<compile_context>
chip_gen: v5e
topology: v5e:2x2
jax: 0.10.0
libtpu: 0.0.40
codegen_flags: <defaults>
</compile_context>

<pallas_src>
import functools

import jax
import jax.numpy as jnp
import numpy as np
from jax.experimental import pallas as pl
from jax.experimental.pallas import tpu as pltpu


def _pointnet_s_kernel(
    x_ref,                      # (1, 3,   TN)  source points tile (BCN, bf16)
    f0_ref, f1_ref, f2_ref,     # (1, 64,  TN)  fusion features (BCN, bf16)
    f3_ref,                     # (1, 128, TN)
    f4_ref,                     # (1, EMB, TN)
    w1_ref, b1_ref,             # (64, 3)  bf16, (64, 1)  f32
    w2_ref, b2_ref,             # (64, 64),      (64, 1)
    w3_ref, b3_ref,             # (64, 64),      (64, 1)
    w4_ref, b4_ref,             # (128, 64),     (128, 1)
    w5_ref, b5_ref,             # (EMB, 128),    (EMB, 1)
    o_ref,                      # (1, EMB, TN) bf16
):
    # TODO(synk): if v5e profiling ever shows the MXU as the binding slot, the
    # first K=3 matmul can be moved to the VPU as 3 broadcast multiply-adds.
    h = x_ref[0]  # (3, TN) bf16; points on lanes, channels on sublanes.
    layers = (
        (w1_ref, b1_ref, f0_ref),
        (w2_ref, b2_ref, f1_ref),
        (w3_ref, b3_ref, f2_ref),
        (w4_ref, b4_ref, f3_ref),
        (w5_ref, b5_ref, f4_ref),
    )
    for w_ref, b_ref, f_ref in layers:
        # 1x1 Conv1d on the MXU: (C_out, C_in) @ (C_in, TN), f32 accumulate.
        y = jnp.dot(w_ref[...], h, preferred_element_type=jnp.float32)
        y = y + b_ref[...]                                       # f32 bias
        y = jnp.maximum(y, 0.0) + f_ref[0].astype(jnp.float32)   # relu + fusion(add)
        h = y.astype(jnp.bfloat16)   # bf16 operand for next matmul / output store
    o_ref[0] = h


def _vmem_capacity_bytes():
    try:
        return int(pltpu.get_tpu_info().vmem_capacity_bytes)
    except Exception:
        return 64 * 1024 * 1024  # conservative fallback = v7x per-core VMEM


@functools.partial(jax.jit, static_argnames=("input_shape", "tile_n"))
def pointnet_s_forward(source, featureT_bcn, params, *, input_shape="bnc",
                       tile_n=2048):
    """PointNetS forward.

    source: (B, N, 3) if input_shape=='bnc', else (B, 3, N).
    featureT_bcn: tuple of 5 arrays in BCN layout with channels 64,64,64,128,emb
      (ideally already bf16 so no extra HBM conversion pass is needed).
    params: list of (weight (C_out, C_in), bias (C_out,)) per conv layer.
    Returns (B, emb_dims, N) bf16, matching the PyTorch module's BCN output.
    """
    if input_shape == "bnc":
        source_bcn = jnp.transpose(source, (0, 2, 1))   # cheap: only 3 channels
    elif input_shape == "bcn":
        source_bcn = source
    else:
        raise ValueError("Allowed shapes are 'bcn' and 'bnc'")
    source_bcn = source_bcn.astype(jnp.bfloat16)
    B, _, N = source_bcn.shape

    (w1, b1), (w2, b2), (w3, b3), (w4, b4), (w5, b5) = params
    emb = w5.shape[0]
    ch = [64, 64, 64, 128, emb]
    in_ch_total = 3 + 64 * 3 + 128 + emb

    # Features/output move in bf16 (dominant HBM traffic); weights bf16 for MXU
    # rate; biases stay f32 (added after the f32 accumulation).
    feats = tuple(jnp.asarray(f, jnp.bfloat16) for f in featureT_bcn)
    weight_args = []
    for w, bb in params:
        weight_args += [w.astype(jnp.bfloat16),
                        bb.reshape(-1, 1).astype(jnp.float32)]

    # ---- generation-aware VMEM budget -> point-tile size -------------------
    vmem_cap = _vmem_capacity_bytes()               # 64 MiB v7x, 128 MiB v5e/v6e
    usable = max(min(vmem_cap - (16 << 20), 96 << 20), 32 << 20)
    # double-buffered bf16 weights + f32 biases (constant index_map, DMA'd once)
    w_vmem = 2 * sum(int(np.prod(w.shape)) * 2 + int(w.shape[0]) * 4
                     for w, _ in params)
    # per-point bytes: double-buffered bf16 in/out tiles + f32 in-kernel temps
    per_point = 2 * (in_ch_total + emb) * 2 + (2 * emb + 128) * 4
    budget_tn = max(128, int((usable - w_vmem - (8 << 20)) // per_point))

    tn = min(tile_n, N, budget_tn)
    if tn < N:
        tn = max(128, (tn // 128) * 128)   # keep the lane axis 128-aligned
    else:
        tn = N                             # single full-extent tile is always legal
    n_tiles = pl.cdiv(N, tn)

    # v7x megacore: make sure both TensorCores get at least one unit of work.
    if B * n_tiles < 2 and N >= 256:
        half = -(-N // 2)
        tn = ((half + 127) // 128) * 128
        n_tiles = pl.cdiv(N, tn)

    grid = (B, n_tiles)

    def tile_map(b, n):
        return (b, 0, n)

    def full_map(b, n):
        return (0, 0)

    in_specs = [pl.BlockSpec((1, 3, tn), tile_map)]
    in_specs += [pl.BlockSpec((1, c, tn), tile_map) for c in ch]
    for w, bb in params:
        in_specs += [
            pl.BlockSpec(w.shape, full_map),
            pl.BlockSpec((bb.shape[0], 1), full_map),
        ]

    io_vmem = 2 * (in_ch_total + emb) * tn * 2
    interm_vmem = (2 * emb + 128) * tn * 4
    vmem_limit = int(min(io_vmem + w_vmem + interm_vmem + (8 << 20), usable))

    flops = 2 * B * N * (3 * 64 + 64 * 64 + 64 * 64 + 64 * 128 + 128 * emb)
    bytes_accessed = B * N * (in_ch_total + emb) * 2 + w_vmem // 2
    cost = pl.CostEstimate(flops=flops, transcendentals=0,
                           bytes_accessed=bytes_accessed)

    out = pl.pallas_call(
        _pointnet_s_kernel,
        out_shape=jax.ShapeDtypeStruct((B, emb, N), jnp.bfloat16),
        grid_spec=pltpu.PrefetchScalarGridSpec(
            num_scalar_prefetch=0,
            grid=grid,
            in_specs=in_specs,
            out_specs=pl.BlockSpec((1, emb, tn), tile_map),
        ),
        compiler_params=pltpu.CompilerParams(
            dimension_semantics=("parallel", "parallel"),
            vmem_limit_bytes=vmem_limit,
        ),
        cost_estimate=cost,
    )(source_bcn, *feats, *weight_args)

    return out  # (B, emb, N) — PyTorch BCN output layout, no transpose needed.


def _reference_forward(source_bnc, featureT_bcn, params):
    """Pure-JAX reference mirroring the PyTorch forward (and the kernel's bf16
    operand/storage rounding, so it can be compared with a tight tolerance)."""
    x = jnp.transpose(source_bnc, (0, 2, 1)).astype(jnp.bfloat16)  # (B, 3, N)
    for (w, b), f in zip(params, featureT_bcn):
        # 1x1 Conv1d: out[b, o, n] = sum_c W[o, c] * x[b, c, n] + bias[o]
        y = jnp.einsum("oc,bcn->bon", w.astype(jnp.bfloat16), x,
                       preferred_element_type=jnp.float32)
        y = y + b.astype(jnp.float32)[None, :, None]
        y = jnp.maximum(y, 0.0) + f.astype(jnp.float32)   # relu + fusion (add)
        x = y.astype(jnp.bfloat16)
    return x.astype(jnp.float32)


def _init_params(key, emb_dims):
    # Conv1d weights stored as (C_out, C_in), matching PyTorch's (C_out, C_in, 1).
    dims = [(3, 64), (64, 64), (64, 64), (64, 128), (128, emb_dims)]
    params = []
    for i, (cin, cout) in enumerate(dims):
        kw, kb = jax.random.split(jax.random.fold_in(key, i))
        scale = 1.0 / np.sqrt(cin)
        w = jax.random.uniform(kw, (cout, cin), jnp.float32, -scale, scale)
        b = jax.random.uniform(kb, (cout,), jnp.float32, -scale, scale)
        params.append((w, b))
    return params


if __name__ == "__main__":
    key = jax.random.PRNGKey(0)
    B, N, emb_dims = 2, 512, 256  # small demo shapes; emb_dims is a hyper-param

    k_src, k_f, k_p = jax.random.split(key, 3)
    source = jax.random.normal(k_src, (B, N, 3), jnp.float32)  # 'bnc' input

    feat_ch = [64, 64, 64, 128, emb_dims]
    # Fusion features arrive in bf16 (half the HBM traffic for the kernel).
    featureT = tuple(
        jax.random.normal(jax.random.fold_in(k_f, i), (B, c, N),
                          jnp.float32).astype(jnp.bfloat16)
        for i, c in enumerate(feat_ch)
    )

    params = _init_params(k_p, emb_dims)

    out = pointnet_s_forward(source, featureT, params)
    out = jax.block_until_ready(out)
    assert out.shape == (B, emb_dims, N)
    assert out.dtype == jnp.bfloat16

    ref = jax.block_until_ready(_reference_forward(source, featureT, params))
    np.testing.assert_allclose(np.asarray(out.astype(jnp.float32)),
                               np.asarray(ref), rtol=1e-2, atol=1e-2)

    print("KERNEL_OK")
</pallas_src>

<mosaic_0001>
module attributes {stable_mosaic.version = 11 : i64} {
  func.func @_pointnet_s_kernel(%arg0: i32, %arg1: i32, %arg2: memref<1x3x512xbf16, #tpu.memory_space<vmem>>, %arg3: memref<1x64x512xbf16, #tpu.memory_space<vmem>>, %arg4: memref<1x64x512xbf16, #tpu.memory_space<vmem>>, %arg5: memref<1x64x512xbf16, #tpu.memory_space<vmem>>, %arg6: memref<1x128x512xbf16, #tpu.memory_space<vmem>>, %arg7: memref<1x256x512xbf16, #tpu.memory_space<vmem>>, %arg8: memref<64x3xbf16, #tpu.memory_space<vmem>>, %arg9: memref<64x1xf32, #tpu.memory_space<vmem>>, %arg10: memref<64x64xbf16, #tpu.memory_space<vmem>>, %arg11: memref<64x1xf32, #tpu.memory_space<vmem>>, %arg12: memref<64x64xbf16, #tpu.memory_space<vmem>>, %arg13: memref<64x1xf32, #tpu.memory_space<vmem>>, %arg14: memref<128x64xbf16, #tpu.memory_space<vmem>>, %arg15: memref<128x1xf32, #tpu.memory_space<vmem>>, %arg16: memref<256x128xbf16, #tpu.memory_space<vmem>>, %arg17: memref<256x1xf32, #tpu.memory_space<vmem>>, %arg18: memref<1x256x512xbf16, #tpu.memory_space<vmem>>) attributes {dimension_semantics = [#tpu.dimension_semantics<parallel>, #tpu.dimension_semantics<parallel>], iteration_bounds = array<i64: 2, 1>, scalar_prefetch = 0 : i64, scratch_operands = 0 : i64, tpu.core_type = #tpu.core_type<tc>, window_params = [{transform_indices = @transform_0, window_bounds = array<i64: 1, 3, 512>}, {transform_indices = @transform_1, window_bounds = array<i64: 1, 64, 512>}, {transform_indices = @transform_2, window_bounds = array<i64: 1, 64, 512>}, {transform_indices = @transform_3, window_bounds = array<i64: 1, 64, 512>}, {transform_indices = @transform_4, window_bounds = array<i64: 1, 128, 512>}, {transform_indices = @transform_5, window_bounds = array<i64: 1, 256, 512>}, {pipeline_mode = #tpu.pipeline_mode<synchronous>, transform_indices = @transform_6, window_bounds = array<i64: 64, 3>}, {pipeline_mode = #tpu.pipeline_mode<synchronous>, transform_indices = @transform_7, window_bounds = array<i64: 64, 1>}, {pipeline_mode = #tpu.pipeline_mode<synchronous>, transform_indices = @transform_8, window_bounds = array<i64: 64, 64>}, {pipeline_mode = #tpu.pipeline_mode<synchronous>, transform_indices = @transform_9, window_bounds = array<i64: 64, 1>}, {pipeline_mode = #tpu.pipeline_mode<synchronous>, transform_indices = @transform_10, window_bounds = array<i64: 64, 64>}, {pipeline_mode = #tpu.pipeline_mode<synchronous>, transform_indices = @transform_11, window_bounds = array<i64: 64, 1>}, {pipeline_mode = #tpu.pipeline_mode<synchronous>, transform_indices = @transform_12, window_bounds = array<i64: 128, 64>}, {pipeline_mode = #tpu.pipeline_mode<synchronous>, transform_indices = @transform_13, window_bounds = array<i64: 128, 1>}, {pipeline_mode = #tpu.pipeline_mode<synchronous>, transform_indices = @transform_14, window_bounds = array<i64: 256, 128>}, {pipeline_mode = #tpu.pipeline_mode<synchronous>, transform_indices = @transform_15, window_bounds = array<i64: 256, 1>}, {transform_indices = @transform_16, window_bounds = array<i64: 1, 256, 512>}]} {
    %c0 = arith.constant 0 : index
    %c0_0 = arith.constant 0 : index
    %c0_1 = arith.constant 0 : index
    %0 = vector.load %arg2[%c0, %c0_0, %c0_1] : memref<1x3x512xbf16, #tpu.memory_space<vmem>>, vector<1x3x512xbf16>
    %1 = vector.shape_cast %0 : vector<1x3x512xbf16> to vector<3x512xbf16>
    %c0_2 = arith.constant 0 : index
    %c0_3 = arith.constant 0 : index
    %2 = vector.load %arg8[%c0_2, %c0_3] : memref<64x3xbf16, #tpu.memory_space<vmem>>, vector<64x3xbf16>
    %cst = arith.constant dense<0.000000e+00> : vector<64x512xf32>
    %3 = tpu.matmul %2, %1, %cst {dimension_numbers = #tpu.dot_dimension_numbers<[1], [0], [0], [1], [0, 0, 1, 1], [], []>} : vector<64x3xbf16>, vector<3x512xbf16>, vector<64x512xf32> -> vector<64x512xf32>
    %c0_4 = arith.constant 0 : index
    %c0_5 = arith.constant 0 : index
    %4 = vector.load %arg9[%c0_4, %c0_5] : memref<64x1xf32, #tpu.memory_space<vmem>>, vector<64x1xf32>
    %5 = vector.broadcast %4 : vector<64x1xf32> to vector<64x512xf32>
    %6 = arith.addf %3, %5 : vector<64x512xf32>
    %cst_6 = arith.constant 0.000000e+00 : f32
    %7 = vector.broadcast %cst_6 : f32 to vector<64x512xf32>
    %8 = arith.maximumf %6, %7 : vector<64x512xf32>
    %c0_7 = arith.constant 0 : index
    %c0_8 = arith.constant 0 : index
    %c0_9 = arith.constant 0 : index
    %9 = vector.load %arg3[%c0_7, %c0_8, %c0_9] : memref<1x64x512xbf16, #tpu.memory_space<vmem>>, vector<1x64x512xbf16>
    %10 = vector.shape_cast %9 : vector<1x64x512xbf16> to vector<64x512xbf16>
    %11 = arith.extf %10 : vector<64x512xbf16> to vector<64x512xf32>
    %12 = arith.addf %8, %11 : vector<64x512xf32>
    %13 = arith.truncf %12 : vector<64x512xf32> to vector<64x512xbf16>
    %c0_10 = arith.constant 0 : index
    %c0_11 = arith.constant 0 : index
    %14 = vector.load %arg10[%c0_10, %c0_11] : memref<64x64xbf16, #tpu.memory_space<vmem>>, vector<64x64xbf16>
    %cst_12 = arith.constant dense<0.000000e+00> : vector<64x512xf32>
    %15 = tpu.matmul %14, %13, %cst_12 {dimension_numbers = #tpu.dot_dimension_numbers<[1], [0], [0], [1], [0, 0, 1, 1], [], []>} : vector<64x64xbf16>, vector<64x512xbf16>, vector<64x512xf32> -> vector<64x512xf32>
    %c0_13 = arith.constant 0 : index
    %c0_14 = arith.constant 0 : index
    %16 = vector.load %arg11[%c0_13, %c0_14] : memref<64x1xf32, #tpu.memory_space<vmem>>, vector<64x1xf32>
    %17 = vector.broadcast %16 : vector<64x1xf32> to vector<64x512xf32>
    %18 = arith.addf %15, %17 : vector<64x512xf32>
    %cst_15 = arith.constant 0.000000e+00 : f32
    %19 = vector.broadcast %cst_15 : f32 to vector<64x512xf32>
    %20 = arith.maximumf %18, %19 : vector<64x512xf32>
    %c0_16 = arith.constant 0 : index
    %c0_17 = arith.constant 0 : index
    %c0_18 = arith.constant 0 : index
    %21 = vector.load %arg4[%c0_16, %c0_17, %c0_18] : memref<1x64x512xbf16, #tpu.memory_space<vmem>>, vector<1x64x512xbf16>
    %22 = vector.shape_cast %21 : vector<1x64x512xbf16> to vector<64x512xbf16>
    %23 = arith.extf %22 : vector<64x512xbf16> to vector<64x512xf32>
    %24 = arith.addf %20, %23 : vector<64x512xf32>
    %25 = arith.truncf %24 : vector<64x512xf32> to vector<64x512xbf16>
    %c0_19 = arith.constant 0 : index
    %c0_20 = arith.constant 0 : index
    %26 = vector.load %arg12[%c0_19, %c0_20] : memref<64x64xbf16, #tpu.memory_space<vmem>>, vector<64x64xbf16>
    %cst_21 = arith.constant dense<0.000000e+00> : vector<64x512xf32>
    %27 = tpu.matmul %26, %25, %cst_21 {dimension_numbers = #tpu.dot_dimension_numbers<[1], [0], [0], [1], [0, 0, 1, 1], [], []>} : vector<64x64xbf16>, vector<64x512xbf16>, vector<64x512xf32> -> vector<64x512xf32>
    %c0_22 = arith.constant 0 : index
    %c0_23 = arith.constant 0 : index
    %28 = vector.load %arg13[%c0_22, %c0_23] : memref<64x1xf32, #tpu.memory_space<vmem>>, vector<64x1xf32>
    %29 = vector.broadcast %28 : vector<64x1xf32> to vector<64x512xf32>
    %30 = arith.addf %27, %29 : vector<64x512xf32>
    %cst_24 = arith.constant 0.000000e+00 : f32
    %31 = vector.broadcast %cst_24 : f32 to vector<64x512xf32>
    %32 = arith.maximumf %30, %31 : vector<64x512xf32>
    %c0_25 = arith.constant 0 : index
    %c0_26 = arith.constant 0 : index
    %c0_27 = arith.constant 0 : index
    %33 = vector.load %arg5[%c0_25, %c0_26, %c0_27] : memref<1x64x512xbf16, #tpu.memory_space<vmem>>, vector<1x64x512xbf16>
    %34 = vector.shape_cast %33 : vector<1x64x512xbf16> to vector<64x512xbf16>
    %35 = arith.extf %34 : vector<64x512xbf16> to vector<64x512xf32>
    %36 = arith.addf %32, %35 : vector<64x512xf32>
    %37 = arith.truncf %36 : vector<64x512xf32> to vector<64x512xbf16>
    %c0_28 = arith.constant 0 : index
    %c0_29 = arith.constant 0 : index
    %38 = vector.load %arg14[%c0_28, %c0_29] : memref<128x64xbf16, #tpu.memory_space<vmem>>, vector<128x64xbf16>
    %cst_30 = arith.constant dense<0.000000e+00> : vector<128x512xf32>
    %39 = tpu.matmul %38, %37, %cst_30 {dimension_numbers = #tpu.dot_dimension_numbers<[1], [0], [0], [1], [0, 0, 1, 1], [], []>} : vector<128x64xbf16>, vector<64x512xbf16>, vector<128x512xf32> -> vector<128x512xf32>
    %c0_31 = arith.constant 0 : index
    %c0_32 = arith.constant 0 : index
    %40 = vector.load %arg15[%c0_31, %c0_32] : memref<128x1xf32, #tpu.memory_space<vmem>>, vector<128x1xf32>
    %41 = vector.broadcast %40 : vector<128x1xf32> to vector<128x512xf32>
    %42 = arith.addf %39, %41 : vector<128x512xf32>
    %cst_33 = arith.constant 0.000000e+00 : f32
    %43 = vector.broadcast %cst_33 : f32 to vector<128x512xf32>
    %44 = arith.maximumf %42, %43 : vector<128x512xf32>
    %c0_34 = arith.constant 0 : index
    %c0_35 = arith.constant 0 : index
    %c0_36 = arith.constant 0 : index
    %45 = vector.load %arg6[%c0_34, %c0_35, %c0_36] : memref<1x128x512xbf16, #tpu.memory_space<vmem>>, vector<1x128x512xbf16>
    %46 = vector.shape_cast %45 : vector<1x128x512xbf16> to vector<128x512xbf16>
    %47 = arith.extf %46 : vector<128x512xbf16> to vector<128x512xf32>
    %48 = arith.addf %44, %47 : vector<128x512xf32>
    %49 = arith.truncf %48 : vector<128x512xf32> to vector<128x512xbf16>
    %c0_37 = arith.constant 0 : index
    %c0_38 = arith.constant 0 : index
    %50 = vector.load %arg16[%c0_37, %c0_38] : memref<256x128xbf16, #tpu.memory_space<vmem>>, vector<256x128xbf16>
    %cst_39 = arith.constant dense<0.000000e+00> : vector<256x512xf32>
    %51 = tpu.matmul %50, %49, %cst_39 {dimension_numbers = #tpu.dot_dimension_numbers<[1], [0], [0], [1], [0, 0, 1, 1], [], []>} : vector<256x128xbf16>, vector<128x512xbf16>, vector<256x512xf32> -> vector<256x512xf32>
    %c0_40 = arith.constant 0 : index
    %c0_41 = arith.constant 0 : index
    %52 = vector.load %arg17[%c0_40, %c0_41] : memref<256x1xf32, #tpu.memory_space<vmem>>, vector<256x1xf32>
    %53 = vector.broadcast %52 : vector<256x1xf32> to vector<256x512xf32>
    %54 = arith.addf %51, %53 : vector<256x512xf32>
    %cst_42 = arith.constant 0.000000e+00 : f32
    %55 = vector.broadcast %cst_42 : f32 to vector<256x512xf32>
    %56 = arith.maximumf %54, %55 : vector<256x512xf32>
    %c0_43 = arith.constant 0 : index
    %c0_44 = arith.constant 0 : index
    %c0_45 = arith.constant 0 : index
    %57 = vector.load %arg7[%c0_43, %c0_44, %c0_45] : memref<1x256x512xbf16, #tpu.memory_space<vmem>>, vector<1x256x512xbf16>
    %58 = vector.shape_cast %57 : vector<1x256x512xbf16> to vector<256x512xbf16>
    %59 = arith.extf %58 : vector<256x512xbf16> to vector<256x512xf32>
    %60 = arith.addf %56, %59 : vector<256x512xf32>
    %61 = arith.truncf %60 : vector<256x512xf32> to vector<256x512xbf16>
    %c0_46 = arith.constant 0 : index
    %c0_47 = arith.constant 0 : index
    %c0_48 = arith.constant 0 : index
    %62 = vector.load %arg18[%c0_46, %c0_47, %c0_48] : memref<1x256x512xbf16, #tpu.memory_space<vmem>>, vector<1x256x512xbf16>
    %63 = vector.shape_cast %62 : vector<1x256x512xbf16> to vector<256x512xbf16>
    %64 = vector.shape_cast %61 : vector<256x512xbf16> to vector<1x256x512xbf16>
    tpu.vector_store %arg18[%c0_46, %c0_47, %c0_48], %64 {strides = array<i32>} : memref<1x256x512xbf16, #tpu.memory_space<vmem>>, vector<1x256x512xbf16>,
    return
  }
  func.func @transform_0(%arg0: i32, %arg1: i32) -> (i32, i32, i32) {
    %c0_i32 = arith.constant 0 : i32
    %c0_i32_0 = arith.constant 0 : i32
    return %arg0, %c0_i32, %arg1 : i32, i32, i32
  }
  func.func @transform_1(%arg0: i32, %arg1: i32) -> (i32, i32, i32) {
    %c0_i32 = arith.constant 0 : i32
    %c0_i32_0 = arith.constant 0 : i32
    return %arg0, %c0_i32, %arg1 : i32, i32, i32
  }
  func.func @transform_2(%arg0: i32, %arg1: i32) -> (i32, i32, i32) {
    %c0_i32 = arith.constant 0 : i32
    %c0_i32_0 = arith.constant 0 : i32
    return %arg0, %c0_i32, %arg1 : i32, i32, i32
  }
  func.func @transform_3(%arg0: i32, %arg1: i32) -> (i32, i32, i32) {
    %c0_i32 = arith.constant 0 : i32
    %c0_i32_0 = arith.constant 0 : i32
    return %arg0, %c0_i32, %arg1 : i32, i32, i32
  }
  func.func @transform_4(%arg0: i32, %arg1: i32) -> (i32, i32, i32) {
    %c0_i32 = arith.constant 0 : i32
    %c0_i32_0 = arith.constant 0 : i32
    return %arg0, %c0_i32, %arg1 : i32, i32, i32
  }
  func.func @transform_5(%arg0: i32, %arg1: i32) -> (i32, i32, i32) {
    %c0_i32 = arith.constant 0 : i32
    %c0_i32_0 = arith.constant 0 : i32
    return %arg0, %c0_i32, %arg1 : i32, i32, i32
  }
  func.func @transform_6(%arg0: i32, %arg1: i32) -> (i32, i32) {
    %c0_i32 = arith.constant 0 : i32
    %c0_i32_0 = arith.constant 0 : i32
    %c0_i32_1 = arith.constant 0 : i32
    return %c0_i32, %c0_i32_0 : i32, i32
  }
  func.func @transform_7(%arg0: i32, %arg1: i32) -> (i32, i32) {
    %c0_i32 = arith.constant 0 : i32
    %c0_i32_0 = arith.constant 0 : i32
    %c0_i32_1 = arith.constant 0 : i32
    return %c0_i32, %c0_i32_0 : i32, i32
  }
  func.func @transform_8(%arg0: i32, %arg1: i32) -> (i32, i32) {
    %c0_i32 = arith.constant 0 : i32
    %c0_i32_0 = arith.constant 0 : i32
    %c0_i32_1 = arith.constant 0 : i32
    return %c0_i32, %c0_i32_0 : i32, i32
  }
  func.func @transform_9(%arg0: i32, %arg1: i32) -> (i32, i32) {
    %c0_i32 = arith.constant 0 : i32
    %c0_i32_0 = arith.constant 0 : i32
    %c0_i32_1 = arith.constant 0 : i32
    return %c0_i32, %c0_i32_0 : i32, i32
  }
  func.func @transform_10(%arg0: i32, %arg1: i32) -> (i32, i32) {
    %c0_i32 = arith.constant 0 : i32
    %c0_i32_0 = arith.constant 0 : i32
    %c0_i32_1 = arith.constant 0 : i32
    return %c0_i32, %c0_i32_0 : i32, i32
  }
  func.func @transform_11(%arg0: i32, %arg1: i32) -> (i32, i32) {
    %c0_i32 = arith.constant 0 : i32
    %c0_i32_0 = arith.constant 0 : i32
    %c0_i32_1 = arith.constant 0 : i32
    return %c0_i32, %c0_i32_0 : i32, i32
  }
  func.func @transform_12(%arg0: i32, %arg1: i32) -> (i32, i32) {
    %c0_i32 = arith.constant 0 : i32
    %c0_i32_0 = arith.constant 0 : i32
    %c0_i32_1 = arith.constant 0 : i32
    return %c0_i32, %c0_i32_0 : i32, i32
  }
  func.func @transform_13(%arg0: i32, %arg1: i32) -> (i32, i32) {
    %c0_i32 = arith.constant 0 : i32
    %c0_i32_0 = arith.constant 0 : i32
    %c0_i32_1 = arith.constant 0 : i32
    return %c0_i32, %c0_i32_0 : i32, i32
  }
  func.func @transform_14(%arg0: i32, %arg1: i32) -> (i32, i32) {
    %c0_i32 = arith.constant 0 : i32
    %c0_i32_0 = arith.constant 0 : i32
    %c0_i32_1 = arith.constant 0 : i32
    return %c0_i32, %c0_i32_0 : i32, i32
  }
  func.func @transform_15(%arg0: i32, %arg1: i32) -> (i32, i32) {
    %c0_i32 = arith.constant 0 : i32
    %c0_i32_0 = arith.constant 0 : i32
    %c0_i32_1 = arith.constant 0 : i32
    return %c0_i32, %c0_i32_0 : i32, i32
  }
  func.func @transform_16(%arg0: i32, %arg1: i32) -> (i32, i32, i32) {
    %c0_i32 = arith.constant 0 : i32
    %c0_i32_0 = arith.constant 0 : i32
    return %arg0, %c0_i32, %arg1 : i32, i32, i32
  }
}

</mosaic_0001>

<bundles_post_ra>
// kernel: pointnet_s_forward.1
= control target key start
LH: loop header
LB: loop body
LE: loop exit
PB: predicated region body
PF: predicated region fallthrough
CT: control target
= control target key end

     0   :  { %s6447_s0 = inlined_call_operand.vmem [shape: bf16[2,3,512], index: 0, kind: input, shape index: {}]   ;;  %s6448_s1 = inlined_call_operand.vmem [shape: bf16[2,64,512], index: 1, kind: input, shape index: {}]   ;;  %s6449_s2 = inlined_call_operand.hbm [shape: bf16[2,64,512], index: 2, kind: input, shape index: {}]   ;;  %s6450_s3 = inlined_call_operand.hbm [shape: bf16[2,64,512], index: 3, kind: input, shape index: {}]   ;;  %s6451_s4 = inlined_call_operand.hbm [shape: bf16[2,128,512], index: 4, kind: input, shape index: {}]   ;;  %s6452_s5 = inlined_call_operand.vmem [shape: bf16[2,256,512], index: 5, kind: input, shape index: {}]   ;;  %s6453_s6 = inlined_call_operand.vmem [shape: bf16[64,3], index: 6, kind: input, shape index: {}]   ;;  %s6454_s7 = inlined_call_operand.vmem [shape: f32[64,1], index: 7, kind: input, shape index: {}]   ;;  %s6455_s8 = inlined_call_operand.vmem [shape: bf16[64,64], index: 8, kind: input, shape index: {}]   ;;  %s6456_s9 = inlined_call_operand.vmem [shape: f32[64,1], index: 9, kind: input, shape index: {}]   ;;  %s6457_s10 = inlined_call_operand.vmem [shape: bf16[64,64], index: 10, kind: input, shape index: {}]   ;;  %s6458_s11 = inlined_call_operand.vmem [shape: f32[64,1], index: 11, kind: input, shape index: {}]   ;;  %s6459_s12 = inlined_call_operand.vmem [shape: bf16[128,64], index: 12, kind: input, shape index: {}]   ;;  %s6460_s13 = inlined_call_operand.vmem [shape: f32[128,1], index: 13, kind: input, shape index: {}]   ;;  %s6461_s14 = inlined_call_operand.vmem [shape: bf16[256,128], index: 14, kind: input, shape index: {}]   ;;  %s6462_s15 = inlined_call_operand.vmem [shape: f32[256,1], index: 15, kind: input, shape index: {}]   ;;  %s6463_s16 = inlined_call_operand.hbm [shape: bf16[2,256,512], index: 16, kind: output, shape index: {}]  }
   0x1   :  { %6507 = sst [smem:[#allocation59_spill]] %s6447_s0 }
   0x2   :  { %6508 = sst [smem:[#allocation60_spill]] %s6448_s1 }
   0x3   :  { %6509 = sst [smem:[#allocation61_spill]] %s6450_s3 }
   0x4   :  { %6510 = sst [smem:[#allocation62_spill]] %s6452_s5 }
   0x5   :  { %6511 = sst [smem:[#allocation63_spill]] %s6453_s6 }
   0x6   :  { %6512 = sst [smem:[#allocation64_spill]] %s6455_s8 }
   0x7   :  { %6513 = sst [smem:[#allocation65_spill]] %s6456_s9 }
   0x8   :  { %6514 = sst [smem:[#allocation66_spill]] %s6457_s10 }
   0x9   :  { %6515 = sst [smem:[#allocation67_spill]] %s6458_s11 }
   0xa   :  { %6516 = sst [smem:[#allocation68_spill]] %s6459_s12 }
   0xb   :  { %6517 = sst [smem:[#allocation69_spill]] %s6460_s13 }
   0xc   :  { %6518 = sst [smem:[#allocation70_spill]] %s6461_s14 }
   0xd   :  { %6519 = sst [smem:[#allocation71_spill]] %s6462_s15 }
   0xe   :  { %6520 = sst [smem:[#allocation72_spill]] %s6463_s16 }
   0xf   :  { %21 = vsyncpa [#allocation3], 0 }
  0x10   :  { %23 = vsyncpa [#allocation3 + $0x1], 0 }
  0x11   :  { %24 = vsyncpa [#allocation6], 0 }
  0x12   :  { %26 = vsyncpa [#allocation6 + $0x1], 0 }
  0x13   :  { %27 = vsyncpa [#allocation4], 0 }
  0x14   :  { %29 = vsyncpa [#allocation4 + $0x1], 0  ;;  %s4513_s21 = smov 0   ;;  %s4515_s22 = smov 0  }
  0x15   :  { %s4517_s23 = smov 0   ;;  %s4519_s24 = smov 0  }
  0x16   :  { %s4521_s25 = smov 0   ;;  %s4523_s26 = smov 0  }
  0x17 LB: > { %6521 = sst [smem:[#allocation12_spill]] %s4400_s21  ;;  %s4544_s27 = sadd.s32 4294967295, %s4420_s26   ;;  %s4420_s26 = sphi %s4523_s26, %s35_s26   ;;  %s4416_s25 = sphi %s4521_s25, %s6689_s25   ;;  %s4412_s24 = sphi %s4519_s24, %s6688_s24   ;;  %s4408_s23 = sphi %s4517_s23, %s6684_s23   ;;  %s4404_s22 = sphi %s4515_s22, %s6687_s22   ;;  %s4400_s21 = sphi %s4513_s21, %s6686_s21  }
  0x18   : > { %6522 = sst [smem:[#allocation13_spill]] %s4408_s23  ;;  %s3868_s28 = sadd.s32 4294967294, %s4420_s26  }
  0x19   : > { %6523 = sst [smem:[#allocation14_spill]] %s4420_s26  ;;  %s47_s29 = sadd.s32 1, %s4416_s25 }
  0x1a   : > { %s112_s30 = sadd.s32 1, %s4408_s23  ;;  %p49_p0 = scmp.ge.s32.totalorder %s47_s29, 2 }
  0x1b   : > { %p119_p1 = scmp.ne.s32.totalorder %s4408_s23, %s4404_s22  ;;  %p120_p2 = scmp.eq.s32.totalorder %s4420_s26, 0 }
  0x1c   : > { %p125_p3 = scmp.ne.s32.totalorder %s4404_s22, %s4400_s21  ;;  %s6691_s29 = smov (%p49_p0, %s47_s29), 0 }
  0x1d   : > { %6524 = sst [smem:[#allocation15_spill]] %s6691_s29  ;;  %p4556_p4 = por %p120_p2, %p119_p1 }
  0x1e   : > { %p126_p5 = scmp.eq.s32.totalorder %s4544_s27, 0  ;;  %s107_s17 = ssub.s32 %s4416_s25, %s6691_s29 }
  0x1f   : > { %p445_p6 = scmp.eq.s32.totalorder %s4544_s27, 1  ;;  %p110_p7 = scmp.eq.s32.totalorder %s107_s17, 0 }
  0x20   : > { %p4564_p8 = por %p126_p5, %p125_p3  ;;  %p451_p10 = scmp.eq.s32.totalorder %s3868_s28, 1 }
  0x21   : > { %p4568_p9 = por %p445_p6, %p119_p1  ;;  %p3870_p12 = scmp.ge.s32.totalorder %s4420_s26, 2 }
  0x22   : > { %s4573_s20 = scalar_select %p110_p7, %s4408_s23, %s112_s30  }
  0x23   : > { %s6527_s19 = scalar_select %p4568_p9, 1, 0 }
  0x24   : > { %6529 = sst [smem:[#allocation17_spill]] %s4573_s20  ;;  %p4575_p11 = por %p451_p10, %p125_p3 }
  0x25   : > { %6528 = sst [smem:[#allocation16_spill]] %s6527_s19  ;;  %p4185_p13 = scmp.lt.s32.totalorder %s4420_s26, 2 }
  0x26   : > { %s6530_s21 = scalar_select %p4575_p11, 1, 0 }
  0x27   : > { %s4582_s29 = sand.u32 1, %s4408_s23   ;;  %s4120_s16 = sshll.u32 %s4416_s25, 7 }
  0x28   : > { %6531 = sst [smem:[#allocation18_spill]] %s6530_s21  ;;  %s3871_s17 = sshll.u32 %s4582_s29, 7 }
  0x29   : > { %p4588_p0 = pnand %p4185_p13, %p4556_p4  ;;  %s551_s28 = sand.u32 1, %s4420_s26  }
  0x2a   : > { %s6533_s3 = sld [smem:[#allocation61_spill]]  ;;  %s555_s14 = scalar_lea.vmem [#allocation5], %s3871_s17 }
  0x2b   : > { %s565_s12 = sshll.u32 %s555_s14, 4  ;;  %s552_s23 = scalar_lea.sflag [#allocation6], %s551_s28  ;;  %s566_s12 = int_to_ptr.vmem [resolvable:$true] %s565_s12 }
  0x2c   : > { %s4422_s0 = smov 256   ;;  %s4423_s10 = smov 16  }
  0x2d   : > { %p3880_p1 = scmp.ge.s32.totalorder %s4420_s26, 1  ;;  %p610_p2 = scmp.lt.s32.totalorder %s4420_s26, 3 }
  0x2e   : > { %s538_s14 = scalar_lea.hbm %s6449_s2, %s4120_s16  ;;  %s528_s28 = scalar_lea.sflag [#allocation3], %s4582_s29 }
  0x2f   : > { %p4600_p3 = pnand %p3880_p1, %p610_p2  ;;  %s539_s30 = sshll.u32 %s538_s14, 4  ;;  %s540_s30 = int_to_ptr.hbm [resolvable:$true] %s539_s30 }
  0x30   : > { %s562_s21 = scalar_lea.hbm %s6533_s3, %s4120_s16  ;;  %s531_s3 = scalar_lea.vmem [#allocation2], %s3871_s17 }
  0x31   : > { %s563_s19 = sshll.u32 %s562_s21, 4  ;;  %s541_s1 = sshll.u32 %s531_s3, 4  ;;  %s564_s19 = int_to_ptr.hbm [resolvable:$true] %s563_s19  ;;  %s542_s1 = int_to_ptr.vmem [resolvable:$true] %s541_s1 }
  0x32   : > { %4177 = dma.hbm_to_vmem [thread:$0]  (!%p4588_p0), %s564_s19, 2048, %s566_s12, %s552_s23, %s4422_s0, %s4422_s0, %s4423_s10  }
  0x33   : > { %4174 = dma.hbm_to_vmem [thread:$0]  (!%p4588_p0), %s540_s30, 2048, %s542_s1, %s528_s28, %s4422_s0, %s4422_s0, %s4423_s10  }
  0x34   : > { %s3877_s12 = sshll.u32 %s4582_s29, 8  ;;  %s4122_s19 = sshll.u32 %s4416_s25, 8 }
  0x35   : > { %s586_s13 = scalar_lea.hbm %s6451_s4, %s4122_s19  ;;  %s579_s9 = scalar_lea.vmem [#allocation7], %s3877_s12 }
  0x36   : > { %s587_s11 = sshll.u32 %s586_s13, 4  ;;  %s589_s6 = sshll.u32 %s579_s9, 4  ;;  %s588_s11 = int_to_ptr.hbm [resolvable:$true] %s587_s11  ;;  %s590_s6 = int_to_ptr.vmem [resolvable:$true] %s589_s6 }
  0x37   : > { %4180 = dma.hbm_to_vmem [thread:$0]  (!%p4588_p0), %s588_s11, 4096, %s590_s6, %s552_s23, %s4422_s0, %s4422_s0, %s4423_s10  }
  0x38   : > { %614 = sbr.rel (%p4600_p3) target bundleno = 1407 (0x57f), region = 84 }
  0x3d   : > { %s4620_s3 = sand.u32 1, %s4404_s22  }
  0x3e   : > { %s3881_s1 = sshll.u32 %s4620_s3, 7  ;;  %s617_s16 = scalar_lea.sflag [#allocation3], %s4620_s3 }
  0x3f   : > { %s4624_s15 = scalar_lea.vmem [#allocation2], %s3881_s1 }
  0x40   : > { %4387 = dma.done.wait (%p4564_p8), %s617_s16, 2048  }
  0x41   : > { %4389 = vsyncadd (%p4564_p8), %s617_s16, 4294965248  ;;  %s626_s5 = sand.u32 1, %s4544_s27   ;;  %s4631_s8 = scalar_lea.vmem [#allocation5], %s3881_s1 }
  0x42   : > { %s627_s6 = scalar_lea.sflag [#allocation6], %s626_s5 }
  0x43   : > { %4391 = dma.done.wait (%p4564_p8), %s627_s6, 6144  }
  0x44   : > { %4393 = vsyncadd (%p4564_p8), %s627_s6, 4294961152  ;;  %p728_p4 = scmp.lt.s32.totalorder %s4412_s24, 1  ;;  %v4424_v0 = vmov 0   ;;  %s6535_s23 = sld [smem:[#allocation59_spill]]  ;;  %v777_v1 = vld [vmem:[%s6454_s7 + $0x30] sm:$0xff]  ;;  %v775_v2 = vld [vmem:[%s6454_s7 + $0x20] sm:$0xff] }
  0x45   : > { %4243 = vset.pattern.permute.xlu2 %v4424_v0  ;;  %4242 = vset.pattern.permute.xlu1 %v4424_v0  ;;  %v773_v3 = vld [vmem:[%s6454_s7 + $0x10] sm:$0xff]  ;;  %vm858_vm0 = vcmask 1040384   ;;  %vm859_vm1 = vcmask 1041408   ;;  %v4425_v5 = vmov 65535   ;;  %v778_v7 = vld [vmem:[%s6454_s7 + $0x38] sm:$0xff]  ;;  %v776_v8 = vld [vmem:[%s6454_s7 + $0x28] sm:$0xff] }
  0x46   : > { %4241 = vset.pattern.permute.xlu0 %v4424_v0  ;;  %s4639_s9 = scalar_select %p728_p4, %s4412_s24, 1  ;;  %801 = vperm.xlu1 %4242, %v775_v2   ;;  %v860_v6 = vsel %vm858_vm0, 4294967295, %v4425_v5  ;;  %v774_v9 = vld [vmem:[%s6454_s7 + $0x18] sm:$0xff]  ;;  %vm845_vm2 = vcmask 23552   ;;  %v772_v21 = vld [vmem:[%s6454_s7 + $0x8] sm:$0xff]  ;;  %v771_v22 = vld [vmem:[%s6454_s7] sm:$0xff] }
  0x47   : > { %811 = vperm.xlu0 %4241, %v777_v1   ;;  %791 = vperm.xlu2 %4243, %v773_v3   ;;  %v861_v10 = vsel %vm859_vm1, %v860_v6, 0  ;;  %s6536_s5 = sld [smem:[#allocation63_spill]]  ;;  %vm1190_vm3 = vcmask 523264   ;;  %s3883_s16 = sshll.u32 %s4620_s3, 8 }
  0x48   : > { %s4123_s10 = sshll.u32 %s4639_s9, 3  ;;  %s6537_s11 = sld [smem:[#allocation65_spill]] }
  0x49   : > { %s6540_s0 = sld [smem:[#allocation69_spill]]  ;;  %s4124_s28 = sshll.u32 %s4639_s9, 7 }
  0x4a   : > { %s735_s26 = scalar_lea.vmem %s6535_s23, %s4123_s10  ;;  %s6538_s23 = sld [smem:[#allocation67_spill]] }
  0x4b   : > { %v762_v4 = vld [vmem:[%s735_s26] sm:$0xff]  ;;  %s6541_s26 = sld [smem:[#allocation71_spill]] }
  0x4c   : > { %840 = vst [vmem:[#allocation1] ss:$4 sm:$0xff] %v762_v4  ;;  %s6555_s19 = sld [smem:[#allocation64_spill]] }
  0x4d   : > { %v4126_v19 = vld [vmem:[%s6536_s5] sm:$0xff]  ;;  %v4127_v26 = vld [vmem:[%s6536_s5 + $0x8] sm:$0xff]  ;;  %v4128_v33 = vld [vmem:[%s6536_s5 + $0x10] sm:$0xff]  ;;  %s6565_s21 = sld [smem:[#allocation66_spill]] }
  0x4e   : > { %806 = vperm.xlu1 %4242, %v776_v8   ;;  %v1128_v20 = vld [vmem:[%s6537_s11 + $0x30] sm:$0xff]  ;;  %v1127_v23 = vld [vmem:[%s6537_s11 + $0x28] sm:$0xff]  ;;  %v1126_v24 = vld [vmem:[%s6537_s11 + $0x20] sm:$0xff]  ;;  %s6573_s6 = sld [smem:[#allocation68_spill]] }
  0x4f   : > { %816 = vperm.xlu0 %4241, %v778_v7   ;;  %796 = vperm.xlu2 %4243, %v774_v9   ;;  %v1129_v25 = vld [vmem:[%s6537_s11 + $0x38] sm:$0xff]  ;;  %v1122_v27 = vld [vmem:[%s6537_s11] sm:$0xff]  ;;  %v1124_v29 = vld [vmem:[%s6537_s11 + $0x10] sm:$0xff]  ;;  %s6677_s14 = sld [smem:[#allocation62_spill]] }
  0x50   : > { %v1125_v28 = vld [vmem:[%s6537_s11 + $0x18] sm:$0xff]  ;;  %s6539_s27 = smov %s6538_s23  ;;  %v1123_v32 = vld [vmem:[%s6537_s11 + $0x8] sm:$0xff]  ;;  %v1807_v41 = vld [vmem:[%s6540_s0 + $0x60] sm:$0xff]  ;;  %s6678_s13 = sld [smem:[#allocation72_spill]] }
  0x51   : > { %v1462_v30 = vld [vmem:[%s6538_s23 + $0x38] sm:$0xff]  ;;  %v1461_v31 = vld [vmem:[%s6539_s27 + $0x30] sm:$0xff]  ;;  %v1460_v35 = vld [vmem:[%s6539_s27 + $0x28] sm:$0xff]  ;;  %s6542_s29 = smov %s6541_s26  ;;  %s6646_s23 = sld [smem:[#allocation70_spill]] }
  0x52   : > { %v1457_v34 = vld [vmem:[%s6539_s27 + $0x10] sm:$0xff]  ;;  %v1459_v36 = vld [vmem:[%s6539_s27 + $0x20] sm:$0xff]  ;;  %v1456_v37 = vld [vmem:[%s6539_s27 + $0x8] sm:$0xff] }
  0x53   : > { %v841_v11 = vld.sshfl [vmem:[#allocation1] sm:$0xff pattern:$0x73625140]  ;;  %v842_v12 = vld.sshfl [vmem:[#allocation1 + $0x8] sm:$0xff pattern:$0x73625140]  ;;  %s6566_s20 = smov %s6565_s21 }
  0x54   : > { %v862_v13 = vand.u32 %v861_v10, %v841_v11  ;;  %v864_v14 = vand.u32 %v861_v10, %v842_v12  ;;  %v843_v15 = vld.sshfl [vmem:[#allocation1 + $0x10] sm:$0xff pattern:$0x73625140]  ;;  %v844_v16 = vld.sshfl [vmem:[#allocation1 + $0x18] sm:$0xff pattern:$0x73625140] }
  0x55   : > { %v866_v17 = vand.u32 %v861_v10, %v843_v15  ;;  %v868_v18 = vand.u32 %v861_v10, %v844_v16  ;;  %v1455_v38 = vld [vmem:[%s6539_s27] sm:$0xff]  ;;  %v1458_v39 = vld [vmem:[%s6539_s27 + $0x18] sm:$0xff]  ;;  %v1809_v43 = vld [vmem:[%s6540_s0 + $0x70] sm:$0xff] }
  0x56   : > { %877 = vmatpush.bf16.msra.mxu0 %v862_v13  ;;  %906 = vmatpush.bf16.msra.mxu1 %v864_v14  ;;  %v4129_v40 = vld [vmem:[%s6536_s5 + $0x18] sm:$0xff]  ;;  %v1805_v45 = vld [vmem:[%s6540_s0 + $0x50] sm:$0xff]  ;;  %v1808_v46 = vld [vmem:[%s6540_s0 + $0x68] sm:$0xff] }
  0x57   : > { %935 = vmatpush.bf16.msra.mxu2 %v866_v17  ;;  %964 = vmatpush.bf16.msra.mxu3 %v868_v18  ;;  %v1810_v42 = vld [vmem:[%s6540_s0 + $0x78] sm:$0xff]  ;;  %v1801_v47 = vld [vmem:[%s6540_s0 + $0x30] sm:$0xff]  ;;  %v1804_v48 = vld [vmem:[%s6540_s0 + $0x48] sm:$0xff]  ;;  %s6647_s17 = smov %s6646_s23 }
  0x58   : > { %1162 = vperm.xlu2 %4243, %v1128_v20   ;;  %786 = vperm.xlu1 %4242, %v772_v21   ;;  %v1806_v44 = vld [vmem:[%s6540_s0 + $0x58] sm:$0xff]  ;;  %v1803_v49 = vld [vmem:[%s6540_s0 + $0x40] sm:$0xff]  ;;  %v1800_v50 = vld [vmem:[%s6540_s0 + $0x28] sm:$0xff] }
  0x59   : > { %3907 = vmatmul.msk.bf16.vlgmr.msra.gmra.mxu0 %vm845_vm2, %v4126_v19  ;;  %3911 = vmatmul.msk.bf16.vlgmr.msra.gmra.mxu1 %vm845_vm2, %v4126_v19  ;;  %v1799_v51 = vld [vmem:[%s6540_s0 + $0x20] sm:$0xff]  ;;  %v1802_v52 = vld [vmem:[%s6540_s0 + $0x38] sm:$0xff]  ;;  %v1797_v55 = vld [vmem:[%s6540_s0 + $0x10] sm:$0xff] }
  0x5a   : > { %3915 = vmatmul.msk.bf16.vlgmr.msra.gmra.mxu2 %vm845_vm2, %v4126_v19  ;;  %3919 = vmatmul.msk.bf16.vlgmr.msra.gmra.mxu3 %vm845_vm2, %v4126_v19  ;;  %v1795_v53 = vld [vmem:[%s6540_s0] sm:$0xff]  ;;  %v1798_v54 = vld [vmem:[%s6540_s0 + $0x18] sm:$0xff]  ;;  %v2440_v56 = vld [vmem:[%s6541_s26 + $0x8] sm:$0xff]  ;;  %s6543_s26 = sld [smem:[#allocation60_spill]] }
  0x5b   : > { %781 = vperm.xlu0 %4241, %v771_v22   ;;  %v2439_v57 = vld [vmem:[%s6542_s29] sm:$0xff]  ;;  %v1796_v58 = vld [vmem:[%s6540_s0 + $0x8] sm:$0xff]  ;;  %v2442_v60 = vld [vmem:[%s6542_s29 + $0x18] sm:$0xff] }
  0x5c   : > { %v2443_v59 = vld [vmem:[%s6542_s29 + $0x20] sm:$0xff]  ;;  %v2441_v61 = vld [vmem:[%s6542_s29 + $0x10] sm:$0xff]  ;;  %v2446_v62 = vld [vmem:[%s6542_s29 + $0x38] sm:$0xff] }
  0x5d   : > { %v2445_v63 = vld [vmem:[%s6542_s29 + $0x30] sm:$0xff]  ;;  %v2444_v0 = vld [vmem:[%s6542_s29 + $0x28] sm:$0xff]  ;;  %v2447_v4 = vld [vmem:[%s6542_s29 + $0x40] sm:$0xff] }
  0x5e   : > { %v2449_v2 = vld [vmem:[%s6542_s29 + $0x50] sm:$0xff]  ;;  %v2448_v3 = vld [vmem:[%s6542_s29 + $0x48] sm:$0xff]  ;;  %v2451_v8 = vld [vmem:[%s6542_s29 + $0x60] sm:$0xff] }
  0x5f   : > { %v2452_v7 = vld [vmem:[%s6542_s29 + $0x68] sm:$0xff]  ;;  %v2450_v9 = vld [vmem:[%s6542_s29 + $0x58] sm:$0xff]  ;;  %v2455_v19 = vld [vmem:[%s6542_s29 + $0x80] sm:$0xff] }
  0x60   : > { %1157 = vperm.xlu2 %4243, %v1127_v23   ;;  %1152 = vperm.xlu1 %4242, %v1126_v24   ;;  %s4845_s18 = scalar_lea.vmem %s6543_s26, %s4124_s28  ;;  %v2454_v20 = vld [vmem:[%s6542_s29 + $0x78] sm:$0xff]  ;;  %v2453_v22 = vld [vmem:[%s6542_s29 + $0x70] sm:$0xff]  ;;  %s4125_s26 = sshll.u32 %s4639_s9, 9 }
  0x61   : > { %v1018_v10 = vld [vmem:[%s4845_s18] sm:$0xff]  ;;  %s6017_s30 = scalar_lea.vmem %s6677_s14, %s4125_s26  ;;  %s3884_s9 = sshll.u32 %s4620_s3, 9 }
  0x62   : > { %v1034_v15 = vunpack.c.l.bf16 %v1018_v10  ;;  %v1035_v18 = vunpack.c.h.bf16 %v1018_v10  ;;  %s6032_s12 = scalar_lea.vmem [#allocation8], %s3884_s9  ;;  %s4354_s9 = scalar_lea.hbm %s6678_s13, 1024 }
  0x63   : > { %1167 = vperm.xlu0 %4241, %v1129_v25   ;;  %v1019_v25 = vld [vmem:[%s4845_s18 + $0x8] sm:$0xff] }
  0x68   : > { %1132 = vperm.xlu2 %4243, %v1122_v27   ;;  %1147 = vperm.xlu1 %4242, %v1125_v28  }
  0x69   : > { %3908 = vmatmul.msk.bf16.gmra.mxu0 %vm845_vm2, %v4127_v26  ;;  %3912 = vmatmul.msk.bf16.gmra.mxu1 %vm845_vm2, %v4127_v26 }
  0x6a   : > { %3916 = vmatmul.msk.bf16.gmra.mxu2 %vm845_vm2, %v4127_v26  ;;  %3920 = vmatmul.msk.bf16.gmra.mxu3 %vm845_vm2, %v4127_v26 }
  0x6b   : > { %1142 = vperm.xlu0 %4241, %v1124_v29   ;;  %v1020_v29 = vld [vmem:[%s4845_s18 + $0x10] sm:$0xff] }
  0x70   : > { %1500 = vperm.xlu2 %4243, %v1462_v30   ;;  %1495 = vperm.xlu1 %4242, %v1461_v31   ;;  %v1036_v31 = vunpack.c.l.bf16 %v1019_v25 }
  0x73   : > { %1137 = vperm.xlu0 %4241, %v1123_v32  }
  0x78   : > { %1475 = vperm.xlu2 %4243, %v1457_v34   ;;  %1490 = vperm.xlu1 %4242, %v1460_v35  }
  0x79   : > { %3909 = vmatmul.msk.bf16.gmra.mxu0 %vm845_vm2, %v4128_v33  ;;  %3913 = vmatmul.msk.bf16.gmra.mxu1 %vm845_vm2, %v4128_v33 }
  0x7a   : > { %3917 = vmatmul.msk.bf16.gmra.mxu2 %vm845_vm2, %v4128_v33  ;;  %3921 = vmatmul.msk.bf16.gmra.mxu3 %vm845_vm2, %v4128_v33  ;;  %v1037_v33 = vunpack.c.h.bf16 %v1019_v25  ;;  %v2466_v25 = vld [vmem:[%s6542_s29 + $0xd8] sm:$0xff] }
  0x7b   : > { %1485 = vperm.xlu0 %4241, %v1459_v36  }
  0x80   : > { %1470 = vperm.xlu2 %4243, %v1456_v37   ;;  %1465 = vperm.xlu1 %4242, %v1455_v38  }
  0x83   : > { %1480 = vperm.xlu0 %4241, %v1458_v39  }
  0x88   : > { %1873 = vperm.xlu2 %4243, %v1807_v41   ;;  %1888 = vperm.xlu1 %4242, %v1810_v42   ;;  %v2457_v41 = vld [vmem:[%s6542_s29 + $0x90] sm:$0xff]  ;;  %v1038_v42 = vunpack.c.l.bf16 %v1020_v29 }
  0x89   : > { %3910 = vmatmul.msk.bf16.gmra.mxu0 %vm845_vm2, %v4129_v40  ;;  %3914 = vmatmul.msk.bf16.gmra.mxu1 %vm845_vm2, %v4129_v40 }
  0x8a   : > { %3918 = vmatmul.msk.bf16.gmra.mxu2 %vm845_vm2, %v4129_v40  ;;  %3922 = vmatmul.msk.bf16.gmra.mxu3 %vm845_vm2, %v4129_v40  ;;  %v2458_v40 = vld [vmem:[%s6542_s29 + $0x98] sm:$0xff] }
  0x8b   : > { %1883 = vperm.xlu0 %4241, %v1809_v43  }
  0x90   : > { %1868 = vperm.xlu2 %4243, %v1806_v44   ;;  %1863 = vperm.xlu1 %4242, %v1805_v45   ;;  %v2456_v44 = vld [vmem:[%s6542_s29 + $0x88] sm:$0xff]  ;;  %v1039_v45 = vunpack.c.h.bf16 %v1020_v29 }
  0x93   : > { %1878 = vperm.xlu0 %4241, %v1808_v46  }
  0x98   : > { %1843 = vperm.xlu2 %4243, %v1801_v47   ;;  %1858 = vperm.xlu1 %4242, %v1804_v48  }
  0x9b   : > { %1853 = vperm.xlu0 %4241, %v1803_v49   ;;  %v1021_v49 = vld [vmem:[%s4845_s18 + $0x18] sm:$0xff] }
  0xa0   : > { %1838 = vperm.xlu2 %4243, %v1800_v50   ;;  %1833 = vperm.xlu1 %4242, %v1799_v51  }
  0xa3   : > { %1848 = vperm.xlu0 %4241, %v1802_v52  }
  0xa8   : > { %1813 = vperm.xlu2 %4243, %v1795_v53   ;;  %1828 = vperm.xlu1 %4242, %v1798_v54  }
  0xab   : > { %1823 = vperm.xlu0 %4241, %v1797_v55   ;;  %v1040_v55 = vunpack.c.l.bf16 %v1021_v49 }
  0xb0   : > { %2478 = vperm.xlu2 %4243, %v2440_v56   ;;  %2473 = vperm.xlu1 %4242, %v2439_v57  }
  0xb3   : > { %1818 = vperm.xlu0 %4241, %v1796_v58  }
  0xb8   : > { %2493 = vperm.xlu2 %4243, %v2443_v59   ;;  %2488 = vperm.xlu1 %4242, %v2442_v60   ;;  %v4828_v5 = vpop.permute.xlu1 %801  ;;  %v1041_v59 = vunpack.c.h.bf16 %v1021_v49 }
  0xb9   : > { %v4817_v1 = vpop.permute.xlu0 %811 }
  0xbb   : > { %2483 = vperm.xlu0 %4241, %v2441_v61   ;;  %v1033_v61 = vld [vmem:[%s4845_s18 + $0x78] sm:$0xff] }
  0xc0   : > { %2508 = vperm.xlu2 %4243, %v2446_v62   ;;  %2503 = vperm.xlu1 %4242, %v2445_v63   ;;  %v4848_v11 = vpop.permute.xlu1 %806 }
  0xc1   : > { %v4830_v6 = vpop.permute.xlu0 %816 }
  0xc3   : > { %2498 = vperm.xlu0 %4241, %v2444_v0  }
  0xc8   : > { %2523 = vperm.xlu2 %4243, %v2449_v2   ;;  %2518 = vperm.xlu1 %4242, %v2448_v3   ;;  %v2461_v2 = vld [vmem:[%s6542_s29 + $0xb0] sm:$0xff]  ;;  %v2460_v3 = vld [vmem:[%s6542_s29 + $0xa8] sm:$0xff] }
  0xca   : > { %v787_v34 = vpop.permute.xlu1 %786 }
  0xcb   : > { %2513 = vperm.xlu0 %4241, %v2447_v4   ;;  %v2459_v4 = vld [vmem:[%s6542_s29 + $0xa0] sm:$0xff] }
  0xcd   : > { %v782_v12 = vpop.permute.xlu0 %781 }
  0xd0   : > { %2538 = vperm.xlu2 %4243, %v2452_v7   ;;  %2533 = vperm.xlu1 %4242, %v2451_v8  }
  0xd3   : > { %2528 = vperm.xlu0 %4241, %v2450_v9  }
  0xd6   : > { %v879_v13 = vpop.f32.mrf.mxu0  ;;  %v908_v16 = vpop.f32.mrf.mxu1 }
  0xd7   : > { %v880_v14 = vadd.f32 %v879_v13, %v782_v12  ;;  %v909_v17 = vadd.f32 %v908_v16, %v782_v12  ;;  %v2464_v16 = vld [vmem:[%s6542_s29 + $0xc8] sm:$0xff] }
  0xd8   : > { %2553 = vperm.xlu2 %4243, %v2455_v19   ;;  %2548 = vperm.xlu1 %4242, %v2454_v20  }
  0xd9   : > { %v986_v21 = vmax.f32 %v880_v14, 0.0  ;;  %v987_v23 = vmax.f32 %v909_v17, 0.0  ;;  %v2463_v17 = vld [vmem:[%s6542_s29 + $0xc0] sm:$0xff] }
  0xdb   : > { %v4859_v24 = vadd.f32 %v1034_v15, %v986_v21  ;;  %v4862_v26 = vadd.f32 %v1035_v18, %v987_v23  ;;  %2543 = vperm.xlu0 %4241, %v2453_v22   ;;  %v2462_v18 = vld [vmem:[%s6542_s29 + $0xb8] sm:$0xff]  ;;  %v2467_v23 = vld [vmem:[%s6542_s29 + $0xe0] sm:$0xff] }
  0xdd   : > { %v937_v27 = vpop.f32.mrf.mxu2  ;;  %v966_v28 = vpop.f32.mrf.mxu3 }
  0xde   : > { %v938_v30 = vadd.f32 %v937_v27, %v782_v12  ;;  %v967_v32 = vadd.f32 %v966_v28, %v782_v12  ;;  %v881_v35 = vpop.f32.mrf.mxu0  ;;  %v910_v39 = vpop.f32.mrf.mxu1  ;;  %v2465_v27 = vld [vmem:[%s6542_s29 + $0xd0] sm:$0xff] }
  0xdf   : > { %v882_v38 = vadd.f32 %v881_v35, %v787_v34  ;;  %v911_v43 = vadd.f32 %v910_v39, %v787_v34  ;;  %v2468_v35 = vld [vmem:[%s6542_s29 + $0xe8] sm:$0xff]  ;;  %v4947_v39 = vld [vmem:[%s4845_s18 + $0x38] sm:$0xff] }
  0xe0   : > { %v988_v36 = vmax.f32 %v938_v30, 0.0  ;;  %v989_v37 = vmax.f32 %v967_v32, 0.0  ;;  %2568 = vperm.xlu2 %4243, %v2458_v40   ;;  %2563 = vperm.xlu1 %4242, %v2457_v41   ;;  %v792_v30 = vpop.permute.xlu2 %791  ;;  %v4950_v40 = vld [vmem:[%s4845_s18 + $0x40] sm:$0xff]  ;;  %v4953_v41 = vld [vmem:[%s4845_s18 + $0x48] sm:$0xff] }
  0xe1   : > { %v990_v48 = vmax.f32 %v882_v38, 0.0  ;;  %v991_v50 = vmax.f32 %v911_v43, 0.0 }
  0xe2   : > { %v4874_v46 = vadd.f32 %v1036_v31, %v988_v36  ;;  %v4876_v47 = vadd.f32 %v1037_v33, %v989_v37  ;;  %v2470_v33 = vld [vmem:[%s6542_s29 + $0xf8] sm:$0xff]  ;;  %v1022_v37 = vld [vmem:[%s4845_s18 + $0x20] sm:$0xff] }
  0xe3   : > { %2558 = vperm.xlu0 %4241, %v2456_v44   ;;  %v4879_v51 = vadd.f32 %v1038_v42, %v990_v48  ;;  %v4881_v54 = vadd.f32 %v1039_v45, %v991_v50  ;;  %v1042_v44 = vunpack.c.l.bf16 %v1022_v37  ;;  %v1043_v45 = vunpack.c.h.bf16 %v1022_v37  ;;  %v4960_v48 = vld [vmem:[%s4845_s18 + $0x30] sm:$0xff] }
  0xe5   : > { %v939_v52 = vpop.f32.mrf.mxu2  ;;  %v968_v53 = vpop.f32.mrf.mxu3 }
  0xe6   : > { %v940_v56 = vadd.f32 %v939_v52, %v787_v34  ;;  %v969_v57 = vadd.f32 %v968_v53, %v787_v34  ;;  %v884_v60 = vpop.f32.mrf.mxu0  ;;  %v913_v0 = vpop.f32.mrf.mxu1  ;;  %v2469_v34 = vld [vmem:[%s6542_s29 + $0xf0] sm:$0xff]  ;;  %v4963_v53 = vld [vmem:[%s4845_s18 + $0x60] sm:$0xff] }
  0xe7   : > { %v885_v36 = vadd.f32 %v884_v60, %v792_v30  ;;  %v914_v38 = vadd.f32 %v913_v0, %v792_v30  ;;  %v1050_v60 = vunpack.c.l.bf16 %v4950_v40 }
  0xe8   : > { %v992_v62 = vmax.f32 %v940_v56, 0.0  ;;  %v993_v63 = vmax.f32 %v969_v57, 0.0  ;;  %2583 = vperm.xlu2 %4243, %v2461_v2   ;;  %2578 = vperm.xlu1 %4242, %v2460_v3  }
  0xe9   : > { %v994_v49 = vmax.f32 %v885_v36, 0.0  ;;  %v995_v50 = vmax.f32 %v914_v38, 0.0  ;;  %v1032_v36 = vld [vmem:[%s4845_s18 + $0x70] sm:$0xff] }
  0xea   : > { %v4896_v7 = vadd.f32 %v1040_v55, %v992_v62  ;;  %v4898_v8 = vadd.f32 %v1041_v59, %v993_v63  ;;  %v4966_v55 = vld [vmem:[%s4845_s18 + $0x58] sm:$0xff]  ;;  %v4970_v59 = vpop.permute.xlu2 %796  ;;  %v1051_v62 = vunpack.c.h.bf16 %v4950_v40  ;;  %v1063_v58 = vunpack.c.h.bf16 %v1032_v36 }
  0xeb   : > { %2573 = vperm.xlu0 %4241, %v2459_v4  }
  0xed   : > { %v4904_v12 = vpop.f32.mrf.mxu2  ;;  %v4906_v13 = vpop.f32.mrf.mxu3 }
  0xee   : > { %v886_v14 = vpop.f32.mrf.mxu0  ;;  %v915_v15 = vpop.f32.mrf.mxu1  ;;  %v5001_v37 = vadd.f32 %v4906_v13, %v792_v30 }
  0xef   : > { %v4977_v3 = vadd.f32 %v886_v14, %v4970_v59  ;;  %v4980_v4 = vadd.f32 %v915_v15, %v4970_v59  ;;  %v4991_v14 = vadd.f32 %v1042_v44, %v994_v49  ;;  %v4993_v15 = vadd.f32 %v1043_v45, %v995_v50  ;;  %v1028_v44 = vld [vmem:[%s4845_s18 + $0x50] sm:$0xff] }
  0xf0   : > { %2598 = vperm.xlu2 %4243, %v2464_v16   ;;  %2593 = vperm.xlu1 %4242, %v2463_v17   ;;  %v4983_v16 = vld [vmem:[%s4845_s18 + $0x68] sm:$0xff]  ;;  %v1054_v0 = vunpack.c.l.bf16 %v1028_v44 }
  0xf1   : > { %v998_v49 = vmax.f32 %v4977_v3, 0.0  ;;  %v6546_v40 = vunpack.c.h.bf16 %v4983_v16 }
  0xf3   : > { %2588 = vperm.xlu0 %4241, %v2462_v18  }
  0xf5   : > { %v4917_v19 = vpop.f32.mrf.mxu2  ;;  %v4919_v20 = vpop.f32.mrf.mxu3 }
  0xf6   : > { %v889_v21 = vpop.f32.mrf.mxu0  ;;  %v4921_v22 = vpop.f32.mrf.mxu1  ;;  %v5016_v57 = vadd.f32 %v4917_v19, %v4970_v59 }
  0xf8   : > { %2613 = vperm.xlu2 %4243, %v2467_v23   ;;  %2608 = vperm.xlu1 %4242, %v2466_v25   ;;  %v890_v23 = vadd.f32 %v889_v21, %v4828_v5  ;;  %v1058_v25 = vunpack.c.l.bf16 %v4963_v53 }
  0xfa   : > { %v1002_v13 = vmax.f32 %v890_v23, 0.0  ;;  %v1065_v23 = vunpack.c.h.bf16 %v1033_v61 }
  0xfb   : > { %2603 = vperm.xlu0 %4241, %v2465_v27   ;;  %v1064_v27 = vunpack.c.l.bf16 %v1033_v61 }
  0xfc   : > { %v1082_v10 = vadd.f32 %v1050_v60, %v1002_v13 }
  0xfd   : > { %v4932_v28 = vpop.f32.mrf.mxu2  ;;  %v4934_v29 = vpop.f32.mrf.mxu3 }
  0xfe   : > { %v891_v31 = vpop.f32.mrf.mxu0  ;;  %v920_v32 = vpop.f32.mrf.mxu1 }
  0xff   : > { %v921_v3 = vadd.f32 %v920_v32, %v4848_v11 }
 0x100   : > { %2628 = vperm.xlu2 %4243, %v2470_v33   ;;  %2623 = vperm.xlu1 %4242, %v2469_v34   ;;  %v4996_v34 = vadd.f32 %v4904_v12, %v792_v30  ;;  %v892_v12 = vadd.f32 %v891_v31, %v4848_v11  ;;  %v919_v30 = vadd.f32 %v4921_v22, %v4828_v5  ;;  %v1055_v31 = vunpack.c.h.bf16 %v1028_v44 }
 0x101   : > { %v948_v44 = vadd.f32 %v4932_v28, %v4828_v5 }
 0x102   : > { %v1006_v18 = vmax.f32 %v892_v12, 0.0  ;;  %v1003_v19 = vmax.f32 %v919_v30, 0.0 }
 0x103   : > { %2618 = vperm.xlu0 %4241, %v2468_v35   ;;  %v1059_v35 = vunpack.c.h.bf16 %v4963_v53 }
 0x104   : > { %v1086_v30 = vadd.f32 %v1054_v0, %v1006_v18  ;;  %v1004_v0 = vmax.f32 %v948_v44, 0.0 }
 0x105   : > { %v4955_v42 = vpop.f32.mrf.mxu2  ;;  %v4957_v43 = vpop.f32.mrf.mxu3 }
 0x106   : > { %v894_v52 = vpop.f32.mrf.mxu0  ;;  %v923_v2 = vpop.f32.mrf.mxu1  ;;  %v950_v61 = vadd.f32 %v4955_v42, %v4848_v11  ;;  %v979_v12 = vadd.f32 %v4957_v43, %v4848_v11  ;;  %v974_v42 = vadd.f32 %v4919_v20, %v4970_v59  ;;  %v1083_v11 = vadd.f32 %v1051_v62, %v1003_v19 }
 0x107   : > { %v895_v21 = vadd.f32 %v894_v52, %v4817_v1  ;;  %v924_v50 = vadd.f32 %v923_v2, %v4817_v1  ;;  %v1062_v52 = vunpack.c.l.bf16 %v1032_v36  ;;  %v1106_v18 = vpack.c.bf16 %v1086_v30, %v1082_v10 }
 0x108   : > { %v6545_v20 = vunpack.c.l.bf16 %v4983_v16  ;;  %v6548_v10 = vunpack.c.h.bf16 %v4960_v48  ;;  %v6550_v16 = vunpack.c.h.bf16 %v4966_v55 }
 0x109   : > { %v1010_v63 = vmax.f32 %v895_v21, 0.0  ;;  %v1011_v45 = vmax.f32 %v924_v50, 0.0  ;;  %v1007_v21 = vmax.f32 %v921_v3, 0.0 }
 0x10b   : > { %v1091_v50 = vadd.f32 %v1059_v35, %v1011_v45  ;;  %v1009_v35 = vmax.f32 %v979_v12, 0.0 }
 0x10d   : > { %v952_v53 = vpop.f32.mrf.mxu2  ;;  %v981_v9 = vpop.f32.mrf.mxu3  ;;  %v1089_v12 = vadd.f32 %v6550_v16, %v1009_v35 }
 0x10e   : > { %v896_v56 = vpop.f32.mrf.mxu0  ;;  %v925_v33 = vpop.f32.mrf.mxu1  ;;  %v953_v22 = vadd.f32 %v952_v53, %v4817_v1  ;;  %v982_v38 = vadd.f32 %v981_v9, %v4817_v1 }
 0x10f   : > { %v897_v2 = vadd.f32 %v896_v56, %v4830_v6  ;;  %v926_v36 = vadd.f32 %v925_v33, %v4830_v6  ;;  %v977_v56 = vadd.f32 %v4934_v29, %v4828_v5  ;;  %v1090_v33 = vadd.f32 %v1058_v25, %v1010_v63 }
 0x110   : > { %v1012_v53 = vmax.f32 %v953_v22, 0.0  ;;  %v1013_v28 = vmax.f32 %v982_v38, 0.0  ;;  %v1087_v63 = vadd.f32 %v1055_v31, %v1007_v21  ;;  %v1008_v25 = vmax.f32 %v950_v61, 0.0 }
 0x111   : > { %v1014_v32 = vmax.f32 %v897_v2, 0.0  ;;  %v1015_v17 = vmax.f32 %v926_v36, 0.0  ;;  %v1000_v22 = vmax.f32 %v5016_v57, 0.0  ;;  %v1001_v36 = vmax.f32 %v974_v42, 0.0 }
 0x112   : > { %v1092_v59 = vadd.f32 %v6545_v20, %v1012_v53  ;;  %v1093_v62 = vadd.f32 %v6546_v40, %v1013_v28  ;;  %v1107_v19 = vpack.c.bf16 %v1087_v63, %v1083_v11  ;;  %v6549_v21 = vunpack.c.l.bf16 %v4966_v55 }
 0x113   : > { %v1094_v60 = vadd.f32 %v1062_v52, %v1014_v32  ;;  %v1095_v13 = vadd.f32 %v1063_v58, %v1015_v17  ;;  %v1005_v17 = vmax.f32 %v977_v56, 0.0  ;;  %v1023_v52 = vld [vmem:[%s4845_s18 + $0x28] sm:$0xff]  ;;  %v6547_v32 = vmax.f32 %v4980_v4, 0.0 }
 0x114   : > { %v1088_v61 = vadd.f32 %v6549_v21, %v1008_v25  ;;  %v1045_v57 = vunpack.c.h.bf16 %v1023_v52  ;;  %v6551_v4 = vunpack.c.l.bf16 %v4953_v41 }
 0x115   : > { %v954_v1 = vpop.f32.mrf.mxu2  ;;  %v983_v9 = vpop.f32.mrf.mxu3  ;;  %v1110_v29 = vpack.c.bf16 %v1094_v60, %v1090_v33  ;;  %v1111_v43 = vpack.c.bf16 %v1095_v13, %v1091_v50  ;;  %v1079_v44 = vadd.f32 %v6548_v10, %v6547_v32  ;;  %v997_v33 = vmax.f32 %v5001_v37, 0.0 }
 0x116   : > { %v955_v2 = vadd.f32 %v954_v1, %v4830_v6  ;;  %v984_v5 = vadd.f32 %v983_v9, %v4830_v6  ;;  %v6544_v6 = vunpack.c.l.bf16 %v4960_v48  ;;  %v1084_v48 = vadd.f32 %v6551_v4, %v1004_v0 }
 0x117   : > { %1207 = vmatpush.bf16.msrb.mxu0 %v1110_v29  ;;  %1236 = vmatpush.bf16.msrb.mxu1 %v1111_v43  ;;  %v6552_v60 = vunpack.c.h.bf16 %v4953_v41  ;;  %v1103_v55 = vpack.c.bf16 %v1079_v44, %v4993_v15  ;;  %v6553_v9 = vunpack.c.l.bf16 %v4947_v39  ;;  %v6554_v37 = vunpack.c.h.bf16 %v4947_v39  ;;  %v4130_v41 = vld [vmem:[%s6555_s19] sm:$0xff]  ;;  %v5143_v44 = vpop.permute.xlu1 %1152 }
 0x118   : > { %v1016_v45 = vmax.f32 %v955_v2, 0.0  ;;  %v1017_v58 = vmax.f32 %v984_v5, 0.0  ;;  %v1078_v38 = vadd.f32 %v6544_v6, %v998_v49  ;;  %v1108_v1 = vpack.c.bf16 %v1088_v61, %v1084_v48  ;;  %v5157_v48 = vld [vmem:[%s4624_s15 + $0x40] sm:$0xff] }
 0x119   : > { %v1085_v50 = vadd.f32 %v6552_v60, %v1005_v17  ;;  %v1080_v13 = vadd.f32 %v6553_v9, %v1000_v22  ;;  %v1081_v30 = vadd.f32 %v6554_v37, %v1001_v36  ;;  %v1077_v2 = vadd.f32 %v1045_v57, %v997_v33  ;;  %v5119_v17 = vpop.permute.xlu0 %1167  ;;  %v5153_v57 = vld [vmem:[%s4624_s15 + $0x30] sm:$0xff] }
 0x11a   : > { %v1096_v3 = vadd.f32 %v1064_v27, %v1016_v45  ;;  %v1097_v31 = vadd.f32 %v1065_v23, %v1017_v58  ;;  %v996_v27 = vmax.f32 %v4996_v34, 0.0  ;;  %v1044_v23 = vunpack.c.l.bf16 %v1023_v52  ;;  %v5117_v45 = vpop.permute.xlu2 %1162 }
 0x11b   : > { %1208 = vmatpush.bf16.msrb.mxu0 %v1106_v18  ;;  %1237 = vmatpush.bf16.msrb.mxu1 %v1107_v19  ;;  %v1102_v53 = vpack.c.bf16 %v1078_v38, %v4991_v14  ;;  %v1109_v34 = vpack.c.bf16 %v1089_v12, %v1085_v50  ;;  %v6556_v14 = vpack.c.bf16 %v4879_v51, %v4859_v24 }
 0x11c   : > { %v1112_v49 = vpack.c.bf16 %v1096_v3, %v1092_v59  ;;  %v1113_v56 = vpack.c.bf16 %v1097_v31, %v1093_v62  ;;  %v1076_v28 = vadd.f32 %v1044_v23, %v996_v27  ;;  %v1105_v5 = vpack.c.bf16 %v1081_v30, %v1077_v2  ;;  %v5150_v23 = vld [vmem:[%s4624_s15 + $0x20] sm:$0xff]  ;;  %v5168_v30 = vld [vmem:[%s4624_s15 + $0x50] sm:$0xff] }
 0x11d   : > { %v6557_v39 = vpack.c.bf16 %v4881_v54, %v4862_v26  ;;  %v6558_v29 = vpack.c.bf16 %v4896_v7, %v4874_v46  ;;  %v6559_v24 = vpack.c.bf16 %v4898_v8, %v4876_v47  ;;  %v4131_v26 = vld [vmem:[%s6555_s19 + $0x8] sm:$0xff]  ;;  %v4132_v46 = vld [vmem:[%s6555_s19 + $0x10] sm:$0xff]  ;;  %v4133_v47 = vld [vmem:[%s6555_s19 + $0x18] sm:$0xff] }
 0x11e   : > { %1265 = vmatpush.bf16.msrb.mxu2 %v1112_v49  ;;  %1294 = vmatpush.bf16.msrb.mxu3 %v1113_v56  ;;  %v1104_v15 = vpack.c.bf16 %v1080_v13, %v1076_v28  ;;  %v1351_v49 = vld [vmem:[%s4624_s15] sm:$0xff]  ;;  %v1353_v56 = vld [vmem:[%s4624_s15 + $0x10] sm:$0xff] }
 0x11f   : > { %1209 = vmatpush.bf16.msrb.mxu0 %v1102_v53  ;;  %1238 = vmatpush.bf16.msrb.mxu1 %v1103_v55  ;;  %v1367_v16 = vunpack.c.l.bf16 %v1351_v49  ;;  %v1368_v27 = vunpack.c.h.bf16 %v1351_v49  ;;  %v1371_v50 = vunpack.c.l.bf16 %v1353_v56  ;;  %v1372_v55 = vunpack.c.h.bf16 %v1353_v56 }
 0x121   : > { %v5133_v62 = vpop.permute.xlu0 %1142 }
 0x122   : > { %1266 = vmatpush.bf16.msrb.mxu2 %v1108_v1  ;;  %1295 = vmatpush.bf16.msrb.mxu3 %v1109_v34  ;;  %v5125_v52 = vpop.permute.xlu2 %1157  ;;  %v5161_v1 = vld [vmem:[%s4624_s15 + $0x38] sm:$0xff]  ;;  %v1375_v34 = vunpack.c.l.bf16 %v5150_v23 }
 0x123   : > { %1210 = vmatpush.bf16.msrb.mxu0 %v6556_v14  ;;  %1239 = vmatpush.bf16.msrb.mxu1 %v6557_v39 }
 0x126   : > { %1267 = vmatpush.bf16.msrb.mxu2 %v1104_v15  ;;  %1296 = vmatpush.bf16.msrb.mxu3 %v1105_v5  ;;  %v1363_v15 = vld [vmem:[%s4624_s15 + $0x60] sm:$0xff] }
 0x127   : > { %3939 = vmatmul.msk.bf16.vlgmr.msrb.gmra.mxu0 %vm1190_vm3, %v4130_v41  ;;  %3943 = vmatmul.msk.bf16.vlgmr.msrb.gmra.mxu1 %vm1190_vm3, %v4130_v41 }
 0x129   : > { %v5147_v21 = vpop.permute.xlu0 %1137 }
 0x12a   : > { %1268 = vmatpush.bf16.msrb.mxu2 %v6558_v29  ;;  %1297 = vmatpush.bf16.msrb.mxu3 %v6559_v24  ;;  %v5135_v22 = vpop.permute.xlu2 %1132 }
 0x12d   : > { %3947 = vmatmul.msk.bf16.vlgmr.msrb.gmra.mxu2 %vm1190_vm3, %v4130_v41  ;;  %3951 = vmatmul.msk.bf16.vlgmr.msrb.gmra.mxu3 %vm1190_vm3, %v4130_v41 }
 0x137   : > { %3940 = vmatmul.msk.bf16.gmra.mxu0 %vm1190_vm3, %v4131_v26  ;;  %3944 = vmatmul.msk.bf16.gmra.mxu1 %vm1190_vm3, %v4131_v26 }
 0x13d   : > { %3948 = vmatmul.msk.bf16.gmra.mxu2 %vm1190_vm3, %v4131_v26  ;;  %3952 = vmatmul.msk.bf16.gmra.mxu3 %vm1190_vm3, %v4131_v26 }
 0x147   : > { %3941 = vmatmul.msk.bf16.gmra.mxu0 %vm1190_vm3, %v4132_v46  ;;  %3945 = vmatmul.msk.bf16.gmra.mxu1 %vm1190_vm3, %v4132_v46 }
 0x14d   : > { %3949 = vmatmul.msk.bf16.gmra.mxu2 %vm1190_vm3, %v4132_v46  ;;  %3953 = vmatmul.msk.bf16.gmra.mxu3 %vm1190_vm3, %v4132_v46 }
 0x157   : > { %3942 = vmatmul.msk.bf16.gmra.mxu0 %vm1190_vm3, %v4133_v47  ;;  %3946 = vmatmul.msk.bf16.gmra.mxu1 %vm1190_vm3, %v4133_v47 }
 0x15d   : > { %3950 = vmatmul.msk.bf16.gmra.mxu2 %vm1190_vm3, %v4133_v47  ;;  %3954 = vmatmul.msk.bf16.gmra.mxu3 %vm1190_vm3, %v4133_v47 }
 0x1a4   : > { %v1212_v51 = vpop.f32.mrf.mxu0  ;;  %v1241_v54 = vpop.f32.mrf.mxu1 }
 0x1a5   : > { %v1213_v36 = vadd.f32 %v1212_v51, %v5135_v22  ;;  %v1242_v19 = vadd.f32 %v1241_v54, %v5135_v22  ;;  %v1387_v51 = vunpack.c.l.bf16 %v5168_v30  ;;  %v1388_v54 = vunpack.c.h.bf16 %v5168_v30 }
 0x1a7   : > { %v1319_v61 = vmax.f32 %v1213_v36, 0.0  ;;  %v1320_v12 = vmax.f32 %v1242_v19, 0.0  ;;  %v5188_v36 = vpop.permute.xlu1 %1147 }
 0x1a9   : > { %v5170_v28 = vadd.f32 %v1367_v16, %v1319_v61  ;;  %v5172_v2 = vadd.f32 %v1368_v27, %v1320_v12  ;;  %v1391_v61 = vunpack.c.l.bf16 %v1363_v15 }
 0x1ac   : > { %v1214_v7 = vpop.f32.mrf.mxu0  ;;  %v1243_v8 = vpop.f32.mrf.mxu1 }
 0x1ad   : > { %v1215_v4 = vadd.f32 %v1214_v7, %v5147_v21  ;;  %v1244_v53 = vadd.f32 %v1243_v8, %v5147_v21  ;;  %v1365_v8 = vld [vmem:[%s4624_s15 + $0x70] sm:$0xff] }
 0x1ae   : > { %v1395_v30 = vunpack.c.l.bf16 %v1365_v8  ;;  %v1396_v24 = vunpack.c.h.bf16 %v1365_v8  ;;  %v5211_v8 = vld [vmem:[%s4624_s15 + $0x58] sm:$0xff] }
 0x1af   : > { %v1323_v29 = vmax.f32 %v1215_v4, 0.0  ;;  %v1324_v47 = vmax.f32 %v1244_v53, 0.0 }
 0x1b0   : > { %v5105_v42 = vpop.f32.mrf.mxu2  ;;  %v5107_v11 = vpop.f32.mrf.mxu3 }
 0x1b4   : > { %v5109_v43 = vpop.f32.mrf.mxu0  ;;  %v5111_v63 = vpop.f32.mrf.mxu1 }
 0x1b5   : > { %v1218_v19 = vadd.f32 %v5109_v43, %v5133_v62  ;;  %v1247_v49 = vadd.f32 %v5111_v63, %v5133_v62 }
 0x1b7   : > { %v1327_v14 = vmax.f32 %v1218_v19, 0.0 }
 0x1b8   : > { %v5113_v25 = vpop.f32.mrf.mxu2  ;;  %v5115_v35 = vpop.f32.mrf.mxu3 }
 0x1bc   : > { %v1219_v58 = vpop.f32.mrf.mxu0  ;;  %v1248_v0 = vpop.f32.mrf.mxu1 }
 0x1bd   : > { %v1220_v16 = vadd.f32 %v1219_v58, %v5188_v36  ;;  %v1249_v12 = vadd.f32 %v1248_v0, %v5188_v36  ;;  %v5203_v0 = vadd.f32 %v1371_v50, %v1323_v29 }
 0x1bf   : > { %v1332_v29 = vmax.f32 %v1249_v12, 0.0 }
 0x1c0   : > { %v5121_v18 = vpop.f32.mrf.mxu2  ;;  %v5123_v6 = vpop.f32.mrf.mxu3 }
 0x1c4   : > { %v1222_v38 = vpop.f32.mrf.mxu0  ;;  %v5127_v20 = vpop.f32.mrf.mxu1 }
 0x1c5   : > { %v1252_v63 = vadd.f32 %v5127_v20, %v5143_v44 }
 0x1c8   : > { %v5129_v59 = vpop.f32.mrf.mxu2  ;;  %v5131_v40 = vpop.f32.mrf.mxu3 }
 0x1cc   : > { %v1224_v3 = vpop.f32.mrf.mxu0  ;;  %v1253_v31 = vpop.f32.mrf.mxu1 }
 0x1cd   : > { %v1225_v56 = vadd.f32 %v1224_v3, %v5125_v52  ;;  %v1254_v27 = vadd.f32 %v1253_v31, %v5125_v52  ;;  %v5205_v31 = vadd.f32 %v1372_v55, %v1324_v47  ;;  %v1336_v55 = vmax.f32 %v1252_v63, 0.0 }
 0x1cf   : > { %v1340_v37 = vmax.f32 %v1254_v27, 0.0 }
 0x1d0   : > { %v5139_v32 = vpop.f32.mrf.mxu2  ;;  %v5141_v10 = vpop.f32.mrf.mxu3 }
 0x1d1   : > { %v1420_v12 = vadd.f32 %v1388_v54, %v1340_v37  ;;  %v6564_v37 = vunpack.c.h.bf16 %v5157_v48 }
 0x1d4   : > { %v1227_v33 = vpop.f32.mrf.mxu0  ;;  %v1256_v60 = vpop.f32.mrf.mxu1 }
 0x1d5   : > { %v1228_v46 = vadd.f32 %v1227_v33, %v5117_v45  ;;  %v1257_v7 = vadd.f32 %v1256_v60, %v5117_v45  ;;  %v1392_v33 = vunpack.c.h.bf16 %v1363_v15  ;;  %v1223_v60 = vadd.f32 %v1222_v38, %v5143_v44 }
 0x1d6   : > { %v1339_v15 = vmax.f32 %v1225_v56, 0.0 }
 0x1d7   : > { %v1343_v53 = vmax.f32 %v1228_v46, 0.0  ;;  %v1344_v3 = vmax.f32 %v1257_v7, 0.0  ;;  %v1328_v46 = vmax.f32 %v1247_v49, 0.0  ;;  %v1331_v7 = vmax.f32 %v1220_v16, 0.0 }
 0x1d8   : > { %v5177_v5 = vpop.f32.mrf.mxu2  ;;  %v5179_v39 = vpop.f32.mrf.mxu3  ;;  %v1335_v9 = vmax.f32 %v1223_v60, 0.0  ;;  %v1419_v19 = vadd.f32 %v1387_v51, %v1339_v15  ;;  %v1407_v16 = vadd.f32 %v1375_v34, %v1327_v14  ;;  %v6563_v34 = vunpack.c.h.bf16 %v5153_v57 }
 0x1d9   : > { %v1424_v47 = vadd.f32 %v1392_v33, %v1344_v3  ;;  %v1366_v33 = vld [vmem:[%s4624_s15 + $0x78] sm:$0xff]  ;;  %v6562_v3 = vunpack.c.l.bf16 %v5153_v57  ;;  %v1416_v14 = vadd.f32 %v6564_v37, %v1336_v55 }
 0x1db   : > { %v1411_v15 = vadd.f32 %v6562_v3, %v1331_v7  ;;  %v1302_v3 = vadd.f32 %v5115_v35, %v5147_v21  ;;  %v1352_v35 = vld [vmem:[%s4624_s15 + $0x8] sm:$0xff] }
 0x1dc   : > { %v1229_v4 = vpop.f32.mrf.mxu0  ;;  %v1258_v26 = vpop.f32.mrf.mxu1 }
 0x1dd   : > { %v1230_v43 = vadd.f32 %v1229_v4, %v5119_v17  ;;  %v1259_v58 = vadd.f32 %v1258_v26, %v5119_v17  ;;  %v5208_v4 = vld [vmem:[%s4624_s15 + $0x48] sm:$0xff]  ;;  %v1423_v26 = vadd.f32 %v1391_v61, %v1343_v53  ;;  %v6560_v61 = vunpack.c.h.bf16 %v5150_v23 }
 0x1de   : > { %v1385_v49 = vunpack.c.l.bf16 %v5208_v4  ;;  %v1412_v23 = vadd.f32 %v6563_v34, %v1332_v29 }
 0x1df   : > { %v1347_v38 = vmax.f32 %v1230_v43, 0.0  ;;  %v1348_v13 = vmax.f32 %v1259_v58, 0.0  ;;  %v1364_v43 = vld [vmem:[%s4624_s15 + $0x68] sm:$0xff]  ;;  %v1431_v58 = vpack.c.bf16 %v5203_v0, %v5170_v28  ;;  %v1408_v60 = vadd.f32 %v6560_v61, %v1328_v46 }
 0x1e0   : > { %v1285_v41 = vpop.f32.mrf.mxu2  ;;  %v1314_v20 = vpop.f32.mrf.mxu3  ;;  %v1393_v54 = vunpack.c.l.bf16 %v1364_v43  ;;  %v1397_v46 = vunpack.c.l.bf16 %v1366_v33  ;;  %v6568_v28 = vunpack.c.h.bf16 %v5161_v1 }
 0x1e1   : > { %v1427_v50 = vadd.f32 %v1395_v30, %v1347_v38  ;;  %v1428_v56 = vadd.f32 %v1396_v24, %v1348_v13  ;;  %v6561_v30 = vunpack.c.l.bf16 %v5157_v48  ;;  %v1389_v24 = vunpack.c.l.bf16 %v5211_v8 }
 0x1e2   : > { %v1286_v51 = vadd.f32 %v1285_v41, %v5117_v45  ;;  %v1315_v63 = vadd.f32 %v1314_v20, %v5117_v45  ;;  %v1394_v38 = vunpack.c.h.bf16 %v1364_v43  ;;  %v1281_v45 = vadd.f32 %v5139_v32, %v5143_v44 }
 0x1e3   : > { %v1443_v27 = vpack.c.bf16 %v1427_v50, %v1423_v26  ;;  %v1444_v53 = vpack.c.bf16 %v1428_v56, %v1424_v47  ;;  %v1415_v13 = vadd.f32 %v6561_v30, %v1335_v9  ;;  %v1283_v9 = vadd.f32 %v5177_v5, %v5125_v52 }
 0x1e4   : > { %v1312_v20 = vadd.f32 %v5179_v39, %v5125_v52  ;;  %v1398_v26 = vunpack.c.h.bf16 %v1366_v33  ;;  %v1440_v50 = vpack.c.bf16 %v1420_v12, %v1416_v14  ;;  %v1345_v48 = vmax.f32 %v1286_v51, 0.0  ;;  %v1356_v33 = vld [vmem:[%s4624_s15 + $0x28] sm:$0xff] }
 0x1e5   : > { %1539 = vmatpush.bf16.msra.mxu0 %v1443_v27  ;;  %1568 = vmatpush.bf16.msra.mxu1 %v1444_v53  ;;  %v1439_v41 = vpack.c.bf16 %v1419_v19, %v1415_v13  ;;  %v1346_v29 = vmax.f32 %v1315_v63, 0.0  ;;  %v1276_v5 = vadd.f32 %v5121_v18, %v5133_v62  ;;  %v1310_v32 = vadd.f32 %v5141_v10, %v5143_v44  ;;  %v1354_v63 = vld [vmem:[%s4624_s15 + $0x18] sm:$0xff] }
 0x1e6   : > { %v1390_v56 = vunpack.c.h.bf16 %v5211_v8  ;;  %v1435_v52 = vpack.c.bf16 %v1411_v15, %v1407_v16  ;;  %v1278_v39 = vadd.f32 %v5129_v59, %v5188_v36  ;;  %v1341_v19 = vmax.f32 %v1283_v9, 0.0 }
 0x1e7   : > { %v1337_v61 = vmax.f32 %v1281_v45, 0.0  ;;  %v1342_v12 = vmax.f32 %v1312_v20, 0.0  ;;  %v1436_v18 = vpack.c.bf16 %v1412_v23, %v1408_v60  ;;  %v1425_v53 = vadd.f32 %v1393_v54, %v1345_v48 }
 0x1e8   : > { %v1287_v7 = vpop.f32.mrf.mxu2  ;;  %v1316_v57 = vpop.f32.mrf.mxu3  ;;  %v1426_v10 = vadd.f32 %v1394_v38, %v1346_v29  ;;  %v1273_v16 = vadd.f32 %v5113_v25, %v5147_v21  ;;  %v1305_v59 = vadd.f32 %v5123_v6, %v5133_v62  ;;  %v1338_v30 = vmax.f32 %v1310_v32, 0.0  ;;  %v4134_v6 = vld [vmem:[%s6565_s21] sm:$0xff]  ;;  %v4136_v32 = vld [vmem:[%s6566_s20 + $0x10] sm:$0xff]  ;;  %s3660_s21 = scalar_lea.sflag [#allocation4], %s4620_s3 }
 0x1e9   : > { %v1288_v55 = vadd.f32 %v1287_v7, %v5119_v17  ;;  %v1317_v47 = vadd.f32 %v1316_v57, %v5119_v17  ;;  %1540 = vmatpush.bf16.msra.mxu0 %v1439_v41  ;;  %1569 = vmatpush.bf16.msra.mxu1 %v1440_v50  ;;  %v1307_v17 = vadd.f32 %v5131_v40, %v5188_v36  ;;  %v1386_v13 = vunpack.c.h.bf16 %v5208_v4 }
 0x1ea   : > { %v1333_v40 = vmax.f32 %v1278_v39, 0.0  ;;  %v1421_v36 = vadd.f32 %v1389_v24, %v1341_v19  ;;  %v1422_v34 = vadd.f32 %v1390_v56, %v1342_v12  ;;  %v1432_v25 = vpack.c.bf16 %v5205_v31, %v5172_v2  ;;  %v4137_v56 = vld [vmem:[%s6566_s20 + $0x18] sm:$0xff] }
 0x1eb   : > { %v1349_v27 = vmax.f32 %v1288_v55, 0.0  ;;  %v1350_v43 = vmax.f32 %v1317_v47, 0.0  ;;  %v1334_v15 = vmax.f32 %v1307_v17, 0.0  ;;  %v1271_v62 = vadd.f32 %v5105_v42, %v5135_v22 }
 0x1ec   : > { %v1329_v23 = vmax.f32 %v1276_v5, 0.0  ;;  %v1377_v24 = vunpack.c.l.bf16 %v1356_v33  ;;  %v1417_v37 = vadd.f32 %v1385_v49, %v1337_v61  ;;  %v1300_v21 = vadd.f32 %v5107_v11, %v5135_v22  ;;  %v4135_v5 = vld [vmem:[%s6566_s20 + $0x8] sm:$0xff] }
 0x1ed   : > { %v1429_v44 = vadd.f32 %v1397_v46, %v1349_v27  ;;  %v1430_v8 = vadd.f32 %v1398_v26, %v1350_v43  ;;  %1541 = vmatpush.bf16.msra.mxu0 %v1435_v52  ;;  %1570 = vmatpush.bf16.msra.mxu1 %v1436_v18  ;;  %v1330_v2 = vmax.f32 %v1305_v59, 0.0  ;;  %v1378_v31 = vunpack.c.h.bf16 %v1356_v33  ;;  %v5321_v59 = vpop.permute.xlu2 %1500 }
 0x1ee   : > { %v1418_v14 = vadd.f32 %v1386_v13, %v1338_v30  ;;  %v1325_v42 = vmax.f32 %v1273_v16, 0.0  ;;  %v1373_v54 = vunpack.c.l.bf16 %v1354_v63  ;;  %v6567_v9 = vunpack.c.l.bf16 %v5161_v1  ;;  %v5319_v16 = vpop.permute.xlu1 %1495 }
 0x1ef   : > { %v1445_v60 = vpack.c.bf16 %v1429_v44, %v1425_v53  ;;  %v1446_v51 = vpack.c.bf16 %v1430_v8, %v1426_v10  ;;  %v1441_v49 = vpack.c.bf16 %v1421_v36, %v1417_v37  ;;  %v1326_v38 = vmax.f32 %v1302_v3, 0.0  ;;  %v5349_v37 = vld [vmem:[%s4631_s8 + $0x30] sm:$0xff] }
 0x1f0   : > { %v1413_v4 = vadd.f32 %v6567_v9, %v1333_v40  ;;  %v1374_v46 = vunpack.c.h.bf16 %v1354_v63  ;;  %v1414_v0 = vadd.f32 %v6568_v28, %v1334_v15  ;;  %v1321_v11 = vmax.f32 %v1271_v62, 0.0  ;;  %v5335_v15 = vpop.permute.xlu0 %1485  ;;  %v5341_v62 = vld [vmem:[%s4631_s8 + $0x10] sm:$0xff]  ;;  %v1695_v9 = vld [vmem:[%s4631_s8 + $0x60] sm:$0xff] }
 0x1f1   : > { %1542 = vmatpush.bf16.msra.mxu0 %v1431_v58  ;;  %1597 = vmatpush.bf16.msra.mxu2 %v1445_v60  ;;  %v1442_v58 = vpack.c.bf16 %v1422_v34, %v1418_v14  ;;  %v1369_v22 = vunpack.c.l.bf16 %v1352_v35  ;;  %v1409_v41 = vadd.f32 %v1377_v24, %v1329_v23  ;;  %v1322_v45 = vmax.f32 %v1300_v21, 0.0  ;;  %v5346_v24 = vld [vmem:[%s4631_s8 + $0x20] sm:$0xff] }
 0x1f2   : > { %1571 = vmatpush.bf16.msra.mxu1 %v1432_v25  ;;  %1626 = vmatpush.bf16.msra.mxu3 %v1446_v51  ;;  %v1370_v20 = vunpack.c.h.bf16 %v1352_v35  ;;  %v1410_v7 = vadd.f32 %v1378_v31, %v1330_v2  ;;  %v1405_v57 = vadd.f32 %v1373_v54, %v1325_v42  ;;  %v1406_v50 = vadd.f32 %v1374_v46, %v1326_v38  ;;  %v5354_v21 = vld [vmem:[%s4631_s8 + $0x40] sm:$0xff] }
 0x1f3   : > { %v1437_v26 = vpack.c.bf16 %v1413_v4, %v1409_v41  ;;  %v1401_v29 = vadd.f32 %v1369_v22, %v1321_v11  ;;  %v1711_v46 = vunpack.c.l.bf16 %v5349_v37  ;;  %v1715_v11 = vunpack.c.l.bf16 %v5354_v21 }
 0x1f4   : > { %3971 = vmatmul.msk.bf16.vlgmr.msra.gmra.mxu0 %vm1190_vm3, %v4134_v6  ;;  %v1438_v48 = vpack.c.bf16 %v1414_v0, %v1410_v7  ;;  %v1402_v1 = vadd.f32 %v1370_v20, %v1322_v45  ;;  %v1697_v0 = vld [vmem:[%s4631_s8 + $0x70] sm:$0xff]  ;;  %v1716_v22 = vunpack.c.h.bf16 %v5354_v21 }
 0x1f5   : > { %3975 = vmatmul.msk.bf16.vlgmr.msra.gmra.mxu1 %vm1190_vm3, %v4134_v6  ;;  %1598 = vmatpush.bf16.msra.mxu2 %v1441_v49  ;;  %v1433_v55 = vpack.c.bf16 %v1405_v57, %v1401_v29  ;;  %v5333_v3 = vpop.permute.xlu2 %1475  ;;  %v1693_v20 = vld [vmem:[%s4631_s8 + $0x50] sm:$0xff]  ;;  %v1723_v57 = vunpack.c.l.bf16 %v1695_v9 }
 0x1f6   : > { %1627 = vmatpush.bf16.msra.mxu3 %v1442_v58  ;;  %v1434_v47 = vpack.c.bf16 %v1406_v50, %v1402_v1  ;;  %v5329_v51 = vpop.permute.xlu1 %1490 }
 0x1f9   : > { %1599 = vmatpush.bf16.msra.mxu2 %v1437_v26  ;;  %v1724_v26 = vunpack.c.h.bf16 %v1695_v9  ;;  %v1720_v9 = vunpack.c.h.bf16 %v1693_v20 }
 0x1fa   : > { %1628 = vmatpush.bf16.msra.mxu3 %v1438_v48 }
 0x1fd   : > { %1600 = vmatpush.bf16.msra.mxu2 %v1433_v55  ;;  %v5363_v4 = vpop.permute.xlu2 %1470  ;;  %v1727_v55 = vunpack.c.l.bf16 %v1697_v0 }
 0x1fe   : > { %1629 = vmatpush.bf16.msra.mxu3 %v1434_v47  ;;  %v5356_v2 = vpop.permute.xlu1 %1465 }
 0x200   : > { %3979 = vmatmul.msk.bf16.vlgmr.msra.gmra.mxu2 %vm1190_vm3, %v4134_v6 }
 0x201   : > { %3983 = vmatmul.msk.bf16.vlgmr.msra.gmra.mxu3 %vm1190_vm3, %v4134_v6  ;;  %v5338_v6 = vld [vmem:[%s4631_s8] sm:$0xff] }
 0x204   : > { %3972 = vmatmul.msk.bf16.gmra.mxu0 %vm1190_vm3, %v4135_v5 }
 0x205   : > { %3976 = vmatmul.msk.bf16.gmra.mxu1 %vm1190_vm3, %v4135_v5 }
 0x210   : > { %3980 = vmatmul.msk.bf16.gmra.mxu2 %vm1190_vm3, %v4135_v5 }
 0x211   : > { %3984 = vmatmul.msk.bf16.gmra.mxu3 %vm1190_vm3, %v4135_v5  ;;  %v5383_v5 = vpop.permute.xlu0 %1480 }
 0x214   : > { %3973 = vmatmul.msk.bf16.gmra.mxu0 %vm1190_vm3, %v4136_v32 }
 0x215   : > { %3977 = vmatmul.msk.bf16.gmra.mxu1 %vm1190_vm3, %v4136_v32 }
 0x220   : > { %3981 = vmatmul.msk.bf16.gmra.mxu2 %vm1190_vm3, %v4136_v32 }
 0x221   : > { %3985 = vmatmul.msk.bf16.gmra.mxu3 %vm1190_vm3, %v4136_v32 }
 0x224   : > { %3974 = vmatmul.msk.bf16.gmra.mxu0 %vm1190_vm3, %v4137_v56 }
 0x225   : > { %3978 = vmatmul.msk.bf16.gmra.mxu1 %vm1190_vm3, %v4137_v56 }
 0x230   : > { %3982 = vmatmul.msk.bf16.gmra.mxu2 %vm1190_vm3, %v4137_v56 }
 0x231   : > { %3986 = vmatmul.msk.bf16.gmra.mxu3 %vm1190_vm3, %v4137_v56 }
 0x271   : > { %v1544_v52 = vpop.f32.mrf.mxu0 }
 0x272   : > { %v5303_v39 = vpop.f32.mrf.mxu1  ;;  %v5366_v49 = vadd.f32 %v1544_v52, %v5356_v2 }
 0x273   : > { %v1574_v38 = vadd.f32 %v5303_v39, %v5356_v2  ;;  %v1708_v39 = vunpack.c.h.bf16 %v5346_v24 }
 0x279   : > { %v1546_v19 = vpop.f32.mrf.mxu0 }
 0x27a   : > { %v1575_v27 = vpop.f32.mrf.mxu1  ;;  %v5373_v58 = vadd.f32 %v1546_v19, %v5363_v4  ;;  %v1728_v19 = vunpack.c.h.bf16 %v1697_v0 }
 0x27b   : > { %v1576_v45 = vadd.f32 %v1575_v27, %v5363_v4 }
 0x281   : > { %v5305_v43 = vpop.f32.mrf.mxu0 }
 0x282   : > { %v5307_v17 = vpop.f32.mrf.mxu1 }
 0x283   : > { %v5309_v61 = vpop.f32.mrf.mxu2 }
 0x284   : > { %v5311_v12 = vpop.f32.mrf.mxu3 }
 0x289   : > { %v1551_v18 = vpop.f32.mrf.mxu0 }
 0x28a   : > { %v5313_v53 = vpop.f32.mrf.mxu1 }
 0x28b   : > { %v5315_v10 = vpop.f32.mrf.mxu2  ;;  %v1581_v21 = vadd.f32 %v5313_v53, %v5383_v5 }
 0x28c   : > { %v5317_v44 = vpop.f32.mrf.mxu3 }
 0x291   : > { %v1554_v8 = vpop.f32.mrf.mxu0 }
 0x292   : > { %v1583_v33 = vpop.f32.mrf.mxu1  ;;  %v1555_v48 = vadd.f32 %v1554_v8, %v5335_v15 }
 0x293   : > { %v5323_v30 = vpop.f32.mrf.mxu2  ;;  %v1584_v32 = vadd.f32 %v1583_v33, %v5335_v15  ;;  %v1550_v33 = vadd.f32 %v5305_v43, %v5333_v3 }
 0x294   : > { %v5325_v13 = vpop.f32.mrf.mxu3 }
 0x299   : > { %v1556_v40 = vpop.f32.mrf.mxu0 }
 0x29a   : > { %v1585_v36 = vpop.f32.mrf.mxu1  ;;  %v1557_v41 = vadd.f32 %v1556_v40, %v5329_v51  ;;  %v1552_v40 = vadd.f32 %v1551_v18, %v5383_v5  ;;  %v1579_v18 = vadd.f32 %v5307_v17, %v5333_v3  ;;  %v1700_v17 = vunpack.c.h.bf16 %v5338_v6 }
 0x29b   : > { %v5327_v60 = vpop.f32.mrf.mxu2  ;;  %v1586_v7 = vadd.f32 %v1585_v36, %v5329_v51 }
 0x29c   : > { %v5331_v63 = vpop.f32.mrf.mxu3  ;;  %v1671_v36 = vmax.f32 %v1557_v41, 0.0  ;;  %v1668_v41 = vmax.f32 %v1584_v32, 0.0  ;;  %v1663_v42 = vmax.f32 %v1552_v40, 0.0 }
 0x29e   : > { %v1748_v32 = vadd.f32 %v1716_v22, %v1668_v41  ;;  %v6571_v22 = vunpack.c.l.bf16 %v5346_v24 }
 0x2a1   : > { %v1559_v34 = vpop.f32.mrf.mxu0 }
 0x2a2   : > { %v1588_v25 = vpop.f32.mrf.mxu1  ;;  %v1560_v54 = vadd.f32 %v1559_v34, %v5319_v16  ;;  %v1719_v34 = vunpack.c.l.bf16 %v1693_v20  ;;  %v1664_v20 = vmax.f32 %v1581_v21, 0.0 }
 0x2a3   : > { %v5343_v23 = vpop.f32.mrf.mxu2  ;;  %v1589_v28 = vadd.f32 %v1588_v25, %v5319_v16 }
 0x2a4   : > { %v5351_v35 = vpop.f32.mrf.mxu3  ;;  %v1675_v29 = vmax.f32 %v1560_v54, 0.0  ;;  %v1672_v54 = vmax.f32 %v1586_v7, 0.0  ;;  %v1751_v53 = vadd.f32 %v1719_v34, %v1671_v36  ;;  %v6569_v36 = vunpack.c.l.bf16 %v5341_v62 }
 0x2a5   : > { %v1676_v56 = vmax.f32 %v1589_v28, 0.0  ;;  %v1667_v28 = vmax.f32 %v1555_v48, 0.0  ;;  %v1656_v48 = vmax.f32 %v1576_v45, 0.0 }
 0x2a6   : > { %v1755_v0 = vadd.f32 %v1723_v57, %v1675_v29  ;;  %v1752_v14 = vadd.f32 %v1720_v9, %v1672_v54  ;;  %v1655_v57 = vmax.f32 %v5373_v58, 0.0  ;;  %v1659_v29 = vmax.f32 %v1550_v33, 0.0  ;;  %v5412_v9 = vld [vmem:[%s4631_s8 + $0x38] sm:$0xff] }
 0x2a7   : > { %v1756_v31 = vadd.f32 %v1724_v26, %v1676_v56  ;;  %v1660_v26 = vmax.f32 %v1579_v18, 0.0  ;;  %v1713_v24 = vunpack.c.l.bf16 %v5412_v9  ;;  %v1698_v18 = vld [vmem:[%s4631_s8 + $0x78] sm:$0xff] }
 0x2a8   : > { %v1735_v34 = vadd.f32 %v6569_v36, %v1655_v57  ;;  %v1739_v54 = vadd.f32 %v6571_v22, %v1659_v29  ;;  %v1688_v36 = vld [vmem:[%s4631_s8 + $0x28] sm:$0xff] }
 0x2a9   : > { %v1561_v50 = vpop.f32.mrf.mxu0 }
 0x2aa   : > { %v1562_v1 = vadd.f32 %v1561_v50, %v5321_v59  ;;  %v1590_v47 = vpop.f32.mrf.mxu1 }
 0x2ab   : > { %v1591_v52 = vadd.f32 %v1590_v47, %v5321_v59  ;;  %v5387_v27 = vpop.f32.mrf.mxu2 }
 0x2ac   : > { %v1679_v8 = vmax.f32 %v1562_v1, 0.0  ;;  %v5390_v25 = vpop.f32.mrf.mxu3 }
 0x2ad   : > { %v1680_v50 = vmax.f32 %v1591_v52, 0.0  ;;  %v1712_v52 = vunpack.c.h.bf16 %v5349_v37  ;;  %v1651_v37 = vmax.f32 %v5366_v49, 0.0  ;;  %v1740_v49 = vadd.f32 %v1708_v39, %v1660_v26 }
 0x2ae   : > { %v1759_v47 = vadd.f32 %v1727_v55, %v1679_v8  ;;  %v1747_v55 = vadd.f32 %v1715_v11, %v1667_v28  ;;  %v1772_v11 = vpack.c.bf16 %v1752_v14, %v1748_v32  ;;  %v6570_v8 = vunpack.c.h.bf16 %v5341_v62  ;;  %v1696_v62 = vld [vmem:[%s4631_s8 + $0x68] sm:$0xff] }
 0x2af   : > { %v1760_v1 = vadd.f32 %v1728_v19, %v1680_v50  ;;  %v1652_v19 = vmax.f32 %v1574_v38, 0.0  ;;  %v1744_v40 = vadd.f32 %v1712_v52, %v1664_v20  ;;  %v6572_v38 = vunpack.c.l.bf16 %v5338_v6  ;;  %v1694_v20 = vld [vmem:[%s4631_s8 + $0x58] sm:$0xff] }
 0x2b0   : > { %v1775_v7 = vpack.c.bf16 %v1759_v47, %v1755_v0  ;;  %v1771_v45 = vpack.c.bf16 %v1751_v53, %v1747_v55  ;;  %v1736_v21 = vadd.f32 %v6570_v8, %v1656_v48  ;;  %v1714_v28 = vunpack.c.h.bf16 %v5412_v9  ;;  %v4139_v9 = vld [vmem:[%s6573_s6 + $0x8] sm:$0xff] }
 0x2b1   : > { %v1776_v43 = vpack.c.bf16 %v1760_v1, %v1756_v31  ;;  %v1743_v31 = vadd.f32 %v1711_v46, %v1663_v42  ;;  %v5415_v42 = vld [vmem:[%s4631_s8 + $0x48] sm:$0xff]  ;;  %v1731_v14 = vadd.f32 %v6572_v38, %v1651_v37  ;;  %v1732_v46 = vadd.f32 %v1700_v17, %v1652_v19 }
 0x2b2   : > { %1959 = vmatpush.bf16.msrb.mxu0 %v1775_v7  ;;  %v1768_v47 = vpack.c.bf16 %v1744_v40, %v1740_v49  ;;  %v1717_v41 = vunpack.c.l.bf16 %v5415_v42  ;;  %v1615_v6 = vadd.f32 %v5387_v27, %v5329_v51  ;;  %v1718_v7 = vunpack.c.h.bf16 %v5415_v42 }
 0x2b3   : > { %2008 = vmatpush.bf16.msrb.mxu1 %v1776_v43  ;;  %v1617_v56 = vpop.f32.mrf.mxu2  ;;  %v1767_v33 = vpack.c.bf16 %v1743_v31, %v1739_v54  ;;  %v1763_v1 = vpack.c.bf16 %v1735_v34, %v1731_v14  ;;  %v1764_v53 = vpack.c.bf16 %v1736_v21, %v1732_v46  ;;  %v1644_v52 = vadd.f32 %v5390_v25, %v5329_v51  ;;  %v5441_v51 = vld [vmem:[%s6573_s6] sm:$0xff] }
 0x2b4   : > { %v1646_v58 = vpop.f32.mrf.mxu3  ;;  %v1618_v50 = vadd.f32 %v1617_v56, %v5319_v16  ;;  %v1725_v43 = vunpack.c.l.bf16 %v1696_v62  ;;  %v1726_v57 = vunpack.c.h.bf16 %v1696_v62  ;;  %v1613_v48 = vadd.f32 %v5343_v23, %v5335_v15  ;;  %v1686_v54 = vld [vmem:[%s4631_s8 + $0x18] sm:$0xff] }
 0x2b5   : > { %v1647_v0 = vadd.f32 %v1646_v58, %v5319_v16  ;;  %v1729_v27 = vunpack.c.l.bf16 %v1698_v18  ;;  %v1642_v26 = vadd.f32 %v5351_v35, %v5335_v15  ;;  %v1730_v56 = vunpack.c.h.bf16 %v1698_v18 }
 0x2b6   : > { %1960 = vmatpush.bf16.msrb.mxu0 %v1771_v45  ;;  %v1677_v29 = vmax.f32 %v1618_v50, 0.0  ;;  %v1610_v23 = vadd.f32 %v5327_v60, %v5383_v5  ;;  %v1673_v25 = vmax.f32 %v1615_v6, 0.0  ;;  %v1721_v37 = vunpack.c.l.bf16 %v1694_v20 }
 0x2b7   : > { %2009 = vmatpush.bf16.msrb.mxu1 %v1772_v11  ;;  %v1678_v39 = vmax.f32 %v1647_v0, 0.0  ;;  %v1639_v15 = vadd.f32 %v5331_v63, %v5383_v5  ;;  %v1674_v35 = vmax.f32 %v1644_v52, 0.0  ;;  %v1722_v31 = vunpack.c.h.bf16 %v1694_v20 }
 0x2b8   : > { %v1608_v58 = vadd.f32 %v5323_v30, %v5333_v3  ;;  %v1669_v45 = vmax.f32 %v1613_v48, 0.0  ;;  %v1757_v40 = vadd.f32 %v1725_v43, %v1677_v29  ;;  %v1637_v60 = vadd.f32 %v5325_v13, %v5333_v3 }
 0x2b9   : > { %v1670_v34 = vmax.f32 %v1642_v26, 0.0  ;;  %v1758_v8 = vadd.f32 %v1726_v57, %v1678_v39  ;;  %v1605_v63 = vadd.f32 %v5315_v10, %v5363_v4  ;;  %v1665_v5 = vmax.f32 %v1610_v23, 0.0  ;;  %v1684_v10 = vld [vmem:[%s4631_s8 + $0x8] sm:$0xff]  ;;  %v4141_v26 = vld [vmem:[%s6573_s6 + $0x18] sm:$0xff]  ;;  %v4142_v39 = vld [vmem:[%s6573_s6 + $0x20] sm:$0xff]  ;;  %s5646_s8 = scalar_lea.vmem [#allocation7], %s3883_s16 }
 0x2ba   : > { %1961 = vmatpush.bf16.msrb.mxu0 %v1767_v33  ;;  %v1753_v22 = vadd.f32 %v1721_v37, %v1673_v25  ;;  %v1634_v13 = vadd.f32 %v5317_v44, %v5363_v4  ;;  %v1666_v3 = vmax.f32 %v1639_v15, 0.0  ;;  %v1754_v49 = vadd.f32 %v1722_v31, %v1674_v35  ;;  %s4162_s16 = sshll.u32 %s4412_s24, 9  ;;  %s3674_s24 = sshll.u32 %s6032_s12, 4  ;;  %s3675_s24 = int_to_ptr.vmem [resolvable:$true] %s3674_s24 }
 0x2bb   : > { %2010 = vmatpush.bf16.msrb.mxu1 %v1768_v47  ;;  %v1619_v16 = vpop.f32.mrf.mxu2  ;;  %v1603_v38 = vadd.f32 %v5309_v61, %v5356_v2  ;;  %v1661_v14 = vmax.f32 %v1608_v58, 0.0  ;;  %v1709_v46 = vunpack.c.l.bf16 %v1688_v36  ;;  %v1749_v50 = vadd.f32 %v1717_v41, %v1669_v45 }
 0x2bc   : > { %v1620_v55 = vadd.f32 %v1619_v16, %v5321_v59  ;;  %v1648_v17 = vpop.f32.mrf.mxu3  ;;  %v1632_v62 = vadd.f32 %v5311_v12, %v5356_v2  ;;  %v1662_v33 = vmax.f32 %v1637_v60, 0.0  ;;  %v1710_v0 = vunpack.c.h.bf16 %v1688_v36 }
 0x2bd   : > { %v1649_v32 = vadd.f32 %v1648_v17, %v5321_v59  ;;  %v1750_v47 = vadd.f32 %v1718_v7, %v1670_v34  ;;  %v1657_v18 = vmax.f32 %v1605_v63, 0.0  ;;  %v1705_v44 = vunpack.c.l.bf16 %v1686_v54  ;;  %v4140_v17 = vld [vmem:[%s6573_s6 + $0x10] sm:$0xff] }
 0x2be   : > { %v1681_v19 = vmax.f32 %v1620_v55, 0.0  ;;  %1962 = vmatpush.bf16.msrb.mxu0 %v1763_v1  ;;  %v1745_v4 = vadd.f32 %v1713_v24, %v1665_v5  ;;  %v1773_v6 = vpack.c.bf16 %v1753_v22, %v1749_v50  ;;  %v1658_v1 = vmax.f32 %v1634_v13, 0.0  ;;  %v5555_v5 = vpop.permute.xlu0 %1883  ;;  %v5577_v50 = vpop.permute.xlu1 %1888 }
 0x2bf   : > { %v1682_v59 = vmax.f32 %v1649_v32, 0.0  ;;  %2011 = vmatpush.bf16.msrb.mxu1 %v1764_v53  ;;  %v1706_v61 = vunpack.c.h.bf16 %v1686_v54  ;;  %v1746_v41 = vadd.f32 %v1714_v28, %v1666_v3  ;;  %v1774_v53 = vpack.c.bf16 %v1754_v49, %v1750_v47  ;;  %v4143_v32 = vld [vmem:[%s6573_s6 + $0x28] sm:$0xff]  ;;  %6580 = vst [vmem:[#allocation25_spill] sm:$0xff] %v5555_v5 }
 0x2c0   : > { %v1761_v11 = vadd.f32 %v1729_v27, %v1681_v19  ;;  %v1653_v20 = vmax.f32 %v1603_v38, 0.0  ;;  %v1701_v52 = vunpack.c.l.bf16 %v1684_v10  ;;  %v1741_v43 = vadd.f32 %v1709_v46, %v1661_v14  ;;  %v5573_v14 = vpop.permute.xlu2 %1873 }
 0x2c1   : > { %v1762_v21 = vadd.f32 %v1730_v56, %v1682_v59  ;;  %4019 = vmatmul.msk.bf16.vlgmr.msrb.gmra.mxu0 %vm1190_vm3, %v5441_v51  ;;  %v1654_v12 = vmax.f32 %v1632_v62, 0.0  ;;  %v1702_v2 = vunpack.c.h.bf16 %v1684_v10  ;;  %v1742_v7 = vadd.f32 %v1710_v0, %v1662_v33  ;;  %v4144_v56 = vld [vmem:[%s6573_s6 + $0x30] sm:$0xff]  ;;  %6585 = vst [vmem:[#allocation30_spill] sm:$0xff] %v5573_v14 }
 0x2c2   : > { %v1777_v30 = vpack.c.bf16 %v1761_v11, %v1757_v40  ;;  %4027 = vmatmul.msk.bf16.vlgmr.msrb.gmra.mxu1 %vm1190_vm3, %v5441_v51  ;;  %v1737_v57 = vadd.f32 %v1705_v44, %v1657_v18  ;;  %v1769_v16 = vpack.c.bf16 %v1745_v4, %v1741_v43  ;;  %v1738_v48 = vadd.f32 %v1706_v61, %v1658_v1 }
 0x2c3   : > { %v1778_v42 = vpack.c.bf16 %v1762_v21, %v1758_v8  ;;  %v1770_v29 = vpack.c.bf16 %v1746_v41, %v1742_v7  ;;  %v1733_v24 = vadd.f32 %v1701_v52, %v1653_v20  ;;  %v1734_v55 = vadd.f32 %v1702_v2, %v1654_v12 }
 0x2c4   : > { %2057 = vmatpush.bf16.msrb.mxu2 %v1777_v30 }
 0x2c5   : > { %2106 = vmatpush.bf16.msrb.mxu3 %v1778_v42  ;;  %v1765_v28 = vpack.c.bf16 %v1737_v57, %v1733_v24  ;;  %v1766_v27 = vpack.c.bf16 %v1738_v48, %v1734_v55 }
 0x2c6   : > { %v5575_v46 = vpop.permute.xlu0 %1878  ;;  %v5599_v61 = vpop.permute.xlu1 %1863 }
 0x2c7   : > { %6586 = vst [vmem:[#allocation31_spill] sm:$0xff] %v5575_v46 }
 0x2c8   : > { %2058 = vmatpush.bf16.msrb.mxu2 %v1773_v6  ;;  %v5587_v47 = vpop.permute.xlu2 %1868 }
 0x2c9   : > { %2107 = vmatpush.bf16.msrb.mxu3 %v1774_v53 }
 0x2cc   : > { %2059 = vmatpush.bf16.msrb.mxu2 %v1769_v16 }
 0x2cd   : > { %2108 = vmatpush.bf16.msrb.mxu3 %v1770_v29 }
 0x2ce   : > { %v5589_v18 = vpop.permute.xlu0 %1853  ;;  %v5613_v2 = vpop.permute.xlu1 %1858 }
 0x2d0   : > { %2060 = vmatpush.bf16.msrb.mxu2 %v1765_v28  ;;  %v5601_v41 = vpop.permute.xlu2 %1843 }
 0x2d1   : > { %2109 = vmatpush.bf16.msrb.mxu3 %v1766_v27  ;;  %4020 = vmatmul.msk.bf16.gmra.mxu0 %vm1190_vm3, %v4139_v9 }
 0x2d2   : > { %4028 = vmatmul.msk.bf16.gmra.mxu1 %vm1190_vm3, %v4139_v9 }
 0x2d3   : > { %4035 = vmatmul.msk.bf16.vlgmr.msrb.gmra.mxu2 %vm1190_vm3, %v5441_v51 }
 0x2d4   : > { %4043 = vmatmul.msk.bf16.vlgmr.msrb.gmra.mxu3 %vm1190_vm3, %v5441_v51  ;;  %v4145_v51 = vld [vmem:[%s6573_s6 + $0x38] sm:$0xff] }
 0x2d6   : > { %v5603_v53 = vpop.permute.xlu0 %1848  ;;  %v5627_v55 = vpop.permute.xlu1 %1833 }
 0x2d7   : > { %6597 = vst [vmem:[#allocation42_spill] sm:$0xff] %v5627_v55 }
 0x2d8   : > { %v5625_v24 = vpop.permute.xlu2 %1838 }
 0x2d9   : > { %6596 = vst [vmem:[#allocation41_spill] sm:$0xff] %v5625_v24 }
 0x2de   : > { %v5623_v29 = vpop.permute.xlu0 %1823 }
 0x2df   : > { %6595 = vst [vmem:[#allocation40_spill] sm:$0xff] %v5623_v29 }
 0x2e1   : > { %4021 = vmatmul.msk.bf16.gmra.mxu0 %vm1190_vm3, %v4140_v17 }
 0x2e2   : > { %4029 = vmatmul.msk.bf16.gmra.mxu1 %vm1190_vm3, %v4140_v17 }
 0x2e3   : > { %4036 = vmatmul.msk.bf16.gmra.mxu2 %vm1190_vm3, %v4139_v9 }
 0x2e4   : > { %4044 = vmatmul.msk.bf16.gmra.mxu3 %vm1190_vm3, %v4139_v9 }
 0x2f1   : > { %4022 = vmatmul.msk.bf16.gmra.mxu0 %vm1190_vm3, %v4141_v26 }
 0x2f2   : > { %4030 = vmatmul.msk.bf16.gmra.mxu1 %vm1190_vm3, %v4141_v26 }
 0x2f3   : > { %4037 = vmatmul.msk.bf16.gmra.mxu2 %vm1190_vm3, %v4140_v17 }
 0x2f4   : > { %4045 = vmatmul.msk.bf16.gmra.mxu3 %vm1190_vm3, %v4140_v17 }
 0x301   : > { %4023 = vmatmul.msk.bf16.gmra.mxu0 %vm1190_vm3, %v4142_v39 }
 0x302   : > { %4031 = vmatmul.msk.bf16.gmra.mxu1 %vm1190_vm3, %v4142_v39 }
 0x303   : > { %4038 = vmatmul.msk.bf16.gmra.mxu2 %vm1190_vm3, %v4141_v26 }
 0x304   : > { %4046 = vmatmul.msk.bf16.gmra.mxu3 %vm1190_vm3, %v4141_v26  ;;  %v5638_v26 = vpop.permute.xlu0 %1818 }
 0x305   : > { %6600 = vst [vmem:[#allocation45_spill] sm:$0xff] %v5638_v26 }
 0x311   : > { %4024 = vmatmul.msk.bf16.gmra.mxu0 %vm1190_vm3, %v4143_v32 }
 0x312   : > { %4032 = vmatmul.msk.bf16.gmra.mxu1 %vm1190_vm3, %v4143_v32 }
 0x313   : > { %4039 = vmatmul.msk.bf16.gmra.mxu2 %vm1190_vm3, %v4142_v39 }
 0x314   : > { %4047 = vmatmul.msk.bf16.gmra.mxu3 %vm1190_vm3, %v4142_v39  ;;  %v5640_v39 = vpop.permute.xlu2 %1813 }
 0x315   : > { %6601 = vst [vmem:[#allocation46_spill] sm:$0xff] %v5640_v39 }
 0x321   : > { %4025 = vmatmul.msk.bf16.gmra.mxu0 %vm1190_vm3, %v4144_v56 }
 0x322   : > { %4033 = vmatmul.msk.bf16.gmra.mxu1 %vm1190_vm3, %v4144_v56 }
 0x323   : > { %4040 = vmatmul.msk.bf16.gmra.mxu2 %vm1190_vm3, %v4143_v32 }
 0x324   : > { %4048 = vmatmul.msk.bf16.gmra.mxu3 %vm1190_vm3, %v4143_v32 }
 0x331   : > { %4026 = vmatmul.msk.bf16.gmra.mxu0 %vm1190_vm3, %v4145_v51 }
 0x332   : > { %4034 = vmatmul.msk.bf16.gmra.mxu1 %vm1190_vm3, %v4145_v51 }
 0x333   : > { %4041 = vmatmul.msk.bf16.gmra.mxu2 %vm1190_vm3, %v4144_v56 }
 0x334   : > { %4049 = vmatmul.msk.bf16.gmra.mxu3 %vm1190_vm3, %v4144_v56 }
 0x33e   : > { %v5521_v23 = vpop.f32.mrf.mxu0 }
 0x33f   : > { %v5523_v25 = vpop.f32.mrf.mxu1 }
 0x343   : > { %4042 = vmatmul.msk.bf16.gmra.mxu2 %vm1190_vm3, %v4145_v51 }
 0x344   : > { %4050 = vmatmul.msk.bf16.gmra.mxu3 %vm1190_vm3, %v4145_v51  ;;  %v1965_v51 = vadd.f32 %v5521_v23, %v5640_v39 }
 0x346   : > { %v1966_v37 = vpop.f32.mrf.mxu0 }
 0x347   : > { %v2015_v19 = vpop.f32.mrf.mxu1  ;;  %v1967_v32 = vadd.f32 %v1966_v37, %v5638_v26 }
 0x348   : > { %v2016_v56 = vadd.f32 %v2015_v19, %v5638_v26 }
 0x349   : > { %v2155_v37 = vmax.f32 %v1967_v32, 0.0 }
 0x34a   : > { %v2156_v26 = vmax.f32 %v2016_v56, 0.0 }
 0x34e   : > { %v5527_v15 = vpop.f32.mrf.mxu0 }
 0x34f   : > { %v5529_v35 = vpop.f32.mrf.mxu1 }
 0x350   : > { %v2019_v32 = vadd.f32 %v5529_v35, %v5623_v29 }
 0x356   : > { %v5531_v31 = vpop.f32.mrf.mxu0  ;;  %v5533_v59 = vpop.f32.mrf.mxu2 }
 0x357   : > { %6574 = vst [vmem:[#allocation19_spill] sm:$0xff] %v5533_v59  ;;  %v5535_v58 = vpop.f32.mrf.mxu1  ;;  %v5537_v45 = vpop.f32.mrf.mxu3  ;;  %v2215_v59 = vld [vmem:[%s5646_s8] sm:$0xff] }
 0x358   : > { %6575 = vst [vmem:[#allocation20_spill] sm:$0xff] %v5537_v45  ;;  %v2217_v45 = vld [vmem:[%s5646_s8 + $0x10] sm:$0xff] }
 0x359   : > { %v2251_v19 = vunpack.c.l.bf16 %v2217_v45  ;;  %v2252_v23 = vunpack.c.h.bf16 %v2217_v45  ;;  %v5669_v45 = vld [vmem:[%s5646_s8 + $0x40] sm:$0xff] }
 0x35e   : > { %v5539_v40 = vpop.f32.mrf.mxu0  ;;  %v5541_v11 = vpop.f32.mrf.mxu2 }
 0x35f   : > { %6576 = vst [vmem:[#allocation21_spill] sm:$0xff] %v5541_v11  ;;  %v5543_v36 = vpop.f32.mrf.mxu1  ;;  %v5545_v60 = vpop.f32.mrf.mxu3 }
 0x360   : > { %6577 = vst [vmem:[#allocation22_spill] sm:$0xff] %v5545_v60  ;;  %v2014_v60 = vadd.f32 %v5523_v25, %v5640_v39  ;;  %v1970_v25 = vadd.f32 %v5527_v15, %v5623_v29  ;;  %v2221_v39 = vld [vmem:[%s5646_s8 + $0x30] sm:$0xff] }
 0x361   : > { %v2260_v35 = vunpack.c.h.bf16 %v2221_v39 }
 0x366   : > { %v5547_v34 = vpop.f32.mrf.mxu0  ;;  %v5549_v8 = vpop.f32.mrf.mxu2 }
 0x367   : > { %6578 = vst [vmem:[#allocation23_spill] sm:$0xff] %v5549_v8  ;;  %v5551_v21 = vpop.f32.mrf.mxu1  ;;  %v5553_v63 = vpop.f32.mrf.mxu3  ;;  %v2219_v8 = vld [vmem:[%s5646_s8 + $0x20] sm:$0xff] }
 0x368   : > { %6579 = vst [vmem:[#allocation24_spill] sm:$0xff] %v5553_v63  ;;  %v2255_v56 = vunpack.c.l.bf16 %v2219_v8 }
 0x36e   : > { %v5557_v22 = vpop.f32.mrf.mxu0  ;;  %v5559_v30 = vpop.f32.mrf.mxu2 }
 0x36f   : > { %6581 = vst [vmem:[#allocation26_spill] sm:$0xff] %v5559_v30  ;;  %v5561_v54 = vpop.f32.mrf.mxu1  ;;  %v5563_v13 = vpop.f32.mrf.mxu3 }
 0x370   : > { %6582 = vst [vmem:[#allocation27_spill] sm:$0xff] %v5563_v13 }
 0x376   : > { %v5565_v3 = vpop.f32.mrf.mxu0  ;;  %v5567_v49 = vpop.f32.mrf.mxu2 }
 0x377   : > { %6583 = vst [vmem:[#allocation28_spill] sm:$0xff] %v5567_v49  ;;  %v5569_v42 = vpop.f32.mrf.mxu1  ;;  %v5571_v38 = vpop.f32.mrf.mxu3  ;;  %v2247_v49 = vunpack.c.l.bf16 %v2215_v59 }
 0x378   : > { %6584 = vst [vmem:[#allocation29_spill] sm:$0xff] %v5571_v38  ;;  %v2151_v38 = vmax.f32 %v1965_v51, 0.0 }
 0x37a   : > { %v5682_v29 = vadd.f32 %v2247_v49, %v2151_v38  ;;  %v5698_v49 = vadd.f32 %v5539_v40, %v5627_v55  ;;  %v5702_v38 = vadd.f32 %v5543_v36, %v5627_v55  ;;  %v2245_v55 = vld [vmem:[%s5646_s8 + $0xf0] sm:$0xff] }
 0x37c   : > { %6607 = vst [vmem:[#allocation52_spill] sm:$0xff] %v5682_v29 }
 0x37e   : > { %v5579_v10 = vpop.f32.mrf.mxu0  ;;  %v5581_v62 = vpop.f32.mrf.mxu2 }
 0x37f   : > { %6587 = vst [vmem:[#allocation32_spill] sm:$0xff] %v5581_v62  ;;  %v5583_v33 = vpop.f32.mrf.mxu1  ;;  %v5585_v0 = vpop.f32.mrf.mxu3  ;;  %v2152_v62 = vmax.f32 %v2014_v60, 0.0  ;;  %v2259_v60 = vunpack.c.l.bf16 %v2221_v39 }
 0x380   : > { %6588 = vst [vmem:[#allocation33_spill] sm:$0xff] %v5585_v0  ;;  %v5664_v0 = vpop.permute.xlu1 %1828 }
 0x381   : > { %6604 = vst [vmem:[#allocation49_spill] sm:$0xff] %v5664_v0  ;;  %v1972_v51 = vadd.f32 %v5531_v31, %v5664_v0  ;;  %v2021_v15 = vadd.f32 %v5535_v58, %v5664_v0  ;;  %v5729_v58 = vld [vmem:[%s5646_s8 + $0x90] sm:$0xff] }
 0x383   : > { %v2164_v39 = vmax.f32 %v2021_v15, 0.0 }
 0x386   : > { %v5591_v44 = vpop.f32.mrf.mxu0  ;;  %v5593_v4 = vpop.f32.mrf.mxu2 }
 0x387   : > { %6589 = vst [vmem:[#allocation34_spill] sm:$0xff] %v5593_v4  ;;  %v5595_v6 = vpop.f32.mrf.mxu1  ;;  %v5597_v1 = vpop.f32.mrf.mxu3  ;;  %v2256_v4 = vunpack.c.h.bf16 %v2219_v8  ;;  %v2159_v8 = vmax.f32 %v1970_v25, 0.0 }
 0x388   : > { %6590 = vst [vmem:[#allocation35_spill] sm:$0xff] %v5597_v1  ;;  %v2248_v1 = vunpack.c.h.bf16 %v2215_v59  ;;  %v5680_v59 = vadd.f32 %v2252_v23, %v2156_v26  ;;  %v5694_v26 = vld [vmem:[%s5646_s8 + $0x38] sm:$0xff]  ;;  %v2163_v23 = vmax.f32 %v1972_v51, 0.0  ;;  %v5715_v51 = vadd.f32 %v5551_v21, %v5625_v24 }
 0x389   : > { %6609 = vst [vmem:[#allocation54_spill] sm:$0xff] %v5694_v26 }
 0x38a   : > { %6606 = vst [vmem:[#allocation51_spill] sm:$0xff] %v5680_v59 }
 0x38e   : > { %v5605_v20 = vpop.f32.mrf.mxu0  ;;  %v5607_v52 = vpop.f32.mrf.mxu2 }
 0x38f   : > { %6591 = vst [vmem:[#allocation36_spill] sm:$0xff] %v5607_v52  ;;  %v5609_v43 = vpop.f32.mrf.mxu1  ;;  %v5611_v12 = vpop.f32.mrf.mxu3  ;;  %v5678_v52 = vadd.f32 %v2251_v19, %v2155_v37  ;;  %v5691_v19 = vld [vmem:[%s5646_s8 + $0x60] sm:$0xff] }
 0x390   : > { %6592 = vst [vmem:[#allocation37_spill] sm:$0xff] %v5611_v12  ;;  %v5676_v12 = vld [vmem:[%s5646_s8 + $0x50] sm:$0xff] }
 0x391   : > { %6605 = vst [vmem:[#allocation50_spill] sm:$0xff] %v5678_v52 }
 0x396   : > { %v5615_v7 = vpop.f32.mrf.mxu0  ;;  %v5617_v57 = vpop.f32.mrf.mxu2 }
 0x397   : > { %6593 = vst [vmem:[#allocation38_spill] sm:$0xff] %v5617_v57  ;;  %v5619_v16 = vpop.f32.mrf.mxu1  ;;  %v5621_v48 = vpop.f32.mrf.mxu3  ;;  %v5686_v57 = vadd.f32 %v2248_v1, %v2152_v62  ;;  %v5705_v62 = vld [vmem:[%s5646_s8 + $0x70] sm:$0xff] }
 0x398   : > { %6594 = vst [vmem:[#allocation39_spill] sm:$0xff] %v5621_v48  ;;  %v5723_v48 = vadd.f32 %v2255_v56, %v2159_v8  ;;  %v5739_v56 = vadd.f32 %v2259_v60, %v2163_v23  ;;  %v5741_v8 = vadd.f32 %v2260_v35, %v2164_v39  ;;  %v2243_v23 = vld [vmem:[%s5646_s8 + $0xe0] sm:$0xff] }
 0x399   : > { %6608 = vst [vmem:[#allocation53_spill] sm:$0xff] %v5686_v57  ;;  %v2241_v57 = vld [vmem:[%s5646_s8 + $0xd0] sm:$0xff]  ;;  %v2303_v39 = vunpack.c.l.bf16 %v2243_v23  ;;  %v2304_v37 = vunpack.c.h.bf16 %v2243_v23  ;;  %v2308_v23 = vunpack.c.h.bf16 %v2245_v55 }
 0x39e   : > { %v5629_v9 = vpop.f32.mrf.mxu0  ;;  %v5631_v28 = vpop.f32.mrf.mxu2 }
 0x39f   : > { %6598 = vst [vmem:[#allocation43_spill] sm:$0xff] %v5631_v28  ;;  %v5634_v27 = vpop.f32.mrf.mxu1  ;;  %v5636_v17 = vpop.f32.mrf.mxu3  ;;  %v1995_v29 = vadd.f32 %v5629_v9, %v5573_v14  ;;  %v2307_v28 = vunpack.c.l.bf16 %v2245_v55 }
 0x3a0   : > { %6599 = vst [vmem:[#allocation44_spill] sm:$0xff] %v5636_v17  ;;  %v2160_v17 = vmax.f32 %v2019_v32, 0.0  ;;  %v5711_v32 = vadd.f32 %v5547_v34, %v5625_v24  ;;  %v5737_v24 = vld [vmem:[%s5646_s8 + $0xa0] sm:$0xff]  ;;  %v5746_v34 = vld [vmem:[%s5646_s8 + $0xb0] sm:$0xff] }
 0x3a1   : > { %v2291_v26 = vunpack.c.l.bf16 %v5746_v34 }
 0x3a2   : > { %v5731_v0 = vadd.f32 %v2256_v4, %v2160_v17  ;;  %v5749_v4 = vld [vmem:[%s5646_s8 + $0xc0] sm:$0xff] }
 0x3a3   : > { %v2295_v36 = vunpack.c.l.bf16 %v5749_v4 }
 0x3a6   : > { %v5652_v11 = vpop.f32.mrf.mxu0  ;;  %v5654_v63 = vpop.f32.mrf.mxu2 }
 0x3a7   : > { %6602 = vst [vmem:[#allocation47_spill] sm:$0xff] %v5654_v63  ;;  %v5657_v13 = vpop.f32.mrf.mxu1  ;;  %v5659_v30 = vpop.f32.mrf.mxu3  ;;  %v1997_v31 = vadd.f32 %v5652_v11, %v5575_v46 }
 0x3a8   : > { %6603 = vst [vmem:[#allocation48_spill] sm:$0xff] %v5659_v30  ;;  %v2046_v35 = vadd.f32 %v5657_v13, %v5575_v46  ;;  %v2300_v46 = vunpack.c.h.bf16 %v2241_v57 }
 0x3ae   : > { %v1999_v1 = vpop.f32.mrf.mxu0  ;;  %v5707_v25 = vpop.f32.mrf.mxu2 }
 0x3af   : > { %6610 = vst [vmem:[#allocation55_spill] sm:$0xff] %v5707_v25  ;;  %v2048_v40 = vpop.f32.mrf.mxu1  ;;  %v5717_v15 = vpop.f32.mrf.mxu3  ;;  %v2000_v60 = vadd.f32 %v1999_v1, %v5555_v5  ;;  %v2296_v1 = vunpack.c.h.bf16 %v5749_v4  ;;  %v2044_v4 = vadd.f32 %v5634_v27, %v5573_v14  ;;  %v2203_v25 = vmax.f32 %v1997_v31, 0.0 }
 0x3b0   : > { %6611 = vst [vmem:[#allocation56_spill] sm:$0xff] %v5717_v15  ;;  %v2049_v21 = vadd.f32 %v2048_v40, %v5555_v5  ;;  %v1992_v15 = vadd.f32 %v5615_v7, %v5587_v47  ;;  %v2199_v27 = vmax.f32 %v1995_v29, 0.0 }
 0x3b1   : > { %v2207_v17 = vmax.f32 %v2000_v60, 0.0  ;;  %v2204_v60 = vmax.f32 %v2046_v35, 0.0  ;;  %v2200_v55 = vmax.f32 %v2044_v4, 0.0  ;;  %v6614_v4 = vunpack.c.h.bf16 %v5746_v34 }
 0x3b2   : > { %v2208_v63 = vmax.f32 %v2049_v21, 0.0  ;;  %v6618_v34 = vunpack.c.l.bf16 %v5676_v12 }
 0x3b3   : > { %v2367_v21 = vadd.f32 %v2303_v39, %v2207_v17  ;;  %v2364_v29 = vadd.f32 %v2300_v46, %v2204_v60  ;;  %v2034_v46 = vadd.f32 %v5583_v33, %v5589_v18 }
 0x3b4   : > { %v2368_v7 = vadd.f32 %v2304_v37, %v2208_v63  ;;  %v1985_v63 = vadd.f32 %v5579_v10, %v5589_v18 }
 0x3b6   : > { %v2001_v59 = vpop.f32.mrf.mxu0  ;;  %v5770_v40 = vpop.f32.mrf.mxu2  ;;  %v2183_v33 = vmax.f32 %v1985_v63, 0.0  ;;  %v6623_v63 = vunpack.c.l.bf16 %v5705_v62 }
 0x3b7   : > { %6612 = vst [vmem:[#allocation57_spill] sm:$0xff] %v5770_v40  ;;  %v2002_v52 = vadd.f32 %v2001_v59, %v5577_v50  ;;  %v2050_v30 = vpop.f32.mrf.mxu1  ;;  %v5775_v11 = vpop.f32.mrf.mxu3  ;;  %v2299_v40 = vunpack.c.l.bf16 %v2241_v57  ;;  %v2041_v59 = vadd.f32 %v5619_v16, %v5587_v47  ;;  %v2195_v16 = vmax.f32 %v1992_v15, 0.0 }
 0x3b8   : > { %6613 = vst [vmem:[#allocation58_spill] sm:$0xff] %v5775_v11  ;;  %v2051_v13 = vadd.f32 %v2050_v30, %v5577_v50  ;;  %v1990_v11 = vadd.f32 %v5605_v20, %v5599_v61  ;;  %v2039_v30 = vadd.f32 %v5609_v43, %v5599_v61  ;;  %v1982_v43 = vadd.f32 %v5565_v3, %v5603_v53 }
 0x3b9   : > { %v2211_v9 = vmax.f32 %v2002_v52, 0.0  ;;  %v1987_v52 = vadd.f32 %v5591_v44, %v5613_v2  ;;  %v2363_v35 = vadd.f32 %v2299_v40, %v2203_v25  ;;  %v2196_v20 = vmax.f32 %v2041_v59, 0.0 }
 0x3ba   : > { %v2212_v5 = vmax.f32 %v2051_v13, 0.0  ;;  %v2036_v13 = vadd.f32 %v5595_v6, %v5613_v2  ;;  %v2359_v44 = vadd.f32 %v2295_v36, %v2199_v27  ;;  %v2231_v6 = vld [vmem:[%s5646_s8 + $0x80] sm:$0xff]  ;;  %v2192_v25 = vmax.f32 %v2039_v30, 0.0 }
 0x3bb   : > { %v2371_v14 = vadd.f32 %v2307_v28, %v2211_v9  ;;  %v2360_v15 = vadd.f32 %v2296_v1, %v2200_v55  ;;  %v1980_v3 = vadd.f32 %v5557_v22, %v5601_v41  ;;  %v2187_v39 = vmax.f32 %v1987_v52, 0.0 }
 0x3bc   : > { %v2372_v31 = vadd.f32 %v2308_v23, %v2212_v5  ;;  %v2191_v5 = vmax.f32 %v1990_v11, 0.0  ;;  %v2355_v10 = vadd.f32 %v2291_v26, %v2195_v16  ;;  %v2399_v40 = vpack.c.bf16 %v2363_v35, %v2359_v44 }
 0x3bd   : > { %v2403_v57 = vpack.c.bf16 %v2371_v14, %v2367_v21  ;;  %v2031_v14 = vadd.f32 %v5569_v42, %v5603_v53  ;;  %v2029_v36 = vadd.f32 %v5561_v54, %v5601_v41  ;;  %v2188_v11 = vmax.f32 %v2036_v13, 0.0 }
 0x3be   : > { %v2404_v17 = vpack.c.bf16 %v2372_v31, %v2368_v7  ;;  %v5792_v28 = vpop.f32.mrf.mxu2  ;;  %v2356_v42 = vadd.f32 %v6614_v4, %v2196_v20  ;;  %v2400_v23 = vpack.c.bf16 %v2364_v29, %v2360_v15  ;;  %v2179_v9 = vmax.f32 %v1982_v43, 0.0  ;;  %v5830_v20 = vld [vmem:[%s5646_s8 + $0x58] sm:$0xff] }
 0x3bf   : > { %v5798_v37 = vpop.f32.mrf.mxu3  ;;  %2727 = vmatpush.bf16.msra.mxu0 %v2403_v57  ;;  %v2279_v59 = vunpack.c.l.bf16 %v2231_v6  ;;  %v6615_v1 = vunpack.c.l.bf16 %v5737_v24  ;;  %v2180_v22 = vmax.f32 %v2031_v14, 0.0  ;;  %v2184_v27 = vmax.f32 %v2034_v46, 0.0 }
 0x3c0   : > { %2816 = vmatpush.bf16.msra.mxu1 %v2404_v17  ;;  %v2280_v26 = vunpack.c.h.bf16 %v2231_v6  ;;  %v6616_v21 = vunpack.c.h.bf16 %v5737_v24  ;;  %v6617_v54 = vmax.f32 %v5711_v32, 0.0  ;;  %v2175_v7 = vmax.f32 %v1980_v3, 0.0 }
 0x3c1   : > { %v2351_v60 = vadd.f32 %v6615_v1, %v2191_v5  ;;  %v6619_v31 = vunpack.c.l.bf16 %v5729_v58  ;;  %v6620_v35 = vmax.f32 %v5715_v51, 0.0  ;;  %v6621_v57 = vunpack.c.h.bf16 %v5676_v12 }
 0x3c2   : > { %v2352_v30 = vadd.f32 %v6616_v21, %v2192_v25  ;;  %v5819_v55 = vadd.f32 %v6618_v34, %v6617_v54  ;;  %v2176_v24 = vmax.f32 %v2029_v36, 0.0  ;;  %v6622_v32 = vunpack.c.h.bf16 %v5729_v58  ;;  %v5853_v36 = vld [vmem:[%s5646_s8 + $0x78] sm:$0xff] }
 0x3c3   : > { %2728 = vmatpush.bf16.msra.mxu0 %v2399_v40  ;;  %v2347_v52 = vadd.f32 %v6619_v31, %v2187_v39  ;;  %v2395_v16 = vpack.c.bf16 %v2355_v10, %v2351_v60  ;;  %v5827_v13 = vadd.f32 %v6621_v57, %v6620_v35  ;;  %v2339_v5 = vadd.f32 %v6623_v63, %v2179_v9  ;;  %v6632_v57 = vld [vmem:[#allocation31_spill] sm:$0xff] }
 0x3c4   : > { %2817 = vmatpush.bf16.msra.mxu1 %v2400_v23  ;;  %v2348_v29 = vadd.f32 %v6622_v32, %v2188_v11  ;;  %v2396_v43 = vpack.c.bf16 %v2356_v42, %v2352_v30  ;;  %v2343_v44 = vadd.f32 %v2279_v59, %v2183_v33  ;;  %v2379_v12 = vpack.c.bf16 %v5739_v56, %v5723_v48  ;;  %v5868_v33 = vld [vmem:[%s5646_s8 + $0xc8] sm:$0xff]  ;;  %v2242_v32 = vld [vmem:[%s5646_s8 + $0xd8] sm:$0xff] }
 0x3c5   : > { %v2380_v51 = vpack.c.bf16 %v5741_v8, %v5731_v0  ;;  %v6624_v58 = vmax.f32 %v5698_v49, 0.0  ;;  %v6625_v6 = vunpack.c.l.bf16 %v5669_v45  ;;  %v6626_v25 = vmax.f32 %v5702_v38, 0.0  ;;  %v5860_v38 = vld [vmem:[%s5646_s8 + $0x98] sm:$0xff] }
 0x3c6   : > { %v2097_v17 = vpop.f32.mrf.mxu2  ;;  %v6627_v15 = vunpack.c.h.bf16 %v5669_v45  ;;  %v6628_v39 = vunpack.c.h.bf16 %v5705_v62  ;;  %v2344_v40 = vadd.f32 %v2280_v26, %v2184_v27  ;;  %v6629_v11 = vunpack.c.l.bf16 %v5691_v19  ;;  %v5865_v62 = vld [vmem:[%s5646_s8 + $0xb8] sm:$0xff]  ;;  %v6631_v26 = vld [vmem:[#allocation25_spill] sm:$0xff] }
 0x3c7   : > { %v2146_v14 = vpop.f32.mrf.mxu3  ;;  %2729 = vmatpush.bf16.msra.mxu0 %v2395_v16  ;;  %v2327_v46 = vadd.f32 %v6625_v6, %v6624_v58  ;;  %v2269_v4 = vunpack.c.l.bf16 %v5830_v20  ;;  %v2270_v42 = vunpack.c.h.bf16 %v5830_v20  ;;  %v2391_v45 = vpack.c.bf16 %v2347_v52, %v2343_v44  ;;  %v6634_v44 = vld [vmem:[#allocation57_spill] sm:$0xff]  ;;  %v5931_v0 = vld [vmem:[%s6646_s23] sm:$0xff]  ;;  %s3673_s23 = scalar_lea.hbm %s6678_s13, %s4162_s16 }
 0x3c8   : > { %v5848_v3 = vadd.f32 %v6627_v15, %v6626_v25  ;;  %v2340_v10 = vadd.f32 %v6628_v39, %v2180_v22  ;;  %2818 = vmatpush.bf16.msra.mxu1 %v2396_v43  ;;  %v2335_v49 = vadd.f32 %v6629_v11, %v2175_v7  ;;  %v6630_v23 = vunpack.c.h.bf16 %v5691_v19  ;;  %v2244_v19 = vld [vmem:[%s5646_s8 + $0xe8] sm:$0xff]  ;;  %v6648_v8 = vld [vmem:[#allocation34_spill] sm:$0xff] }
 0x3c9   : > { %v2392_v59 = vpack.c.bf16 %v2348_v29, %v2344_v40  ;;  %v2383_v1 = vpack.c.bf16 %v5819_v55, %v2327_v46  ;;  %v2277_v22 = vunpack.c.l.bf16 %v5853_v36  ;;  %v2278_v27 = vunpack.c.h.bf16 %v5853_v36  ;;  %v2246_v55 = vld [vmem:[%s5646_s8 + $0xf8] sm:$0xff]  ;;  %v6668_v36 = vld [vmem:[#allocation45_spill] sm:$0xff] }
 0x3ca   : > { %v2336_v9 = vadd.f32 %v6630_v23, %v2176_v24  ;;  %v2384_v60 = vpack.c.bf16 %v5827_v13, %v5848_v3  ;;  %v2098_v21 = vadd.f32 %v2097_v17, %v6631_v26  ;;  %v2387_v30 = vpack.c.bf16 %v2339_v5, %v2335_v49  ;;  %v6633_v5 = vld [vmem:[#allocation30_spill] sm:$0xff]  ;;  %v6637_v23 = vld [vmem:[#allocation56_spill] sm:$0xff] }
 0x3cb   : > { %2730 = vmatpush.bf16.msra.mxu0 %v2391_v45  ;;  %v2285_v54 = vunpack.c.l.bf16 %v5860_v38  ;;  %v2286_v34 = vunpack.c.h.bf16 %v5860_v38  ;;  %v2147_v7 = vadd.f32 %v2146_v14, %v6631_v26  ;;  %v2293_v52 = vunpack.c.l.bf16 %v5865_v62  ;;  %v6674_v20 = vld [vmem:[#allocation54_spill] sm:$0xff] }
 0x3cc   : > { %2819 = vmatpush.bf16.msra.mxu1 %v2392_v59  ;;  %v2388_v31 = vpack.c.bf16 %v2340_v10, %v2336_v9  ;;  %v2294_v16 = vunpack.c.h.bf16 %v5865_v62  ;;  %v2297_v35 = vunpack.c.l.bf16 %v5868_v33  ;;  %v2095_v13 = vadd.f32 %v5792_v28, %v6632_v57  ;;  %v6635_v28 = vld [vmem:[#allocation58_spill] sm:$0xff]  ;;  %v6636_v10 = vld [vmem:[#allocation55_spill] sm:$0xff] }
 0x3cd   : > { %v2298_v24 = vunpack.c.h.bf16 %v5868_v33  ;;  %v2144_v29 = vadd.f32 %v5798_v37, %v6632_v57  ;;  %v2305_v17 = vunpack.c.l.bf16 %v2244_v19  ;;  %v2306_v43 = vunpack.c.h.bf16 %v2244_v19  ;;  %v6652_v62 = vld [vmem:[#allocation35_spill] sm:$0xff] }
 0x3ce   : > { %v2099_v63 = vpop.f32.mrf.mxu2  ;;  %v2093_v14 = vadd.f32 %v6634_v44, %v6633_v5  ;;  %v2209_v58 = vmax.f32 %v2098_v21, 0.0  ;;  %v2309_v46 = vunpack.c.l.bf16 %v2246_v55  ;;  %v2142_v15 = vadd.f32 %v6635_v28, %v6633_v5  ;;  %v6638_v21 = vld [vmem:[#allocation47_spill] sm:$0xff] }
 0x3cf   : > { %v2100_v6 = vadd.f32 %v2099_v63, %v5577_v50  ;;  %v2148_v25 = vpop.f32.mrf.mxu3  ;;  %2731 = vmatpush.bf16.msra.mxu0 %v2387_v30  ;;  %v2210_v3 = vmax.f32 %v2147_v7, 0.0  ;;  %v2310_v37 = vunpack.c.h.bf16 %v2246_v55  ;;  %v2090_v40 = vadd.f32 %v6636_v10, %v5587_v47  ;;  %v2236_v55 = vld [vmem:[%s5646_s8 + $0xa8] sm:$0xff] }
 0x3d0   : > { %v2149_v39 = vadd.f32 %v2148_v25, %v5577_v50  ;;  %2820 = vmatpush.bf16.msra.mxu1 %v2388_v31  ;;  %v2205_v11 = vmax.f32 %v2095_v13, 0.0  ;;  %v2301_v49 = vunpack.c.l.bf16 %v2242_v32  ;;  %v2139_v9 = vadd.f32 %v6637_v23, %v5587_v47  ;;  %v6639_v31 = vld [vmem:[#allocation48_spill] sm:$0xff]  ;;  %v6640_v47 = vld [vmem:[#allocation43_spill] sm:$0xff]  ;;  %v6642_v25 = vld [vmem:[#allocation38_spill] sm:$0xff] }
 0x3d1   : > { %v2213_v45 = vmax.f32 %v2100_v6, 0.0  ;;  %v2206_v33 = vmax.f32 %v2144_v29, 0.0  ;;  %v2302_v59 = vunpack.c.h.bf16 %v2242_v32  ;;  %v2088_v19 = vadd.f32 %v6638_v21, %v5599_v61 }
 0x3d2   : > { %v2214_v26 = vmax.f32 %v2149_v39, 0.0  ;;  %v2201_v30 = vmax.f32 %v2093_v14, 0.0  ;;  %v2369_v50 = vadd.f32 %v2305_v17, %v2209_v58  ;;  %v2137_v57 = vadd.f32 %v6639_v31, %v5599_v61  ;;  %v6641_v14 = vld [vmem:[#allocation44_spill] sm:$0xff]  ;;  %v6656_v31 = vld [vmem:[#allocation41_spill] sm:$0xff] }
 0x3d3   : > { %v2373_v7 = vadd.f32 %v2309_v46, %v2213_v45  ;;  %2732 = vmatpush.bf16.msra.mxu0 %v2383_v1  ;;  %v2202_v13 = vmax.f32 %v2142_v15, 0.0  ;;  %v2370_v63 = vadd.f32 %v2306_v43, %v2210_v3  ;;  %v2085_v32 = vadd.f32 %v6640_v47, %v5613_v2  ;;  %v6643_v3 = vld [vmem:[#allocation39_spill] sm:$0xff] }
 0x3d4   : > { %v2374_v5 = vadd.f32 %v2310_v37, %v2214_v26  ;;  %2821 = vmatpush.bf16.msra.mxu1 %v2384_v60  ;;  %v2197_v29 = vmax.f32 %v2090_v40, 0.0  ;;  %v2365_v44 = vadd.f32 %v2301_v49, %v2205_v11  ;;  %v2134_v17 = vadd.f32 %v6641_v14, %v5613_v2  ;;  %v2232_v60 = vld [vmem:[%s5646_s8 + $0x88] sm:$0xff]  ;;  %v6659_v14 = vld [vmem:[#allocation42_spill] sm:$0xff] }
 0x3d5   : > { %v2405_v6 = vpack.c.bf16 %v2373_v7, %v2369_v50  ;;  %v2198_v58 = vmax.f32 %v2139_v9, 0.0  ;;  %v2366_v1 = vadd.f32 %v2302_v59, %v2206_v33  ;;  %v2083_v61 = vadd.f32 %v6642_v25, %v5589_v18  ;;  %v6644_v40 = vld [vmem:[#allocation36_spill] sm:$0xff]  ;;  %v6649_v33 = vld [vmem:[#allocation50_spill] sm:$0xff]  ;;  %v6653_v50 = vld [vmem:[#allocation51_spill] sm:$0xff] }
 0x3d6   : > { %v2406_v46 = vpack.c.bf16 %v2374_v5, %v2370_v63  ;;  %v2193_v28 = vmax.f32 %v2088_v19, 0.0  ;;  %v2289_v43 = vunpack.c.l.bf16 %v2236_v55  ;;  %v2361_v15 = vadd.f32 %v2297_v35, %v2201_v30  ;;  %v6650_v59 = vld [vmem:[#allocation52_spill] sm:$0xff]  ;;  %v6654_v7 = vld [vmem:[#allocation53_spill] sm:$0xff] }
 0x3d7   : > { %2733 = vmatpush.bf16.msra.mxu0 %v2379_v12  ;;  %2905 = vmatpush.bf16.msra.mxu2 %v2405_v6  ;;  %v2132_v39 = vadd.f32 %v6643_v3, %v5589_v18  ;;  %v2194_v37 = vmax.f32 %v2137_v57, 0.0  ;;  %v2290_v2 = vunpack.c.h.bf16 %v2236_v55  ;;  %v2362_v10 = vadd.f32 %v2298_v24, %v2202_v13  ;;  %v6645_v12 = vld [vmem:[#allocation37_spill] sm:$0xff]  ;;  %v6657_v57 = vld [vmem:[#allocation32_spill] sm:$0xff] }
 0x3d8   : > { %2822 = vmatpush.bf16.msra.mxu1 %v2380_v51  ;;  %2994 = vmatpush.bf16.msra.mxu3 %v2406_v46  ;;  %v2080_v35 = vadd.f32 %v6644_v40, %v5603_v53  ;;  %v2189_v11 = vmax.f32 %v2085_v32, 0.0  ;;  %v2357_v48 = vadd.f32 %v2293_v52, %v2197_v29  ;;  %v2401_v56 = vpack.c.bf16 %v2365_v44, %v2361_v15  ;;  %v6658_v32 = vld [vmem:[#allocation33_spill] sm:$0xff] }
 0x3d9   : > { %v2129_v18 = vadd.f32 %v6645_v12, %v5603_v53  ;;  %v2190_v49 = vmax.f32 %v2134_v17, 0.0  ;;  %v2358_v24 = vadd.f32 %v2294_v16, %v2198_v58  ;;  %v2402_v45 = vpack.c.bf16 %v2366_v1, %v2362_v10  ;;  %v2228_v53 = vld [vmem:[%s5646_s8 + $0x68] sm:$0xff]  ;;  %v6664_v10 = vld [vmem:[#allocation27_spill] sm:$0xff] }
 0x3da   : > { %v2078_v51 = vadd.f32 %v6648_v8, %v5601_v41  ;;  %v2185_v23 = vmax.f32 %v2083_v61, 0.0  ;;  %v2281_v9 = vunpack.c.l.bf16 %v2232_v60  ;;  %v2353_v52 = vadd.f32 %v2289_v43, %v2193_v28  ;;  %v6660_v17 = vld [vmem:[#allocation28_spill] sm:$0xff]  ;;  %v6661_v61 = vld [vmem:[#allocation29_spill] sm:$0xff]  ;;  %v6666_v12 = vld [vmem:[#allocation23_spill] sm:$0xff] }
 0x3db   : > { %v6651_v26 = vpack.c.bf16 %v6649_v33, %v6650_v59  ;;  %2906 = vmatpush.bf16.msra.mxu2 %v2401_v56  ;;  %v2127_v16 = vadd.f32 %v6652_v62, %v5601_v41  ;;  %v2186_v21 = vmax.f32 %v2132_v39, 0.0  ;;  %v2282_v19 = vunpack.c.h.bf16 %v2232_v60  ;;  %v6663_v60 = vld [vmem:[#allocation26_spill] sm:$0xff]  ;;  %v6665_v56 = vld [vmem:[#allocation40_spill] sm:$0xff] }
 0x3dc   : > { %v2354_v30 = vadd.f32 %v2290_v2, %v2194_v37  ;;  %v6655_v55 = vpack.c.bf16 %v6653_v50, %v6654_v7  ;;  %2995 = vmatpush.bf16.msra.mxu3 %v2402_v45  ;;  %v2075_v13 = vadd.f32 %v6657_v57, %v6656_v31  ;;  %v2181_v63 = vmax.f32 %v2080_v35, 0.0  ;;  %v2220_v8 = vld [vmem:[%s5646_s8 + $0x28] sm:$0xff]  ;;  %v2218_v62 = vld [vmem:[%s5646_s8 + $0x18] sm:$0xff] }
 0x3dd   : > { %2734 = vmatpush.bf16.msra.mxu0 %v6651_v26  ;;  %v2349_v5 = vadd.f32 %v2285_v54, %v2189_v11  ;;  %v2397_v47 = vpack.c.bf16 %v2357_v48, %v2353_v52  ;;  %v2124_v41 = vadd.f32 %v6658_v32, %v6656_v31  ;;  %v2182_v29 = vmax.f32 %v2129_v18, 0.0  ;;  %v2224_v54 = vld [vmem:[%s5646_s8 + $0x48] sm:$0xff]  ;;  %v6671_v7 = vld [vmem:[#allocation46_spill] sm:$0xff] }
 0x3de   : > { %2823 = vmatpush.bf16.msra.mxu1 %v6655_v55  ;;  %v2350_v44 = vadd.f32 %v2286_v34, %v2190_v49  ;;  %v2398_v6 = vpack.c.bf16 %v2358_v24, %v2354_v30  ;;  %v2073_v58 = vadd.f32 %v6660_v17, %v6659_v14  ;;  %v2177_v1 = vmax.f32 %v2078_v51, 0.0  ;;  %v6662_v34 = vld [vmem:[#allocation49_spill] sm:$0xff]  ;;  %v6672_v55 = vld [vmem:[#allocation19_spill] sm:$0xff] }
 0x3df   : > { %v2273_v46 = vunpack.c.l.bf16 %v2228_v53  ;;  %v2345_v25 = vadd.f32 %v2281_v9, %v2185_v23  ;;  %2907 = vmatpush.bf16.msra.mxu2 %v2397_v47  ;;  %v2122_v28 = vadd.f32 %v6661_v61, %v6659_v14  ;;  %v2178_v43 = vmax.f32 %v2127_v16, 0.0  ;;  %v6670_v16 = vld [vmem:[#allocation22_spill] sm:$0xff]  ;;  %v4147_v61 = vld [vmem:[%s6647_s17 + $0x8] sm:$0xff] }
 0x3e0   : > { %2735 = vmatmul.bf16.vlgmr.msra.gmra.mxu0 %v5931_v0  ;;  %v2274_v15 = vunpack.c.h.bf16 %v2228_v53  ;;  %v2346_v38 = vadd.f32 %v2282_v19, %v2186_v21  ;;  %2996 = vmatpush.bf16.msra.mxu3 %v2398_v6  ;;  %v2070_v3 = vadd.f32 %v6663_v60, %v6662_v34  ;;  %v2173_v39 = vmax.f32 %v2075_v13, 0.0 }
 0x3e1   : > { %2824 = vmatmul.bf16.vlgmr.msra.gmra.mxu1 %v5931_v0  ;;  %v2341_v37 = vadd.f32 %v2277_v22, %v2181_v63  ;;  %v2393_v2 = vpack.c.bf16 %v2349_v5, %v2345_v25  ;;  %v2119_v40 = vadd.f32 %v6664_v10, %v6662_v34  ;;  %v2174_v35 = vmax.f32 %v2124_v41, 0.0  ;;  %v6667_v22 = vld [vmem:[#allocation24_spill] sm:$0xff] }
 0x3e2   : > { %v2342_v11 = vadd.f32 %v2278_v27, %v2182_v29  ;;  %v2394_v48 = vpack.c.bf16 %v2350_v44, %v2346_v38  ;;  %v2068_v18 = vadd.f32 %v6666_v12, %v6665_v56  ;;  %v2169_v49 = vmax.f32 %v2073_v58, 0.0  ;;  %v6669_v27 = vld [vmem:[#allocation21_spill] sm:$0xff]  ;;  %v2216_v5 = vld [vmem:[%s5646_s8 + $0x8] sm:$0xff]  ;;  %v4151_v12 = vld [vmem:[%s6647_s17 + $0x28] sm:$0xff] }
 0x3e3   : > { %v2265_v24 = vunpack.c.l.bf16 %v2224_v54  ;;  %v2337_v45 = vadd.f32 %v2273_v46, %v2177_v1  ;;  %2908 = vmatpush.bf16.msra.mxu2 %v2393_v2  ;;  %v2117_v51 = vadd.f32 %v6667_v22, %v6665_v56  ;;  %v2170_v23 = vmax.f32 %v2122_v28, 0.0  ;;  %v4149_v56 = vld [vmem:[%s6647_s17 + $0x18] sm:$0xff] }
 0x3e4   : > { %v2266_v9 = vunpack.c.h.bf16 %v2224_v54  ;;  %v2338_v52 = vadd.f32 %v2274_v15, %v2178_v43  ;;  %2997 = vmatpush.bf16.msra.mxu3 %v2394_v48  ;;  %v2065_v33 = vadd.f32 %v6669_v27, %v6668_v36  ;;  %v2165_v59 = vmax.f32 %v2070_v3, 0.0  ;;  %v4148_v48 = vld [vmem:[%s6647_s17 + $0x10] sm:$0xff] }
 0x3e5   : > { %v2333_v26 = vadd.f32 %v2269_v4, %v2173_v39  ;;  %v2389_v53 = vpack.c.bf16 %v2341_v37, %v2337_v45  ;;  %v2114_v21 = vadd.f32 %v6670_v16, %v6668_v36  ;;  %v2166_v19 = vmax.f32 %v2119_v40, 0.0  ;;  %v6673_v4 = vld [vmem:[#allocation20_spill] sm:$0xff]  ;;  %v4154_v45 = vld [vmem:[%s6647_s17 + $0x40] sm:$0xff] }
 0x3e6   : > { %v2334_v30 = vadd.f32 %v2270_v42, %v2174_v35  ;;  %v2390_v50 = vpack.c.bf16 %v2342_v11, %v2338_v52  ;;  %v2063_v31 = vadd.f32 %v6672_v55, %v6671_v7  ;;  %v2161_v57 = vmax.f32 %v2068_v18, 0.0  ;;  %v4152_v18 = vld [vmem:[%s6647_s17 + $0x30] sm:$0xff] }
 0x3e7   : > { %v2257_v13 = vunpack.c.l.bf16 %v2220_v8  ;;  %v2329_v63 = vadd.f32 %v2265_v24, %v2169_v49  ;;  %2909 = vmatpush.bf16.msra.mxu2 %v2389_v53  ;;  %v2112_v47 = vadd.f32 %v6673_v4, %v6671_v7  ;;  %v2162_v32 = vmax.f32 %v2117_v51, 0.0  ;;  %v4153_v49 = vld [vmem:[%s6647_s17 + $0x38] sm:$0xff]  ;;  %v3211_v24 = vld [vmem:[%s6017_s30] sm:$0xff]  ;;  %v3213_v53 = vld [vmem:[%s6017_s30 + $0x10] sm:$0xff] }
 0x3e8   : > { %v2258_v41 = vunpack.c.h.bf16 %v2220_v8  ;;  %v2330_v29 = vadd.f32 %v2266_v9, %v2170_v23  ;;  %2998 = vmatpush.bf16.msra.mxu3 %v2390_v50  ;;  %v2157_v44 = vmax.f32 %v2065_v33, 0.0  ;;  %v2253_v6 = vunpack.c.l.bf16 %v2218_v62  ;;  %v6023_v8 = vpop.permute.xlu1 %2473  ;;  %v6040_v4 = vld [vmem:[%s6647_s17 + $0x48] sm:$0xff] }
 0x3e9   : > { %v6675_v42 = vunpack.c.l.bf16 %v6674_v20  ;;  %v2385_v17 = vpack.c.bf16 %v2333_v26, %v2329_v63  ;;  %v2158_v58 = vmax.f32 %v2114_v21, 0.0  ;;  %v2254_v1 = vunpack.c.h.bf16 %v2218_v62  ;;  %v6029_v62 = vpop.permute.xlu2 %2478 }
 0x3ea   : > { %v6676_v46 = vunpack.c.h.bf16 %v6674_v20  ;;  %v2386_v54 = vpack.c.bf16 %v2334_v30, %v2330_v29  ;;  %v2153_v28 = vmax.f32 %v2063_v31, 0.0  ;;  %v2249_v43 = vunpack.c.l.bf16 %v2216_v5 }
 0x3eb   : > { %v2325_v14 = vadd.f32 %v6675_v42, %v2165_v59  ;;  %v2321_v15 = vadd.f32 %v2257_v13, %v2161_v57  ;;  %2910 = vmatpush.bf16.msra.mxu2 %v2385_v17  ;;  %v2154_v38 = vmax.f32 %v2112_v47, 0.0  ;;  %v2250_v34 = vunpack.c.h.bf16 %v2216_v5  ;;  %v3215_v5 = vld [vmem:[%s6017_s30 + $0x20] sm:$0xff]  ;;  %v6042_v47 = vpop.permute.xlu0 %2483 }
 0x3ec   : > { %v2326_v25 = vadd.f32 %v6676_v46, %v2166_v19  ;;  %v2322_v60 = vadd.f32 %v2258_v41, %v2162_v32  ;;  %2999 = vmatpush.bf16.msra.mxu3 %v2386_v54  ;;  %v2317_v3 = vadd.f32 %v2253_v6, %v2157_v44  ;;  %v2318_v37 = vadd.f32 %v2254_v1, %v2158_v58  ;;  %v3217_v46 = vld [vmem:[%s6017_s30 + $0x30] sm:$0xff] }
 0x3ed   : > { %v2381_v39 = vpack.c.bf16 %v2325_v14, %v2321_v15  ;;  %v2313_v10 = vadd.f32 %v2249_v43, %v2153_v28  ;;  %v2314_v40 = vadd.f32 %v2250_v34, %v2154_v38  ;;  %v3275_v23 = vunpack.c.l.bf16 %v3211_v24 }
 0x3ee   : > { %v2382_v2 = vpack.c.bf16 %v2326_v25, %v2322_v60  ;;  %v3276_v36 = vunpack.c.h.bf16 %v3211_v24  ;;  %v3279_v30 = vunpack.c.l.bf16 %v3213_v53  ;;  %v3280_v55 = vunpack.c.h.bf16 %v3213_v53 }
 0x3ef   : > { %2911 = vmatpush.bf16.msra.mxu2 %v2381_v39  ;;  %v2377_v35 = vpack.c.bf16 %v2317_v3, %v2313_v10  ;;  %v2378_v11 = vpack.c.bf16 %v2318_v37, %v2314_v40  ;;  %v3283_v44 = vunpack.c.l.bf16 %v3215_v5  ;;  %v3284_v42 = vunpack.c.h.bf16 %v3215_v5  ;;  %v3212_v39 = vld [vmem:[%s6017_s30 + $0x8] sm:$0xff]  ;;  %v3219_v40 = vld [vmem:[%s6017_s30 + $0x40] sm:$0xff] }
 0x3f0   : > { %2740 = vmatmul.bf16.gmra.mxu0 %v4147_v61  ;;  %3000 = vmatpush.bf16.msra.mxu3 %v2382_v2  ;;  %v6050_v25 = vpop.permute.xlu1 %2488  ;;  %v3287_v43 = vunpack.c.l.bf16 %v3217_v46  ;;  %v3288_v34 = vunpack.c.h.bf16 %v3217_v46 }
 0x3f1   : > { %2829 = vmatmul.bf16.gmra.mxu1 %v4147_v61 }
 0x3f3   : > { %2912 = vmatpush.bf16.msra.mxu2 %v2377_v35 }
 0x3f4   : > { %3001 = vmatpush.bf16.msra.mxu3 %v2378_v11  ;;  %v3277_v11 = vunpack.c.l.bf16 %v3212_v39 }
 0x3f6   : > { %2913 = vmatmul.bf16.vlgmr.msra.gmra.mxu2 %v5931_v0 }
 0x3f7   : > { %3002 = vmatmul.bf16.vlgmr.msra.gmra.mxu3 %v5931_v0  ;;  %v4150_v0 = vld [vmem:[%s6647_s17 + $0x20] sm:$0xff] }
 0x400   : > { %2745 = vmatmul.bf16.gmra.mxu0 %v4148_v48 }
 0x401   : > { %2834 = vmatmul.bf16.gmra.mxu1 %v4148_v48 }
 0x406   : > { %2918 = vmatmul.bf16.gmra.mxu2 %v4147_v61 }
 0x407   : > { %3007 = vmatmul.bf16.gmra.mxu3 %v4147_v61 }
 0x410   : > { %2750 = vmatmul.bf16.gmra.mxu0 %v4149_v56 }
 0x411   : > { %2839 = vmatmul.bf16.gmra.mxu1 %v4149_v56 }
 0x416   : > { %2923 = vmatmul.bf16.gmra.mxu2 %v4148_v48 }
 0x417   : > { %3012 = vmatmul.bf16.gmra.mxu3 %v4148_v48 }
 0x420   : > { %2755 = vmatmul.bf16.gmra.mxu0 %v4150_v0 }
 0x421   : > { %2844 = vmatmul.bf16.gmra.mxu1 %v4150_v0 }
 0x426   : > { %2928 = vmatmul.bf16.gmra.mxu2 %v4149_v56 }
 0x427   : > { %3017 = vmatmul.bf16.gmra.mxu3 %v4149_v56  ;;  %v6061_v56 = vld [vmem:[%s6647_s17 + $0x50] sm:$0xff] }
 0x430   : > { %2760 = vmatmul.bf16.gmra.mxu0 %v4151_v12 }
 0x431   : > { %2849 = vmatmul.bf16.gmra.mxu1 %v4151_v12 }
 0x436   : > { %2933 = vmatmul.bf16.gmra.mxu2 %v4150_v0 }
 0x437   : > { %3022 = vmatmul.bf16.gmra.mxu3 %v4150_v0  ;;  %v6063_v0 = vpop.permute.xlu2 %2493 }
 0x440   : > { %2765 = vmatmul.bf16.gmra.mxu0 %v4152_v18 }
 0x441   : > { %2854 = vmatmul.bf16.gmra.mxu1 %v4152_v18 }
 0x446   : > { %2938 = vmatmul.bf16.gmra.mxu2 %v4151_v12 }
 0x447   : > { %3027 = vmatmul.bf16.gmra.mxu3 %v4151_v12 }
 0x450   : > { %2770 = vmatmul.bf16.gmra.mxu0 %v4153_v49 }
 0x451   : > { %2859 = vmatmul.bf16.gmra.mxu1 %v4153_v49 }
 0x456   : > { %2943 = vmatmul.bf16.gmra.mxu2 %v4152_v18 }
 0x457   : > { %3032 = vmatmul.bf16.gmra.mxu3 %v4152_v18 }
 0x45d   : > { %v2736_v22 = vpop.f32.mrf.mxu0 }
 0x45e   : > { %v2737_v51 = vadd.f32 %v2736_v22, %v6023_v8  ;;  %v2825_v9 = vpop.f32.mrf.mxu1 }
 0x45f   : > { %v2826_v52 = vadd.f32 %v2825_v9, %v6023_v8 }
 0x460   : > { %v3083_v27 = vmax.f32 %v2737_v51, 0.0  ;;  %2775 = vmatmul.bf16.gmra.mxu0 %v4154_v45  ;;  %v3291_v51 = vunpack.c.l.bf16 %v3219_v40 }
 0x461   : > { %v3084_v33 = vmax.f32 %v2826_v52, 0.0  ;;  %2864 = vmatmul.bf16.gmra.mxu1 %v4154_v45 }
 0x462   : > { %v3403_v59 = vadd.f32 %v3275_v23, %v3083_v27 }
 0x463   : > { %v3404_v26 = vadd.f32 %v3276_v36, %v3084_v33  ;;  %v3292_v36 = vunpack.c.h.bf16 %v3219_v40 }
 0x465   : > { %v3531_v16 = vpack.c.bf16 %v3404_v26, %v3403_v59  ;;  %v2738_v21 = vpop.f32.mrf.mxu0  ;;  %v3214_v26 = vld [vmem:[%s6017_s30 + $0x18] sm:$0xff] }
 0x466   : > { %v2739_v19 = vadd.f32 %v2738_v21, %v6029_v62  ;;  %v2827_v50 = vpop.f32.mrf.mxu1  ;;  %2948 = vmatmul.bf16.gmra.mxu2 %v4153_v49 }
 0x467   : > { %3595 = vst [vmem:[%s6032_s12] sm:$0xff] %v3531_v16  ;;  %v2828_v7 = vadd.f32 %v2827_v50, %v6029_v62  ;;  %3037 = vmatmul.bf16.gmra.mxu3 %v4153_v49  ;;  %v3278_v49 = vunpack.c.h.bf16 %v3212_v39 }
 0x468   : > { %v3087_v31 = vmax.f32 %v2739_v19, 0.0 }
 0x469   : > { %v3088_v57 = vmax.f32 %v2828_v7, 0.0  ;;  %v3281_v7 = vunpack.c.l.bf16 %v3214_v26 }
 0x46a   : > { %v3407_v13 = vadd.f32 %v3279_v30, %v3087_v31  ;;  %v3221_v30 = vld [vmem:[%s6017_s30 + $0x50] sm:$0xff]  ;;  %v6074_v31 = vpop.permute.xlu0 %2498 }
 0x46b   : > { %v3408_v63 = vadd.f32 %v3280_v55, %v3088_v57 }
 0x46d   : > { %v3533_v32 = vpack.c.bf16 %v3408_v63, %v3407_v13  ;;  %v2741_v41 = vpop.f32.mrf.mxu0  ;;  %v3282_v63 = vunpack.c.h.bf16 %v3214_v26 }
 0x46e   : > { %v2742_v29 = vadd.f32 %v2741_v41, %v6042_v47  ;;  %v2830_v6 = vpop.f32.mrf.mxu1 }
 0x46f   : > { %3597 = vst [vmem:[%s6032_s12 + $0x10] sm:$0xff] %v3533_v32  ;;  %v2831_v20 = vadd.f32 %v2830_v6, %v6042_v47 }
 0x470   : > { %v3091_v14 = vmax.f32 %v2742_v29, 0.0  ;;  %2780 = vmatmul.bf16.gmra.mxu0 %v6040_v4  ;;  %v3295_v29 = vunpack.c.l.bf16 %v3221_v30 }
 0x471   : > { %v3092_v17 = vmax.f32 %v2831_v20, 0.0  ;;  %2869 = vmatmul.bf16.gmra.mxu1 %v6040_v4 }
 0x472   : > { %v3411_v58 = vadd.f32 %v3283_v44, %v3091_v14 }
 0x473   : > { %v3412_v1 = vadd.f32 %v3284_v42, %v3092_v17  ;;  %v3296_v42 = vunpack.c.h.bf16 %v3221_v30 }
 0x475   : > { %v3535_v54 = vpack.c.bf16 %v3412_v1, %v3411_v58  ;;  %v2743_v61 = vpop.f32.mrf.mxu0  ;;  %v3216_v1 = vld [vmem:[%s6017_s30 + $0x28] sm:$0xff] }
 0x476   : > { %v2744_v28 = vadd.f32 %v2743_v61, %v6050_v25  ;;  %v2832_v15 = vpop.f32.mrf.mxu1  ;;  %2953 = vmatmul.bf16.gmra.mxu2 %v4154_v45 }
 0x477   : > { %3599 = vst [vmem:[%s6032_s12 + $0x20] sm:$0xff] %v3535_v54  ;;  %v2833_v38 = vadd.f32 %v2832_v15, %v6050_v25  ;;  %3042 = vmatmul.bf16.gmra.mxu3 %v4154_v45 }
 0x478   : > { %v3095_v60 = vmax.f32 %v2744_v28, 0.0 }
 0x479   : > { %v3096_v3 = vmax.f32 %v2833_v38, 0.0  ;;  %v2914_v10 = vpop.f32.mrf.mxu2  ;;  %v3285_v38 = vunpack.c.l.bf16 %v3216_v1 }
 0x47a   : > { %v3415_v37 = vadd.f32 %v3287_v43, %v3095_v60  ;;  %v2915_v35 = vadd.f32 %v2914_v10, %v6023_v8  ;;  %v3003_v48 = vpop.f32.mrf.mxu3  ;;  %v3223_v43 = vld [vmem:[%s6017_s30 + $0x60] sm:$0xff]  ;;  %v6089_v60 = vld [vmem:[%s6647_s17 + $0x58] sm:$0xff] }
 0x47b   : > { %v3416_v2 = vadd.f32 %v3288_v34, %v3096_v3  ;;  %v3004_v18 = vadd.f32 %v3003_v48, %v6023_v8  ;;  %v6091_v3 = vpop.permute.xlu1 %2503 }
 0x47c   : > { %v3085_v45 = vmax.f32 %v2915_v35, 0.0  ;;  %v3299_v35 = vunpack.c.l.bf16 %v3223_v43 }
 0x47d   : > { %v3537_v12 = vpack.c.bf16 %v3416_v2, %v3415_v37  ;;  %v2746_v24 = vpop.f32.mrf.mxu0  ;;  %v3086_v9 = vmax.f32 %v3004_v18, 0.0  ;;  %v3286_v37 = vunpack.c.h.bf16 %v3216_v1  ;;  %v3300_v18 = vunpack.c.h.bf16 %v3223_v43  ;;  %v6120_v1 = vpop.permute.xlu0 %2513 }
 0x47e   : > { %v2747_v22 = vadd.f32 %v2746_v24, %v6063_v0  ;;  %v2835_v23 = vpop.f32.mrf.mxu1  ;;  %v3405_v27 = vadd.f32 %v3277_v11, %v3085_v45 }
 0x47f   : > { %3601 = vst [vmem:[%s6032_s12 + $0x30] sm:$0xff] %v3537_v12  ;;  %v2836_v52 = vadd.f32 %v2835_v23, %v6063_v0  ;;  %v3406_v8 = vadd.f32 %v3278_v49, %v3086_v9 }
 0x480   : > { %v3099_v33 = vmax.f32 %v2747_v22, 0.0  ;;  %2785 = vmatmul.bf16.gmra.mxu0 %v6061_v56  ;;  %v3218_v22 = vld [vmem:[%s6017_s30 + $0x38] sm:$0xff] }
 0x481   : > { %v3100_v59 = vmax.f32 %v2836_v52, 0.0  ;;  %2874 = vmatmul.bf16.gmra.mxu1 %v6061_v56  ;;  %v3532_v16 = vpack.c.bf16 %v3406_v8, %v3405_v27  ;;  %v2916_v19 = vpop.f32.mrf.mxu2 }
 0x482   : > { %v3419_v53 = vadd.f32 %v3291_v51, %v3099_v33  ;;  %v2917_v50 = vadd.f32 %v2916_v19, %v6029_v62  ;;  %v3005_v55 = vpop.f32.mrf.mxu3  ;;  %v3289_v33 = vunpack.c.l.bf16 %v3218_v22 }
 0x483   : > { %v3420_v21 = vadd.f32 %v3292_v36, %v3100_v59  ;;  %3596 = vst [vmem:[%s6032_s12 + $0x8] sm:$0xff] %v3532_v16  ;;  %v3006_v13 = vadd.f32 %v3005_v55, %v6029_v62  ;;  %v3225_v36 = vld [vmem:[%s6017_s30 + $0x70] sm:$0xff]  ;;  %v6103_v59 = vpop.permute.xlu2 %2508  ;;  %v3290_v16 = vunpack.c.h.bf16 %v3218_v22 }
 0x484   : > { %v3089_v32 = vmax.f32 %v2917_v50, 0.0  ;;  %v3303_v50 = vunpack.c.l.bf16 %v3225_v36 }
 0x485   : > { %v3539_v57 = vpack.c.bf16 %v3420_v21, %v3419_v53  ;;  %v2748_v5 = vpop.f32.mrf.mxu0  ;;  %v3090_v6 = vmax.f32 %v3006_v13, 0.0  ;;  %v3304_v13 = vunpack.c.h.bf16 %v3225_v36 }
 0x486   : > { %v2749_v41 = vadd.f32 %v2748_v5, %v6074_v31  ;;  %v2837_v44 = vpop.f32.mrf.mxu1  ;;  %v3409_v14 = vadd.f32 %v3281_v7, %v3089_v32  ;;  %2958 = vmatmul.bf16.gmra.mxu2 %v6040_v4 }
 0x487   : > { %3603 = vst [vmem:[%s6032_s12 + $0x40] sm:$0xff] %v3539_v57  ;;  %v2838_v20 = vadd.f32 %v2837_v44, %v6074_v31  ;;  %v3410_v62 = vadd.f32 %v3282_v63, %v3090_v6  ;;  %3047 = vmatmul.bf16.gmra.mxu3 %v6040_v4 }
 0x488   : > { %v3103_v17 = vmax.f32 %v2749_v41, 0.0  ;;  %v3220_v41 = vld [vmem:[%s6017_s30 + $0x48] sm:$0xff] }
 0x489   : > { %v3104_v58 = vmax.f32 %v2838_v20, 0.0  ;;  %v3534_v54 = vpack.c.bf16 %v3410_v62, %v3409_v14  ;;  %v2919_v28 = vpop.f32.mrf.mxu2 }
 0x48a   : > { %v3423_v46 = vadd.f32 %v3295_v29, %v3103_v17  ;;  %v2920_v15 = vadd.f32 %v2919_v28, %v6042_v47  ;;  %v3008_v34 = vpop.f32.mrf.mxu3  ;;  %v3293_v17 = vunpack.c.l.bf16 %v3220_v41 }
 0x48b   : > { %v3424_v61 = vadd.f32 %v3296_v42, %v3104_v58  ;;  %3598 = vst [vmem:[%s6032_s12 + $0x18] sm:$0xff] %v3534_v54  ;;  %v3009_v39 = vadd.f32 %v3008_v34, %v6042_v47  ;;  %v3227_v42 = vld [vmem:[%s6017_s30 + $0x80] sm:$0xff]  ;;  %v3294_v54 = vunpack.c.h.bf16 %v3220_v41  ;;  %v6149_v41 = vpop.permute.xlu2 %2523 }
 0x48c   : > { %v3093_v10 = vmax.f32 %v2920_v15, 0.0  ;;  %v6118_v58 = vld [vmem:[%s6647_s17 + $0x60] sm:$0xff]  ;;  %v3307_v15 = vunpack.c.l.bf16 %v3227_v42 }
 0x48d   : > { %v3541_v4 = vpack.c.bf16 %v3424_v61, %v3423_v46  ;;  %v2751_v2 = vpop.f32.mrf.mxu0  ;;  %v3094_v48 = vmax.f32 %v3009_v39, 0.0  ;;  %v3308_v39 = vunpack.c.h.bf16 %v3227_v42 }
 0x48e   : > { %v2752_v40 = vadd.f32 %v2751_v2, %v6091_v3  ;;  %v2840_v11 = vpop.f32.mrf.mxu1  ;;  %v3413_v49 = vadd.f32 %v3285_v38, %v3093_v10 }
 0x48f   : > { %3605 = vst [vmem:[%s6032_s12 + $0x50] sm:$0xff] %v3541_v4  ;;  %v2841_v12 = vadd.f32 %v2840_v11, %v6091_v3  ;;  %v3414_v47 = vadd.f32 %v3286_v37, %v3094_v48 }
 0x490   : > { %v3107_v24 = vmax.f32 %v2752_v40, 0.0  ;;  %2790 = vmatmul.bf16.gmra.mxu0 %v6089_v60  ;;  %v3222_v40 = vld [vmem:[%s6017_s30 + $0x58] sm:$0xff] }
 0x491   : > { %v3108_v45 = vmax.f32 %v2841_v12, 0.0  ;;  %2879 = vmatmul.bf16.gmra.mxu1 %v6089_v60  ;;  %v3536_v23 = vpack.c.bf16 %v3414_v47, %v3413_v49  ;;  %v2921_v52 = vpop.f32.mrf.mxu2 }
 0x492   : > { %v3427_v51 = vadd.f32 %v3299_v35, %v3107_v24  ;;  %v2922_v27 = vadd.f32 %v2921_v52, %v6050_v25  ;;  %v3010_v8 = vpop.f32.mrf.mxu3  ;;  %v3297_v24 = vunpack.c.l.bf16 %v3222_v40 }
 0x493   : > { %v3428_v9 = vadd.f32 %v3300_v18, %v3108_v45  ;;  %3600 = vst [vmem:[%s6032_s12 + $0x28] sm:$0xff] %v3536_v23  ;;  %v3011_v53 = vadd.f32 %v3010_v8, %v6050_v25  ;;  %v3229_v18 = vld [vmem:[%s6017_s30 + $0x90] sm:$0xff]  ;;  %v6132_v45 = vpop.permute.xlu1 %2518  ;;  %v3298_v23 = vunpack.c.h.bf16 %v3222_v40 }
 0x494   : > { %v3097_v19 = vmax.f32 %v2922_v27, 0.0  ;;  %v3311_v27 = vunpack.c.l.bf16 %v3229_v18 }
 0x495   : > { %v3543_v26 = vpack.c.bf16 %v3428_v9, %v3427_v51  ;;  %v2753_v21 = vpop.f32.mrf.mxu0  ;;  %v3098_v55 = vmax.f32 %v3011_v53, 0.0  ;;  %v3312_v53 = vunpack.c.h.bf16 %v3229_v18 }
 0x496   : > { %v2754_v30 = vadd.f32 %v2753_v21, %v6103_v59  ;;  %v2842_v7 = vpop.f32.mrf.mxu1  ;;  %v3417_v63 = vadd.f32 %v3289_v33, %v3097_v19  ;;  %2963 = vmatmul.bf16.gmra.mxu2 %v6061_v56 }
 0x497   : > { %3607 = vst [vmem:[%s6032_s12 + $0x60] sm:$0xff] %v3543_v26  ;;  %v2843_v57 = vadd.f32 %v2842_v7, %v6103_v59  ;;  %v3418_v25 = vadd.f32 %v3290_v16, %v3098_v55  ;;  %3052 = vmatmul.bf16.gmra.mxu3 %v6061_v56 }
 0x498   : > { %v3111_v5 = vmax.f32 %v2754_v30, 0.0  ;;  %v3224_v30 = vld [vmem:[%s6017_s30 + $0x68] sm:$0xff] }
 0x499   : > { %v3112_v32 = vmax.f32 %v2843_v57, 0.0  ;;  %v3538_v44 = vpack.c.bf16 %v3418_v25, %v3417_v63  ;;  %v2924_v20 = vpop.f32.mrf.mxu2 }
 0x49a   : > { %v3431_v29 = vadd.f32 %v3303_v50, %v3111_v5  ;;  %v2925_v14 = vadd.f32 %v2924_v20, %v6063_v0  ;;  %v3013_v62 = vpop.f32.mrf.mxu3  ;;  %v3301_v5 = vunpack.c.l.bf16 %v3224_v30 }
 0x49b   : > { %v3432_v6 = vadd.f32 %v3304_v13, %v3112_v32  ;;  %3602 = vst [vmem:[%s6032_s12 + $0x38] sm:$0xff] %v3538_v44  ;;  %v3014_v46 = vadd.f32 %v3013_v62, %v6063_v0  ;;  %v3231_v13 = vld [vmem:[%s6017_s30 + $0xa0] sm:$0xff]  ;;  %v6147_v32 = vld [vmem:[%s6647_s17 + $0x68] sm:$0xff]  ;;  %v3302_v44 = vunpack.c.h.bf16 %v3224_v30  ;;  %v6178_v30 = vpop.permute.xlu1 %2533 }
 0x49c   : > { %v3101_v28 = vmax.f32 %v2925_v14, 0.0  ;;  %v3315_v14 = vunpack.c.l.bf16 %v3231_v13 }
 0x49d   : > { %v3545_v56 = vpack.c.bf16 %v3432_v6, %v3431_v29  ;;  %v2756_v61 = vpop.f32.mrf.mxu0  ;;  %v3102_v34 = vmax.f32 %v3014_v46, 0.0  ;;  %v3316_v46 = vunpack.c.h.bf16 %v3231_v13 }
 0x49e   : > { %v2757_v43 = vadd.f32 %v2756_v61, %v6120_v1  ;;  %v2845_v38 = vpop.f32.mrf.mxu1  ;;  %v3421_v37 = vadd.f32 %v3293_v17, %v3101_v28 }
 0x49f   : > { %3609 = vst [vmem:[%s6032_s12 + $0x70] sm:$0xff] %v3545_v56  ;;  %v2846_v4 = vadd.f32 %v2845_v38, %v6120_v1  ;;  %v3422_v0 = vadd.f32 %v3294_v54, %v3102_v34 }
 0x4a0   : > { %v3115_v2 = vmax.f32 %v2757_v43, 0.0  ;;  %2795 = vmatmul.bf16.gmra.mxu0 %v6118_v58  ;;  %v3226_v43 = vld [vmem:[%s6017_s30 + $0x78] sm:$0xff] }
 0x4a1   : > { %v3116_v10 = vmax.f32 %v2846_v4, 0.0  ;;  %2884 = vmatmul.bf16.gmra.mxu1 %v6118_v58  ;;  %v3540_v11 = vpack.c.bf16 %v3422_v0, %v3421_v37  ;;  %v2926_v12 = vpop.f32.mrf.mxu2 }
 0x4a2   : > { %v3435_v35 = vadd.f32 %v3307_v15, %v3115_v2  ;;  %v2927_v49 = vadd.f32 %v2926_v12, %v6074_v31  ;;  %v3015_v47 = vpop.f32.mrf.mxu3  ;;  %v3305_v2 = vunpack.c.l.bf16 %v3226_v43 }
 0x4a3   : > { %v3436_v48 = vadd.f32 %v3308_v39, %v3116_v10  ;;  %3604 = vst [vmem:[%s6032_s12 + $0x48] sm:$0xff] %v3540_v11  ;;  %v3016_v51 = vadd.f32 %v3015_v47, %v6074_v31  ;;  %v3233_v39 = vld [vmem:[%s6017_s30 + $0xb0] sm:$0xff]  ;;  %v6161_v10 = vpop.permute.xlu0 %2528  ;;  %v3306_v11 = vunpack.c.h.bf16 %v3226_v43 }
 0x4a4   : > { %v3105_v52 = vmax.f32 %v2927_v49, 0.0  ;;  %v3319_v49 = vunpack.c.l.bf16 %v3233_v39 }
 0x4a5   : > { %v3547_v22 = vpack.c.bf16 %v3436_v48, %v3435_v35  ;;  %v2758_v9 = vpop.f32.mrf.mxu0  ;;  %v3106_v8 = vmax.f32 %v3016_v51, 0.0  ;;  %v3320_v51 = vunpack.c.h.bf16 %v3233_v39 }
 0x4a6   : > { %v2759_v36 = vadd.f32 %v2758_v9, %v6132_v45  ;;  %v2847_v33 = vpop.f32.mrf.mxu1  ;;  %v3425_v16 = vadd.f32 %v3297_v24, %v3105_v52  ;;  %2968 = vmatmul.bf16.gmra.mxu2 %v6089_v60 }
 0x4a7   : > { %3611 = vst [vmem:[%s6032_s12 + $0x80] sm:$0xff] %v3547_v22  ;;  %v2848_v26 = vadd.f32 %v2847_v33, %v6132_v45  ;;  %v3426_v31 = vadd.f32 %v3298_v23, %v3106_v8  ;;  %3057 = vmatmul.bf16.gmra.mxu3 %v6089_v60 }
 0x4a8   : > { %v3119_v21 = vmax.f32 %v2759_v36, 0.0  ;;  %v3228_v36 = vld [vmem:[%s6017_s30 + $0x88] sm:$0xff] }
 0x4a9   : > { %v3120_v19 = vmax.f32 %v2848_v26, 0.0  ;;  %v3542_v7 = vpack.c.bf16 %v3426_v31, %v3425_v16  ;;  %v2929_v57 = vpop.f32.mrf.mxu2 }
 0x4aa   : > { %v3439_v50 = vadd.f32 %v3311_v27, %v3119_v21  ;;  %v2930_v63 = vadd.f32 %v2929_v57, %v6091_v3  ;;  %v3018_v25 = vpop.f32.mrf.mxu3  ;;  %v3309_v21 = vunpack.c.l.bf16 %v3228_v36 }
 0x4ab   : > { %v3440_v55 = vadd.f32 %v3312_v53, %v3120_v19  ;;  %3606 = vst [vmem:[%s6032_s12 + $0x58] sm:$0xff] %v3542_v7  ;;  %v3019_v29 = vadd.f32 %v3018_v25, %v6091_v3  ;;  %v3235_v53 = vld [vmem:[%s6017_s30 + $0xc0] sm:$0xff]  ;;  %v6176_v19 = vld [vmem:[%s6647_s17 + $0x70] sm:$0xff]  ;;  %v3310_v7 = vunpack.c.h.bf16 %v3228_v36  ;;  %v6207_v36 = vpop.permute.xlu0 %2543 }
 0x4ac   : > { %v3109_v20 = vmax.f32 %v2930_v63, 0.0  ;;  %v3323_v63 = vunpack.c.l.bf16 %v3235_v53 }
 0x4ad   : > { %v3549_v60 = vpack.c.bf16 %v3440_v55, %v3439_v50  ;;  %v2761_v6 = vpop.f32.mrf.mxu0  ;;  %v3110_v62 = vmax.f32 %v3019_v29, 0.0  ;;  %v3324_v29 = vunpack.c.h.bf16 %v3235_v53 }
 0x4ae   : > { %v2762_v42 = vadd.f32 %v2761_v6, %v6149_v41  ;;  %v2850_v17 = vpop.f32.mrf.mxu1  ;;  %v3429_v54 = vadd.f32 %v3301_v5, %v3109_v20 }
 0x4af   : > { %3613 = vst [vmem:[%s6032_s12 + $0x90] sm:$0xff] %v3549_v60  ;;  %v2851_v56 = vadd.f32 %v2850_v17, %v6149_v41  ;;  %v3430_v3 = vadd.f32 %v3302_v44, %v3110_v62 }
 0x4b0   : > { %v3123_v61 = vmax.f32 %v2762_v42, 0.0  ;;  %2800 = vmatmul.bf16.gmra.mxu0 %v6147_v32  ;;  %v3230_v42 = vld [vmem:[%s6017_s30 + $0x98] sm:$0xff] }
 0x4b1   : > { %v3124_v28 = vmax.f32 %v2851_v56, 0.0  ;;  %2889 = vmatmul.bf16.gmra.mxu1 %v6147_v32  ;;  %v3544_v38 = vpack.c.bf16 %v3430_v3, %v3429_v54  ;;  %v2931_v4 = vpop.f32.mrf.mxu2 }
 0x4b2   : > { %v3443_v15 = vadd.f32 %v3315_v14, %v3123_v61  ;;  %v2932_v37 = vadd.f32 %v2931_v4, %v6103_v59  ;;  %v3020_v0 = vpop.f32.mrf.mxu3  ;;  %v3313_v61 = vunpack.c.l.bf16 %v3230_v42 }
 0x4b3   : > { %v3444_v34 = vadd.f32 %v3316_v46, %v3124_v28  ;;  %3608 = vst [vmem:[%s6032_s12 + $0x68] sm:$0xff] %v3544_v38  ;;  %v3021_v35 = vadd.f32 %v3020_v0, %v6103_v59  ;;  %v3237_v46 = vld [vmem:[%s6017_s30 + $0xd0] sm:$0xff]  ;;  %v6190_v28 = vpop.permute.xlu2 %2538  ;;  %v3314_v38 = vunpack.c.h.bf16 %v3230_v42 }
 0x4b4   : > { %v3113_v12 = vmax.f32 %v2932_v37, 0.0  ;;  %v3327_v37 = vunpack.c.l.bf16 %v3237_v46 }
 0x4b5   : > { %v3551_v40 = vpack.c.bf16 %v3444_v34, %v3443_v15  ;;  %v2763_v48 = vpop.f32.mrf.mxu0  ;;  %v3114_v47 = vmax.f32 %v3021_v35, 0.0  ;;  %v3328_v35 = vunpack.c.h.bf16 %v3237_v46 }
 0x4b6   : > { %v2764_v18 = vadd.f32 %v2763_v48, %v6161_v10  ;;  %v2852_v24 = vpop.f32.mrf.mxu1  ;;  %v3433_v23 = vadd.f32 %v3305_v2, %v3113_v12  ;;  %2973 = vmatmul.bf16.gmra.mxu2 %v6118_v58 }
 0x4b7   : > { %3615 = vst [vmem:[%s6032_s12 + $0xa0] sm:$0xff] %v3551_v40  ;;  %v2853_v22 = vadd.f32 %v2852_v24, %v6161_v10  ;;  %v3434_v59 = vadd.f32 %v3306_v11, %v3114_v47  ;;  %3062 = vmatmul.bf16.gmra.mxu3 %v6118_v58 }
 0x4b8   : > { %v3127_v9 = vmax.f32 %v2764_v18, 0.0  ;;  %v3232_v18 = vld [vmem:[%s6017_s30 + $0xa8] sm:$0xff] }
 0x4b9   : > { %v3128_v52 = vmax.f32 %v2853_v22, 0.0  ;;  %v3546_v33 = vpack.c.bf16 %v3434_v59, %v3433_v23  ;;  %v2934_v26 = vpop.f32.mrf.mxu2 }
 0x4ba   : > { %v3447_v27 = vadd.f32 %v3319_v49, %v3127_v9  ;;  %v2935_v16 = vadd.f32 %v2934_v26, %v6120_v1  ;;  %v3023_v31 = vpop.f32.mrf.mxu3  ;;  %v3317_v9 = vunpack.c.l.bf16 %v3232_v18 }
 0x4bb   : > { %v3448_v8 = vadd.f32 %v3320_v51, %v3128_v52  ;;  %3610 = vst [vmem:[%s6032_s12 + $0x78] sm:$0xff] %v3546_v33  ;;  %v3024_v50 = vadd.f32 %v3023_v31, %v6120_v1  ;;  %v3239_v51 = vld [vmem:[%s6017_s30 + $0xe0] sm:$0xff]  ;;  %v6205_v52 = vld [vmem:[%s6647_s17 + $0x78] sm:$0xff]  ;;  %v3318_v33 = vunpack.c.h.bf16 %v3232_v18 }
 0x4bc   : > { %v3117_v57 = vmax.f32 %v2935_v16, 0.0  ;;  %v3331_v16 = vunpack.c.l.bf16 %v3239_v51 }
 0x4bd   : > { %v3553_v58 = vpack.c.bf16 %v3448_v8, %v3447_v27  ;;  %v2766_v55 = vpop.f32.mrf.mxu0  ;;  %v3118_v25 = vmax.f32 %v3024_v50, 0.0  ;;  %v3332_v50 = vunpack.c.h.bf16 %v3239_v51 }
 0x4be   : > { %v2767_v13 = vadd.f32 %v2766_v55, %v6178_v30  ;;  %v2855_v5 = vpop.f32.mrf.mxu1  ;;  %v3437_v44 = vadd.f32 %v3309_v21, %v3117_v57 }
 0x4bf   : > { %3617 = vst [vmem:[%s6032_s12 + $0xb0] sm:$0xff] %v3553_v58  ;;  %v2856_v60 = vadd.f32 %v2855_v5, %v6178_v30  ;;  %v3438_v1 = vadd.f32 %v3310_v7, %v3118_v25 }
 0x4c0   : > { %v3131_v6 = vmax.f32 %v2767_v13, 0.0  ;;  %2805 = vmatmul.bf16.gmra.mxu0 %v6176_v19  ;;  %v3234_v13 = vld [vmem:[%s6017_s30 + $0xb8] sm:$0xff] }
 0x4c1   : > { %v3132_v20 = vmax.f32 %v2856_v60, 0.0  ;;  %2894 = vmatmul.bf16.gmra.mxu1 %v6176_v19  ;;  %v3548_v17 = vpack.c.bf16 %v3438_v1, %v3437_v44  ;;  %v2936_v56 = vpop.f32.mrf.mxu2 }
 0x4c2   : > { %v3451_v14 = vadd.f32 %v3323_v63, %v3131_v6  ;;  %v2937_v54 = vadd.f32 %v2936_v56, %v6132_v45  ;;  %v3025_v3 = vpop.f32.mrf.mxu3  ;;  %v3321_v6 = vunpack.c.l.bf16 %v3234_v13 }
 0x4c3   : > { %v3452_v62 = vadd.f32 %v3324_v29, %v3132_v20  ;;  %3612 = vst [vmem:[%s6032_s12 + $0x88] sm:$0xff] %v3548_v17  ;;  %v3026_v15 = vadd.f32 %v3025_v3, %v6132_v45  ;;  %v3241_v29 = vld [vmem:[%s6017_s30 + $0xf0] sm:$0xff]  ;;  %v6219_v20 = vpop.permute.xlu1 %2548  ;;  %v3322_v17 = vunpack.c.h.bf16 %v3234_v13 }
 0x4c4   : > { %v3121_v4 = vmax.f32 %v2937_v54, 0.0  ;;  %v3335_v54 = vunpack.c.l.bf16 %v3241_v29 }
 0x4c5   : > { %v3555_v43 = vpack.c.bf16 %v3452_v62, %v3451_v14  ;;  %v2768_v34 = vpop.f32.mrf.mxu0  ;;  %v3122_v0 = vmax.f32 %v3026_v15, 0.0  ;;  %v3336_v15 = vunpack.c.h.bf16 %v3241_v29 }
 0x4c6   : > { %v2769_v39 = vadd.f32 %v2768_v34, %v6190_v28  ;;  %v2857_v2 = vpop.f32.mrf.mxu1  ;;  %v3441_v11 = vadd.f32 %v3313_v61, %v3121_v4  ;;  %2978 = vmatmul.bf16.gmra.mxu2 %v6147_v32 }
 0x4c7   : > { %3619 = vst [vmem:[%s6032_s12 + $0xc0] sm:$0xff] %v3555_v43  ;;  %v2858_v40 = vadd.f32 %v2857_v2, %v6190_v28  ;;  %v3442_v45 = vadd.f32 %v3314_v38, %v3122_v0  ;;  %3067 = vmatmul.bf16.gmra.mxu3 %v6147_v32 }
 0x4c8   : > { %v3135_v48 = vmax.f32 %v2769_v39, 0.0  ;;  %v3236_v39 = vld [vmem:[%s6017_s30 + $0xc8] sm:$0xff] }
 0x4c9   : > { %v3136_v12 = vmax.f32 %v2858_v40, 0.0  ;;  %v3550_v24 = vpack.c.bf16 %v3442_v45, %v3441_v11  ;;  %v2939_v22 = vpop.f32.mrf.mxu2 }
 0x4ca   : > { %v3455_v49 = vadd.f32 %v3327_v37, %v3135_v48  ;;  %v2940_v23 = vadd.f32 %v2939_v22, %v6149_v41  ;;  %v3028_v59 = vpop.f32.mrf.mxu3  ;;  %v3325_v48 = vunpack.c.l.bf16 %v3236_v39 }
 0x4cb   : > { %v3456_v47 = vadd.f32 %v3328_v35, %v3136_v12  ;;  %3614 = vst [vmem:[%s6032_s12 + $0x98] sm:$0xff] %v3550_v24  ;;  %v3029_v27 = vadd.f32 %v3028_v59, %v6149_v41  ;;  %v3243_v35 = vld [vmem:[%s6017_s30 + $0x100] sm:$0xff]  ;;  %v6231_v12 = vpop.permute.xlu2 %2553  ;;  %v3326_v24 = vunpack.c.h.bf16 %v3236_v39 }
 0x4cc   : > { %v3125_v26 = vmax.f32 %v2940_v23, 0.0  ;;  %v3339_v51 = vunpack.c.l.bf16 %v3243_v35 }
 0x4cd   : > { %v3557_v32 = vpack.c.bf16 %v3456_v47, %v3455_v49  ;;  %v2771_v8 = vpop.f32.mrf.mxu0  ;;  %v3126_v31 = vmax.f32 %v3029_v27, 0.0 }
 0x4ce   : > { %v2772_v53 = vadd.f32 %v2771_v8, %v6207_v36  ;;  %v2860_v21 = vpop.f32.mrf.mxu1  ;;  %v3445_v7 = vadd.f32 %v3317_v9, %v3125_v26 }
 0x4cf   : > { %3621 = vst [vmem:[%s6032_s12 + $0xd0] sm:$0xff] %v3557_v32  ;;  %v2861_v58 = vadd.f32 %v2860_v21, %v6207_v36  ;;  %v3446_v41 = vadd.f32 %v3318_v33, %v3126_v31  ;;  %v3340_v32 = vunpack.c.h.bf16 %v3243_v35 }
 0x4d0   : > { %v3139_v55 = vmax.f32 %v2772_v53, 0.0  ;;  %2810 = vmatmul.bf16.gmra.mxu0 %v6205_v52  ;;  %v3238_v53 = vld [vmem:[%s6017_s30 + $0xd8] sm:$0xff] }
 0x4d1   : > { %v3140_v57 = vmax.f32 %v2861_v58, 0.0  ;;  %2899 = vmatmul.bf16.gmra.mxu1 %v6205_v52  ;;  %v3552_v5 = vpack.c.bf16 %v3446_v41, %v3445_v7  ;;  %v2941_v60 = vpop.f32.mrf.mxu2  ;;  %v3245_v58 = vld [vmem:[%s6017_s30 + $0x110] sm:$0xff]  ;;  %v3329_v7 = vunpack.c.l.bf16 %v3238_v53  ;;  %v6241_v41 = vpop.permute.xlu0 %2558 }
 0x4d2   : > { %v3459_v63 = vadd.f32 %v3331_v16, %v3139_v55  ;;  %v2942_v44 = vadd.f32 %v2941_v60, %v6161_v10  ;;  %v3030_v1 = vpop.f32.mrf.mxu3  ;;  %v3343_v29 = vunpack.c.l.bf16 %v3245_v58 }
 0x4d3   : > { %v3460_v25 = vadd.f32 %v3332_v50, %v3140_v57  ;;  %3616 = vst [vmem:[%s6032_s12 + $0xa8] sm:$0xff] %v3552_v5  ;;  %v3031_v14 = vadd.f32 %v3030_v1, %v6161_v10 }
 0x4d4   : > { %v3129_v56 = vmax.f32 %v2942_v44, 0.0 }
 0x4d5   : > { %v3559_v42 = vpack.c.bf16 %v3460_v25, %v3459_v63  ;;  %v2773_v62 = vpop.f32.mrf.mxu0  ;;  %v3130_v3 = vmax.f32 %v3031_v14, 0.0  ;;  %v3330_v63 = vunpack.c.h.bf16 %v3238_v53 }
 0x4d6   : > { %v2774_v46 = vadd.f32 %v2773_v62, %v6219_v20  ;;  %v2862_v61 = vpop.f32.mrf.mxu1  ;;  %v3449_v38 = vadd.f32 %v3321_v6, %v3129_v56  ;;  %2983 = vmatmul.bf16.gmra.mxu2 %v6176_v19  ;;  %v3240_v56 = vld [vmem:[%s6017_s30 + $0xe8] sm:$0xff] }
 0x4d7   : > { %3623 = vst [vmem:[%s6032_s12 + $0xe0] sm:$0xff] %v3559_v42  ;;  %v2863_v43 = vadd.f32 %v2862_v61, %v6219_v20  ;;  %v3450_v10 = vadd.f32 %v3322_v17, %v3130_v3  ;;  %3072 = vmatmul.bf16.gmra.mxu3 %v6176_v19  ;;  %v3344_v42 = vunpack.c.h.bf16 %v3245_v58 }
 0x4d8   : > { %v3143_v34 = vmax.f32 %v2774_v46, 0.0 }
 0x4d9   : > { %v3144_v4 = vmax.f32 %v2863_v43, 0.0  ;;  %v3554_v2 = vpack.c.bf16 %v3450_v10, %v3449_v38  ;;  %v2944_v40 = vpop.f32.mrf.mxu2  ;;  %v3247_v43 = vld [vmem:[%s6017_s30 + $0x120] sm:$0xff]  ;;  %v3333_v38 = vunpack.c.l.bf16 %v3240_v56  ;;  %v6253_v10 = vpop.permute.xlu1 %2563 }
 0x4da   : > { %v3463_v37 = vadd.f32 %v3335_v54, %v3143_v34  ;;  %v2945_v11 = vadd.f32 %v2944_v40, %v6178_v30  ;;  %v3033_v45 = vpop.f32.mrf.mxu3  ;;  %v3347_v40 = vunpack.c.l.bf16 %v3247_v43 }
 0x4db   : > { %v3464_v0 = vadd.f32 %v3336_v15, %v3144_v4  ;;  %3618 = vst [vmem:[%s6032_s12 + $0xb8] sm:$0xff] %v3554_v2  ;;  %v3034_v49 = vadd.f32 %v3033_v45, %v6178_v30  ;;  %v3348_v45 = vunpack.c.h.bf16 %v3247_v43 }
 0x4dc   : > { %v3133_v47 = vmax.f32 %v2945_v11, 0.0 }
 0x4dd   : > { %v3561_v18 = vpack.c.bf16 %v3464_v0, %v3463_v37  ;;  %v2776_v19 = vpop.f32.mrf.mxu0  ;;  %v3134_v9 = vmax.f32 %v3034_v49, 0.0  ;;  %v3334_v37 = vunpack.c.h.bf16 %v3240_v56 }
 0x4de   : > { %v2777_v22 = vadd.f32 %v2776_v19, %v6231_v12  ;;  %v2865_v23 = vpop.f32.mrf.mxu1  ;;  %v3453_v27 = vadd.f32 %v3325_v48, %v3133_v47  ;;  %v3242_v47 = vld [vmem:[%s6017_s30 + $0xf8] sm:$0xff] }
 0x4df   : > { %3625 = vst [vmem:[%s6032_s12 + $0xf0] sm:$0xff] %v3561_v18  ;;  %v2866_v59 = vadd.f32 %v2865_v23, %v6231_v12  ;;  %v3454_v8 = vadd.f32 %v3326_v24, %v3134_v9  ;;  %v3249_v9 = vld [vmem:[%s6017_s30 + $0x130] sm:$0xff]  ;;  %v3338_v53 = vunpack.c.h.bf16 %v3242_v47 }
 0x4e0   : > { %v3147_v33 = vmax.f32 %v2777_v22, 0.0 }
 0x4e1   : > { %v3148_v26 = vmax.f32 %v2866_v59, 0.0  ;;  %v3556_v16 = vpack.c.bf16 %v3454_v8, %v3453_v27  ;;  %v2946_v31 = vpop.f32.mrf.mxu2 }
 0x4e2   : > { %v3467_v30 = vadd.f32 %v3339_v51, %v3147_v33  ;;  %v2947_v50 = vadd.f32 %v2946_v31, %v6190_v28  ;;  %v3035_v55 = vpop.f32.mrf.mxu3  ;;  %v6263_v33 = vpop.permute.xlu2 %2568  ;;  %v3351_v31 = vunpack.c.l.bf16 %v3249_v9 }
 0x4e3   : > { %v3468_v21 = vadd.f32 %v3340_v32, %v3148_v26  ;;  %3620 = vst [vmem:[%s6032_s12 + $0xc8] sm:$0xff] %v3556_v16  ;;  %v3036_v13 = vadd.f32 %v3035_v55, %v6190_v28  ;;  %v3337_v32 = vunpack.c.l.bf16 %v3242_v47  ;;  %v3352_v55 = vunpack.c.h.bf16 %v3249_v9 }
 0x4e4   : > { %v3137_v25 = vmax.f32 %v2947_v50, 0.0 }
 0x4e5   : > { %v3563_v57 = vpack.c.bf16 %v3468_v21, %v3467_v30  ;;  %v2778_v5 = vpop.f32.mrf.mxu0  ;;  %v3138_v6 = vmax.f32 %v3036_v13, 0.0 }
 0x4e6   : > { %v2779_v60 = vadd.f32 %v2778_v5, %v6241_v41  ;;  %v2867_v44 = vpop.f32.mrf.mxu1  ;;  %v3457_v14 = vadd.f32 %v3329_v7, %v3137_v25  ;;  %2988 = vmatmul.bf16.gmra.mxu2 %v6205_v52  ;;  %v3244_v25 = vld [vmem:[%s6017_s30 + $0x108] sm:$0xff] }
 0x4e7   : > { %3627 = vst [vmem:[%s6032_s12 + $0x100] sm:$0xff] %v3563_v57  ;;  %v2868_v1 = vadd.f32 %v2867_v44, %v6241_v41  ;;  %v3458_v28 = vadd.f32 %v3330_v63, %v3138_v6  ;;  %3077 = vmatmul.bf16.gmra.mxu3 %v6205_v52  ;;  %v3251_v6 = vld [vmem:[%s6017_s30 + $0x140] sm:$0xff]  ;;  %v3342_v56 = vunpack.c.h.bf16 %v3244_v25 }
 0x4e8   : > { %v3151_v17 = vmax.f32 %v2779_v60, 0.0 }
 0x4e9   : > { %v3152_v62 = vmax.f32 %v2868_v1, 0.0  ;;  %v3558_v54 = vpack.c.bf16 %v3458_v28, %v3457_v14  ;;  %v2949_v3 = vpop.f32.mrf.mxu2 }
 0x4ea   : > { %v3471_v46 = vadd.f32 %v3343_v29, %v3151_v17  ;;  %v2950_v15 = vadd.f32 %v2949_v3, %v6207_v36  ;;  %v3038_v34 = vpop.f32.mrf.mxu3  ;;  %v6273_v17 = vpop.permute.xlu0 %2573  ;;  %v3355_v3 = vunpack.c.l.bf16 %v3251_v6 }
 0x4eb   : > { %v3472_v61 = vadd.f32 %v3344_v42, %v3152_v62  ;;  %3622 = vst [vmem:[%s6032_s12 + $0xd8] sm:$0xff] %v3558_v54  ;;  %v3039_v39 = vadd.f32 %v3038_v34, %v6207_v36  ;;  %v3341_v42 = vunpack.c.l.bf16 %v3244_v25  ;;  %v3356_v34 = vunpack.c.h.bf16 %v3251_v6 }
 0x4ec   : > { %v3141_v2 = vmax.f32 %v2950_v15, 0.0 }
 0x4ed   : > { %v3565_v4 = vpack.c.bf16 %v3472_v61, %v3471_v46  ;;  %v2781_v52 = vpop.f32.mrf.mxu0  ;;  %v3142_v11 = vmax.f32 %v3039_v39, 0.0 }
 0x4ee   : > { %v2782_v0 = vadd.f32 %v2781_v52, %v6253_v10  ;;  %v2870_v35 = vpop.f32.mrf.mxu1  ;;  %v3461_v18 = vadd.f32 %v3333_v38, %v3141_v2  ;;  %v3246_v2 = vld [vmem:[%s6017_s30 + $0x118] sm:$0xff] }
 0x4ef   : > { %3629 = vst [vmem:[%s6032_s12 + $0x110] sm:$0xff] %v3565_v4  ;;  %v2871_v48 = vadd.f32 %v2870_v35, %v6253_v10  ;;  %v3462_v24 = vadd.f32 %v3334_v37, %v3142_v11  ;;  %v3253_v11 = vld [vmem:[%s6017_s30 + $0x150] sm:$0xff]  ;;  %v3346_v47 = vunpack.c.h.bf16 %v3246_v2 }
 0x4f0   : > { %v3155_v49 = vmax.f32 %v2782_v0, 0.0 }
 0x4f1   : > { %v3156_v19 = vmax.f32 %v2871_v48, 0.0  ;;  %v3560_v22 = vpack.c.bf16 %v3462_v24, %v3461_v18  ;;  %v2951_v23 = vpop.f32.mrf.mxu2 }
 0x4f2   : > { %v3475_v36 = vadd.f32 %v3347_v40, %v3155_v49  ;;  %v2952_v59 = vadd.f32 %v2951_v23, %v6219_v20  ;;  %v3040_v27 = vpop.f32.mrf.mxu3  ;;  %v6283_v49 = vpop.permute.xlu1 %2578  ;;  %v3359_v23 = vunpack.c.l.bf16 %v3253_v11 }
 0x4f3   : > { %v3476_v51 = vadd.f32 %v3348_v45, %v3156_v19  ;;  %3624 = vst [vmem:[%s6032_s12 + $0xe8] sm:$0xff] %v3560_v22  ;;  %v3041_v26 = vadd.f32 %v3040_v27, %v6219_v20  ;;  %v3345_v45 = vunpack.c.l.bf16 %v3246_v2  ;;  %v3360_v27 = vunpack.c.h.bf16 %v3253_v11 }
 0x4f4   : > { %v3145_v16 = vmax.f32 %v2952_v59, 0.0 }
 0x4f5   : > { %v3567_v8 = vpack.c.bf16 %v3476_v51, %v3475_v36  ;;  %v2783_v30 = vpop.f32.mrf.mxu0  ;;  %v3146_v50 = vmax.f32 %v3041_v26, 0.0 }
 0x4f6   : > { %v2784_v21 = vadd.f32 %v2783_v30, %v6263_v33  ;;  %v2872_v58 = vpop.f32.mrf.mxu1  ;;  %v3465_v57 = vadd.f32 %v3337_v32, %v3145_v16  ;;  %v3248_v16 = vld [vmem:[%s6017_s30 + $0x128] sm:$0xff] }
 0x4f7   : > { %3631 = vst [vmem:[%s6032_s12 + $0x120] sm:$0xff] %v3567_v8  ;;  %v2873_v7 = vadd.f32 %v2872_v58, %v6263_v33  ;;  %v3466_v63 = vadd.f32 %v3338_v53, %v3146_v50  ;;  %v3255_v50 = vld [vmem:[%s6017_s30 + $0x160] sm:$0xff]  ;;  %v3350_v25 = vunpack.c.h.bf16 %v3248_v16 }
 0x4f8   : > { %v3159_v13 = vmax.f32 %v2784_v21, 0.0 }
 0x4f9   : > { %v3160_v5 = vmax.f32 %v2873_v7, 0.0  ;;  %v3562_v60 = vpack.c.bf16 %v3466_v63, %v3465_v57  ;;  %v2954_v44 = vpop.f32.mrf.mxu2 }
 0x4fa   : > { %v3479_v20 = vadd.f32 %v3351_v31, %v3159_v13  ;;  %v2955_v1 = vadd.f32 %v2954_v44, %v6231_v12  ;;  %v3043_v14 = vpop.f32.mrf.mxu3  ;;  %v6293_v13 = vpop.permute.xlu2 %2583  ;;  %v3363_v44 = vunpack.c.l.bf16 %v3255_v50 }
 0x4fb   : > { %v3480_v29 = vadd.f32 %v3352_v55, %v3160_v5  ;;  %3626 = vst [vmem:[%s6032_s12 + $0xf8] sm:$0xff] %v3562_v60  ;;  %v3044_v62 = vadd.f32 %v3043_v14, %v6231_v12  ;;  %v3349_v55 = vunpack.c.l.bf16 %v3248_v16  ;;  %v3364_v14 = vunpack.c.h.bf16 %v3255_v50 }
 0x4fc   : > { %v3149_v54 = vmax.f32 %v2955_v1, 0.0 }
 0x4fd   : > { %v3569_v28 = vpack.c.bf16 %v3480_v29, %v3479_v20  ;;  %v2786_v46 = vpop.f32.mrf.mxu0  ;;  %v3150_v15 = vmax.f32 %v3044_v62, 0.0 }
 0x4fe   : > { %v2787_v61 = vadd.f32 %v2786_v46, %v6273_v17  ;;  %v2875_v43 = vpop.f32.mrf.mxu1  ;;  %v3469_v4 = vadd.f32 %v3341_v42, %v3149_v54  ;;  %v3250_v54 = vld [vmem:[%s6017_s30 + $0x138] sm:$0xff] }
 0x4ff   : > { %3633 = vst [vmem:[%s6032_s12 + $0x130] sm:$0xff] %v3569_v28  ;;  %v2876_v38 = vadd.f32 %v2875_v43, %v6273_v17  ;;  %v3470_v37 = vadd.f32 %v3342_v56, %v3150_v15  ;;  %v3257_v15 = vld [vmem:[%s6017_s30 + $0x170] sm:$0xff]  ;;  %v3354_v2 = vunpack.c.h.bf16 %v3250_v54 }
 0x500   : > { %v3163_v39 = vmax.f32 %v2787_v61, 0.0 }
 0x501   : > { %v3164_v52 = vmax.f32 %v2876_v38, 0.0  ;;  %v3564_v0 = vpack.c.bf16 %v3470_v37, %v3469_v4  ;;  %v2956_v35 = vpop.f32.mrf.mxu2 }
 0x502   : > { %v3483_v12 = vadd.f32 %v3355_v3, %v3163_v39  ;;  %v2957_v48 = vadd.f32 %v2956_v35, %v6241_v41  ;;  %v3045_v18 = vpop.f32.mrf.mxu3  ;;  %v6303_v39 = vpop.permute.xlu0 %2588  ;;  %v3367_v35 = vunpack.c.l.bf16 %v3257_v15 }
 0x503   : > { %v3484_v40 = vadd.f32 %v3356_v34, %v3164_v52  ;;  %3628 = vst [vmem:[%s6032_s12 + $0x108] sm:$0xff] %v3564_v0  ;;  %v3046_v19 = vadd.f32 %v3045_v18, %v6241_v41  ;;  %v3353_v34 = vunpack.c.l.bf16 %v3250_v54  ;;  %v3368_v18 = vunpack.c.h.bf16 %v3257_v15 }
 0x504   : > { %v3153_v22 = vmax.f32 %v2957_v48, 0.0 }
 0x505   : > { %v3571_v24 = vpack.c.bf16 %v3484_v40, %v3483_v12  ;;  %v2788_v36 = vpop.f32.mrf.mxu0  ;;  %v3154_v59 = vmax.f32 %v3046_v19, 0.0 }
 0x506   : > { %v2789_v51 = vadd.f32 %v2788_v36, %v6283_v49  ;;  %v2877_v9 = vpop.f32.mrf.mxu1  ;;  %v3473_v8 = vadd.f32 %v3345_v45, %v3153_v22  ;;  %v3252_v22 = vld [vmem:[%s6017_s30 + $0x148] sm:$0xff] }
 0x507   : > { %3635 = vst [vmem:[%s6032_s12 + $0x140] sm:$0xff] %v3571_v24  ;;  %v2878_v32 = vadd.f32 %v2877_v9, %v6283_v49  ;;  %v3474_v53 = vadd.f32 %v3346_v47, %v3154_v59  ;;  %v3259_v59 = vld [vmem:[%s6017_s30 + $0x180] sm:$0xff]  ;;  %v3358_v16 = vunpack.c.h.bf16 %v3252_v22 }
 0x508   : > { %v3167_v26 = vmax.f32 %v2789_v51, 0.0 }
 0x509   : > { %v3168_v30 = vmax.f32 %v2878_v32, 0.0  ;;  %v3566_v21 = vpack.c.bf16 %v3474_v53, %v3473_v8  ;;  %v2959_v58 = vpop.f32.mrf.mxu2 }
 0x50a   : > { %v3487_v41 = vadd.f32 %v3359_v23, %v3167_v26  ;;  %v2960_v7 = vadd.f32 %v2959_v58, %v6253_v10  ;;  %v3048_v57 = vpop.f32.mrf.mxu3  ;;  %v6313_v26 = vpop.permute.xlu1 %2593  ;;  %v3371_v58 = vunpack.c.l.bf16 %v3259_v59 }
 0x50b   : > { %v3488_v31 = vadd.f32 %v3360_v27, %v3168_v30  ;;  %3630 = vst [vmem:[%s6032_s12 + $0x118] sm:$0xff] %v3566_v21  ;;  %v3049_v5 = vadd.f32 %v3048_v57, %v6253_v10  ;;  %v3357_v27 = vunpack.c.l.bf16 %v3252_v22  ;;  %v3372_v57 = vunpack.c.h.bf16 %v3259_v59 }
 0x50c   : > { %v3157_v60 = vmax.f32 %v2960_v7, 0.0 }
 0x50d   : > { %v3573_v63 = vpack.c.bf16 %v3488_v31, %v3487_v41  ;;  %v2791_v20 = vpop.f32.mrf.mxu0  ;;  %v3158_v1 = vmax.f32 %v3049_v5, 0.0 }
 0x50e   : > { %v2792_v29 = vadd.f32 %v2791_v20, %v6293_v13  ;;  %v2880_v6 = vpop.f32.mrf.mxu1  ;;  %v3477_v28 = vadd.f32 %v3349_v55, %v3157_v60  ;;  %v3254_v60 = vld [vmem:[%s6017_s30 + $0x158] sm:$0xff] }
 0x50f   : > { %3637 = vst [vmem:[%s6032_s12 + $0x150] sm:$0xff] %v3573_v63  ;;  %v2881_v42 = vadd.f32 %v2880_v6, %v6293_v13  ;;  %v3478_v56 = vadd.f32 %v3350_v25, %v3158_v1  ;;  %v3261_v1 = vld [vmem:[%s6017_s30 + $0x190] sm:$0xff]  ;;  %v3362_v54 = vunpack.c.h.bf16 %v3254_v60 }
 0x510   : > { %v3171_v62 = vmax.f32 %v2792_v29, 0.0 }
 0x511   : > { %v3172_v46 = vmax.f32 %v2881_v42, 0.0  ;;  %v3568_v61 = vpack.c.bf16 %v3478_v56, %v3477_v28  ;;  %v2961_v43 = vpop.f32.mrf.mxu2 }
 0x512   : > { %v3491_v10 = vadd.f32 %v3363_v44, %v3171_v62  ;;  %v2962_v38 = vadd.f32 %v2961_v43, %v6263_v33  ;;  %v3050_v4 = vpop.f32.mrf.mxu3  ;;  %v6323_v62 = vpop.permute.xlu2 %2598  ;;  %v3375_v43 = vunpack.c.l.bf16 %v3261_v1 }
 0x513   : > { %v3492_v3 = vadd.f32 %v3364_v14, %v3172_v46  ;;  %3632 = vst [vmem:[%s6032_s12 + $0x128] sm:$0xff] %v3568_v61  ;;  %v3051_v52 = vadd.f32 %v3050_v4, %v6263_v33  ;;  %v3361_v14 = vunpack.c.l.bf16 %v3254_v60  ;;  %v3376_v4 = vunpack.c.h.bf16 %v3261_v1 }
 0x514   : > { %v3161_v0 = vmax.f32 %v2962_v38, 0.0 }
 0x515   : > { %v3575_v37 = vpack.c.bf16 %v3492_v3, %v3491_v10  ;;  %v2793_v12 = vpop.f32.mrf.mxu0  ;;  %v3162_v48 = vmax.f32 %v3051_v52, 0.0 }
 0x516   : > { %v2794_v40 = vadd.f32 %v2793_v12, %v6303_v39  ;;  %v2882_v11 = vpop.f32.mrf.mxu1  ;;  %v3481_v24 = vadd.f32 %v3353_v34, %v3161_v0  ;;  %v3256_v0 = vld [vmem:[%s6017_s30 + $0x168] sm:$0xff] }
 0x517   : > { %3639 = vst [vmem:[%s6032_s12 + $0x160] sm:$0xff] %v3575_v37  ;;  %v2883_v45 = vadd.f32 %v2882_v11, %v6303_v39  ;;  %v3482_v47 = vadd.f32 %v3354_v2, %v3162_v48  ;;  %v3263_v48 = vld [vmem:[%s6017_s30 + $0x1a0] sm:$0xff]  ;;  %v3366_v22 = vunpack.c.h.bf16 %v3256_v0 }
 0x518   : > { %v3175_v19 = vmax.f32 %v2794_v40, 0.0 }
 0x519   : > { %v3176_v36 = vmax.f32 %v2883_v45, 0.0  ;;  %v3570_v51 = vpack.c.bf16 %v3482_v47, %v3481_v24  ;;  %v2964_v9 = vpop.f32.mrf.mxu2 }
 0x51a   : > { %v3495_v33 = vadd.f32 %v3367_v35, %v3175_v19  ;;  %v2965_v32 = vadd.f32 %v2964_v9, %v6273_v17  ;;  %v3053_v8 = vpop.f32.mrf.mxu3  ;;  %v6333_v19 = vpop.permute.xlu0 %2603  ;;  %v3379_v9 = vunpack.c.l.bf16 %v3263_v48 }
 0x51b   : > { %v3496_v23 = vadd.f32 %v3368_v18, %v3176_v36  ;;  %3634 = vst [vmem:[%s6032_s12 + $0x138] sm:$0xff] %v3570_v51  ;;  %v3054_v30 = vadd.f32 %v3053_v8, %v6273_v17  ;;  %v3365_v18 = vunpack.c.l.bf16 %v3256_v0  ;;  %v3380_v8 = vunpack.c.h.bf16 %v3263_v48 }
 0x51c   : > { %v3165_v21 = vmax.f32 %v2965_v32, 0.0 }
 0x51d   : > { %v3577_v53 = vpack.c.bf16 %v3496_v23, %v3495_v33  ;;  %v2796_v41 = vpop.f32.mrf.mxu0  ;;  %v3166_v7 = vmax.f32 %v3054_v30, 0.0 }
 0x51e   : > { %v2797_v31 = vadd.f32 %v2796_v41, %v6313_v26  ;;  %v2885_v50 = vpop.f32.mrf.mxu1  ;;  %v3485_v63 = vadd.f32 %v3357_v27, %v3165_v21  ;;  %v3258_v21 = vld [vmem:[%s6017_s30 + $0x178] sm:$0xff] }
 0x51f   : > { %3641 = vst [vmem:[%s6032_s12 + $0x170] sm:$0xff] %v3577_v53  ;;  %v2886_v55 = vadd.f32 %v2885_v50, %v6313_v26  ;;  %v3486_v25 = vadd.f32 %v3358_v16, %v3166_v7  ;;  %v3265_v7 = vld [vmem:[%s6017_s30 + $0x1b0] sm:$0xff]  ;;  %v3370_v60 = vunpack.c.h.bf16 %v3258_v21 }
 0x520   : > { %v3179_v5 = vmax.f32 %v2797_v31, 0.0 }
 0x521   : > { %v3180_v20 = vmax.f32 %v2886_v55, 0.0  ;;  %v3572_v29 = vpack.c.bf16 %v3486_v25, %v3485_v63  ;;  %v2966_v6 = vpop.f32.mrf.mxu2 }
 0x522   : > { %v3499_v17 = vadd.f32 %v3371_v58, %v3179_v5  ;;  %v2967_v42 = vadd.f32 %v2966_v6, %v6283_v49  ;;  %v3055_v28 = vpop.f32.mrf.mxu3  ;;  %v6343_v5 = vpop.permute.xlu1 %2608  ;;  %v3383_v6 = vunpack.c.l.bf16 %v3265_v7 }
 0x523   : > { %v3500_v44 = vadd.f32 %v3372_v57, %v3180_v20  ;;  %3636 = vst [vmem:[%s6032_s12 + $0x148] sm:$0xff] %v3572_v29  ;;  %v3056_v46 = vadd.f32 %v3055_v28, %v6283_v49  ;;  %v3369_v57 = vunpack.c.l.bf16 %v3258_v21  ;;  %v3384_v28 = vunpack.c.h.bf16 %v3265_v7 }
 0x524   : > { %v3169_v61 = vmax.f32 %v2967_v42, 0.0 }
 0x525   : > { %v3579_v56 = vpack.c.bf16 %v3500_v44, %v3499_v17  ;;  %v2798_v10 = vpop.f32.mrf.mxu0  ;;  %v3170_v38 = vmax.f32 %v3056_v46, 0.0 }
 0x526   : > { %v2799_v3 = vadd.f32 %v2798_v10, %v6323_v62  ;;  %v2887_v15 = vpop.f32.mrf.mxu1  ;;  %v3489_v37 = vadd.f32 %v3361_v14, %v3169_v61  ;;  %v3260_v61 = vld [vmem:[%s6017_s30 + $0x188] sm:$0xff] }
 0x527   : > { %3643 = vst [vmem:[%s6032_s12 + $0x180] sm:$0xff] %v3579_v56  ;;  %v2888_v34 = vadd.f32 %v2887_v15, %v6323_v62  ;;  %v3490_v2 = vadd.f32 %v3362_v54, %v3170_v38  ;;  %v3267_v38 = vld [vmem:[%s6017_s30 + $0x1c0] sm:$0xff]  ;;  %v3374_v0 = vunpack.c.h.bf16 %v3260_v61 }
 0x528   : > { %v3183_v52 = vmax.f32 %v2799_v3, 0.0 }
 0x529   : > { %v3184_v12 = vmax.f32 %v2888_v34, 0.0  ;;  %v3574_v40 = vpack.c.bf16 %v3490_v2, %v3489_v37  ;;  %v2969_v11 = vpop.f32.mrf.mxu2 }
 0x52a   : > { %v3503_v49 = vadd.f32 %v3375_v43, %v3183_v52  ;;  %v2970_v45 = vadd.f32 %v2969_v11, %v6293_v13  ;;  %v3058_v24 = vpop.f32.mrf.mxu3  ;;  %v6353_v52 = vpop.permute.xlu2 %2613  ;;  %v3387_v11 = vunpack.c.l.bf16 %v3267_v38 }
 0x52b   : > { %v3504_v35 = vadd.f32 %v3376_v4, %v3184_v12  ;;  %3638 = vst [vmem:[%s6032_s12 + $0x158] sm:$0xff] %v3574_v40  ;;  %v3059_v36 = vadd.f32 %v3058_v24, %v6293_v13  ;;  %v3373_v4 = vunpack.c.l.bf16 %v3260_v61  ;;  %v3388_v24 = vunpack.c.h.bf16 %v3267_v38 }
 0x52c   : > { %v3173_v51 = vmax.f32 %v2970_v45, 0.0 }
 0x52d   : > { %v3581_v47 = vpack.c.bf16 %v3504_v35, %v3503_v49  ;;  %v2801_v33 = vpop.f32.mrf.mxu0  ;;  %v3174_v32 = vmax.f32 %v3059_v36, 0.0 }
 0x52e   : > { %v2802_v23 = vadd.f32 %v2801_v33, %v6333_v19  ;;  %v2890_v59 = vpop.f32.mrf.mxu1  ;;  %v3493_v53 = vadd.f32 %v3365_v18, %v3173_v51  ;;  %v3262_v51 = vld [vmem:[%s6017_s30 + $0x198] sm:$0xff] }
 0x52f   : > { %3645 = vst [vmem:[%s6032_s12 + $0x190] sm:$0xff] %v3581_v47  ;;  %v2891_v27 = vadd.f32 %v2890_v59, %v6333_v19  ;;  %v3494_v16 = vadd.f32 %v3366_v22, %v3174_v32  ;;  %v3269_v32 = vld [vmem:[%s6017_s30 + $0x1d0] sm:$0xff]  ;;  %v3378_v21 = vunpack.c.h.bf16 %v3262_v51 }
 0x530   : > { %v3187_v30 = vmax.f32 %v2802_v23, 0.0 }
 0x531   : > { %v3188_v41 = vmax.f32 %v2891_v27, 0.0  ;;  %v3576_v31 = vpack.c.bf16 %v3494_v16, %v3493_v53  ;;  %v2971_v50 = vpop.f32.mrf.mxu2 }
 0x532   : > { %v3507_v13 = vadd.f32 %v3379_v9, %v3187_v30  ;;  %v2972_v55 = vadd.f32 %v2971_v50, %v6303_v39  ;;  %v3060_v63 = vpop.f32.mrf.mxu3  ;;  %v6363_v30 = vpop.permute.xlu0 %2618  ;;  %v3391_v50 = vunpack.c.l.bf16 %v3269_v32 }
 0x533   : > { %v3508_v58 = vadd.f32 %v3380_v8, %v3188_v41  ;;  %3640 = vst [vmem:[%s6032_s12 + $0x168] sm:$0xff] %v3576_v31  ;;  %v3061_v20 = vadd.f32 %v3060_v63, %v6303_v39  ;;  %v3377_v8 = vunpack.c.l.bf16 %v3262_v51  ;;  %v3392_v63 = vunpack.c.h.bf16 %v3269_v32 }
 0x534   : > { %v3177_v29 = vmax.f32 %v2972_v55, 0.0 }
 0x535   : > { %v3583_v25 = vpack.c.bf16 %v3508_v58, %v3507_v13  ;;  %v2803_v17 = vpop.f32.mrf.mxu0  ;;  %v3178_v42 = vmax.f32 %v3061_v20, 0.0 }
 0x536   : > { %v2804_v44 = vadd.f32 %v2803_v17, %v6343_v5  ;;  %v2892_v1 = vpop.f32.mrf.mxu1  ;;  %v3497_v56 = vadd.f32 %v3369_v57, %v3177_v29  ;;  %v3264_v29 = vld [vmem:[%s6017_s30 + $0x1a8] sm:$0xff] }
 0x537   : > { %3647 = vst [vmem:[%s6032_s12 + $0x1a0] sm:$0xff] %v3583_v25  ;;  %v2893_v14 = vadd.f32 %v2892_v1, %v6343_v5  ;;  %v3498_v54 = vadd.f32 %v3370_v60, %v3178_v42  ;;  %v3271_v42 = vld [vmem:[%s6017_s30 + $0x1e0] sm:$0xff]  ;;  %v3382_v61 = vunpack.c.h.bf16 %v3264_v29 }
 0x538   : > { %v3191_v46 = vmax.f32 %v2804_v44, 0.0 }
 0x539   : > { %v3192_v10 = vmax.f32 %v2893_v14, 0.0  ;;  %v3578_v3 = vpack.c.bf16 %v3498_v54, %v3497_v56  ;;  %v2974_v15 = vpop.f32.mrf.mxu2 }
 0x53a   : > { %v3511_v39 = vadd.f32 %v3383_v6, %v3191_v46  ;;  %v2975_v34 = vadd.f32 %v2974_v15, %v6313_v26  ;;  %v3063_v37 = vpop.f32.mrf.mxu3  ;;  %v6373_v46 = vpop.permute.xlu1 %2623  ;;  %v3395_v15 = vunpack.c.l.bf16 %v3271_v42 }
 0x53b   : > { %v3512_v43 = vadd.f32 %v3384_v28, %v3192_v10  ;;  %3642 = vst [vmem:[%s6032_s12 + $0x178] sm:$0xff] %v3578_v3  ;;  %v3064_v12 = vadd.f32 %v3063_v37, %v6313_v26  ;;  %v3381_v28 = vunpack.c.l.bf16 %v3264_v29  ;;  %v3396_v37 = vunpack.c.h.bf16 %v3271_v42 }
 0x53c   : > { %v3181_v40 = vmax.f32 %v2975_v34, 0.0 }
 0x53d   : > { %v3585_v2 = vpack.c.bf16 %v3512_v43, %v3511_v39  ;;  %v2806_v49 = vpop.f32.mrf.mxu0  ;;  %v3182_v45 = vmax.f32 %v3064_v12, 0.0 }
 0x53e   : > { %v2807_v35 = vadd.f32 %v2806_v49, %v6353_v52  ;;  %v2895_v48 = vpop.f32.mrf.mxu1  ;;  %v3501_v47 = vadd.f32 %v3373_v4, %v3181_v40  ;;  %v3266_v40 = vld [vmem:[%s6017_s30 + $0x1b8] sm:$0xff] }
 0x53f   : > { %3649 = vst [vmem:[%s6032_s12 + $0x1b0] sm:$0xff] %v3585_v2  ;;  %v2896_v18 = vadd.f32 %v2895_v48, %v6353_v52  ;;  %v3502_v22 = vadd.f32 %v3374_v0, %v3182_v45  ;;  %v3273_v45 = vld [vmem:[%s6017_s30 + $0x1f0] sm:$0xff]  ;;  %v3386_v51 = vunpack.c.h.bf16 %v3266_v40 }
 0x540   : > { %v3195_v36 = vmax.f32 %v2807_v35, 0.0 }
 0x541   : > { %v3196_v33 = vmax.f32 %v2896_v18, 0.0  ;;  %v3580_v23 = vpack.c.bf16 %v3502_v22, %v3501_v47  ;;  %v2976_v59 = vpop.f32.mrf.mxu2 }
 0x542   : > { %v3515_v26 = vadd.f32 %v3387_v11, %v3195_v36  ;;  %v2977_v27 = vadd.f32 %v2976_v59, %v6323_v62  ;;  %v3065_v53 = vpop.f32.mrf.mxu3  ;;  %v6383_v36 = vpop.permute.xlu2 %2628  ;;  %v3399_v59 = vunpack.c.l.bf16 %v3273_v45 }
 0x543   : > { %v3516_v9 = vadd.f32 %v3388_v24, %v3196_v33  ;;  %3644 = vst [vmem:[%s6032_s12 + $0x188] sm:$0xff] %v3580_v23  ;;  %v3066_v41 = vadd.f32 %v3065_v53, %v6323_v62  ;;  %v3385_v24 = vunpack.c.l.bf16 %v3266_v40  ;;  %v3400_v53 = vunpack.c.h.bf16 %v3273_v45 }
 0x544   : > { %v3185_v31 = vmax.f32 %v2977_v27, 0.0 }
 0x545   : > { %v3587_v16 = vpack.c.bf16 %v3516_v9, %v3515_v26  ;;  %v2808_v13 = vpop.f32.mrf.mxu0  ;;  %v3186_v55 = vmax.f32 %v3066_v41, 0.0 }
 0x546   : > { %v2809_v58 = vadd.f32 %v2808_v13, %v6363_v30  ;;  %v2897_v7 = vpop.f32.mrf.mxu1  ;;  %v3505_v25 = vadd.f32 %v3377_v8, %v3185_v31  ;;  %v3268_v31 = vld [vmem:[%s6017_s30 + $0x1c8] sm:$0xff] }
 0x547   : > { %3651 = vst [vmem:[%s6032_s12 + $0x1c0] sm:$0xff] %v3587_v16  ;;  %v2898_v57 = vadd.f32 %v2897_v7, %v6363_v30  ;;  %v3506_v60 = vadd.f32 %v3378_v21, %v3186_v55 }
 0x548   : > { %v3199_v20 = vmax.f32 %v2809_v58, 0.0 }
 0x549   : > { %v3200_v17 = vmax.f32 %v2898_v57, 0.0  ;;  %v3582_v44 = vpack.c.bf16 %v3506_v60, %v3505_v25  ;;  %v2979_v1 = vpop.f32.mrf.mxu2  ;;  %v3389_v57 = vunpack.c.l.bf16 %v3268_v31  ;;  %v3390_v60 = vunpack.c.h.bf16 %v3268_v31 }
 0x54a   : > { %v3519_v62 = vadd.f32 %v3391_v50, %v3199_v20  ;;  %v2980_v14 = vadd.f32 %v2979_v1, %v6333_v19  ;;  %v3068_v56 = vpop.f32.mrf.mxu3 }
 0x54b   : > { %v3520_v6 = vadd.f32 %v3392_v63, %v3200_v17  ;;  %3646 = vst [vmem:[%s6032_s12 + $0x198] sm:$0xff] %v3582_v44  ;;  %v3069_v10 = vadd.f32 %v3068_v56, %v6333_v19 }
 0x54c   : > { %v3189_v3 = vmax.f32 %v2980_v14, 0.0 }
 0x54d   : > { %v3589_v54 = vpack.c.bf16 %v3520_v6, %v3519_v62  ;;  %v2811_v39 = vpop.f32.mrf.mxu0  ;;  %v3190_v34 = vmax.f32 %v3069_v10, 0.0  ;;  %v3270_v6 = vld [vmem:[%s6017_s30 + $0x1d8] sm:$0xff] }
 0x54e   : > { %v2812_v43 = vadd.f32 %v2811_v39, %v6373_v46  ;;  %v2900_v38 = vpop.f32.mrf.mxu1  ;;  %v3509_v2 = vadd.f32 %v3381_v28, %v3189_v3  ;;  %v3393_v28 = vunpack.c.l.bf16 %v3270_v6  ;;  %v3394_v10 = vunpack.c.h.bf16 %v3270_v6 }
 0x54f   : > { %3653 = vst [vmem:[%s6032_s12 + $0x1d0] sm:$0xff] %v3589_v54  ;;  %v2901_v4 = vadd.f32 %v2900_v38, %v6373_v46  ;;  %v3510_v0 = vadd.f32 %v3382_v61, %v3190_v34 }
 0x550   : > { %v3203_v12 = vmax.f32 %v2812_v43, 0.0  ;;  %v3272_v43 = vld [vmem:[%s6017_s30 + $0x1e8] sm:$0xff] }
 0x551   : > { %v3204_v49 = vmax.f32 %v2901_v4, 0.0  ;;  %v3584_v35 = vpack.c.bf16 %v3510_v0, %v3509_v2  ;;  %v2981_v48 = vpop.f32.mrf.mxu2  ;;  %v3397_v4 = vunpack.c.l.bf16 %v3272_v43 }
 0x552   : > { %v3523_v19 = vadd.f32 %v3395_v15, %v3203_v12  ;;  %v2982_v18 = vadd.f32 %v2981_v48, %v6343_v5  ;;  %v3070_v47 = vpop.f32.mrf.mxu3  ;;  %v3398_v12 = vunpack.c.h.bf16 %v3272_v43 }
 0x553   : > { %v3524_v11 = vadd.f32 %v3396_v37, %v3204_v49  ;;  %3648 = vst [vmem:[%s6032_s12 + $0x1a8] sm:$0xff] %v3584_v35  ;;  %v3071_v33 = vadd.f32 %v3070_v47, %v6343_v5 }
 0x554   : > { %v3193_v23 = vmax.f32 %v2982_v18, 0.0 }
 0x555   : > { %v3591_v22 = vpack.c.bf16 %v3524_v11, %v3523_v19  ;;  %v2813_v26 = vpop.f32.mrf.mxu0  ;;  %v3194_v27 = vmax.f32 %v3071_v33, 0.0  ;;  %v3274_v19 = vld [vmem:[%s6017_s30 + $0x1f8] sm:$0xff]  ;;  %s3676_s30 = sshll.u32 %s3673_s23, 4  ;;  %s3677_s30 = int_to_ptr.hbm [resolvable:$true] %s3676_s30 }
 0x556   : > { %v2814_v9 = vadd.f32 %v2813_v26, %v6383_v36  ;;  %v2902_v32 = vpop.f32.mrf.mxu1  ;;  %v3513_v16 = vadd.f32 %v3385_v24, %v3193_v23  ;;  %v3401_v45 = vunpack.c.l.bf16 %v3274_v19  ;;  %v3402_v24 = vunpack.c.h.bf16 %v3274_v19  ;;  %s4348_s15 = sshra.s32 %s3677_s30, 4  ;;  %s4349_s15 = int_to_ptr.hbm [resolvable:$true] %s4348_s15 }
 0x557   : > { %3655 = vst [vmem:[%s6032_s12 + $0x1e0] sm:$0xff] %v3591_v22  ;;  %v2903_v8 = vadd.f32 %v2902_v32, %v6383_v36  ;;  %v3514_v21 = vadd.f32 %v3386_v51, %v3194_v27  ;;  %s4350_s14 = scalar_lea.hbm %s4349_s15, 512  ;;  %p4355_p8 = scmp.lt.s32.totalorder %s4349_s15, %s6678_s13 }
 0x558   : > { %v3207_v41 = vmax.f32 %v2814_v9, 0.0  ;;  %p4351_p5 = scmp.ne.s32.totalorder %s4349_s15, %s4350_s14  ;;  %p4356_p10 = scmp.lt.s32.totalorder %s4354_s9, %s4350_s14 }
 0x559   : > { %v3208_v13 = vmax.f32 %v2903_v8, 0.0  ;;  %v3586_v58 = vpack.c.bf16 %v3514_v21, %v3513_v16  ;;  %v2984_v7 = vpop.f32.mrf.mxu2 }
 0x55a   : > { %v3527_v5 = vadd.f32 %v3399_v59, %v3207_v41  ;;  %v2985_v55 = vadd.f32 %v2984_v7, %v6353_v52  ;;  %v3073_v63 = vpop.f32.mrf.mxu3  ;;  %p4352_p6 = pnand %p4351_p5, %p4568_p9  ;;  %p4357_p13 = por %p4356_p10, %p4355_p8 }
 0x55b   : > { %v3528_v50 = vadd.f32 %v3400_v53, %v3208_v13  ;;  %3650 = vst [vmem:[%s6032_s12 + $0x1b8] sm:$0xff] %v3586_v58  ;;  %v3074_v20 = vadd.f32 %v3073_v63, %v6353_v52 }
 0x55c   : > { %v3197_v17 = vmax.f32 %v2985_v55, 0.0  ;;  %p4353_p7 = pneg %p4352_p6 }
 0x55d   : > { %v3593_v25 = vpack.c.bf16 %v3528_v50, %v3527_v5  ;;  %v3198_v29 = vmax.f32 %v3074_v20, 0.0 }
 0x55e   : > { %v3517_v62 = vadd.f32 %v3389_v57, %v3197_v17  ;;  %p4358_p0 = pnand %p4357_p13, %p4353_p7 }
 0x55f   : > { %3657 = vst [vmem:[%s6032_s12 + $0x1f0] sm:$0xff] %v3593_v25  ;;  %v3518_v44 = vadd.f32 %v3390_v60, %v3198_v29 }
 0x561   : > { %v3588_v1 = vpack.c.bf16 %v3518_v44, %v3517_v62  ;;  %v2986_v42 = vpop.f32.mrf.mxu2 }
 0x562   : > { %v2987_v14 = vadd.f32 %v2986_v42, %v6363_v30  ;;  %v3075_v56 = vpop.f32.mrf.mxu3 }
 0x563   : > { %3652 = vst [vmem:[%s6032_s12 + $0x1c8] sm:$0xff] %v3588_v1  ;;  %v3076_v54 = vadd.f32 %v3075_v56, %v6363_v30 }
 0x564   : > { %v3201_v52 = vmax.f32 %v2987_v14, 0.0 }
 0x565   : > { %v3202_v61 = vmax.f32 %v3076_v54, 0.0 }
 0x566   : > { %v3521_v39 = vadd.f32 %v3393_v28, %v3201_v52 }
 0x567   : > { %v3522_v3 = vadd.f32 %v3394_v10, %v3202_v61 }
 0x569   : > { %v3590_v15 = vpack.c.bf16 %v3522_v3, %v3521_v39  ;;  %v2989_v38 = vpop.f32.mrf.mxu2 }
 0x56a   : > { %v2990_v34 = vadd.f32 %v2989_v38, %v6373_v46  ;;  %v3078_v37 = vpop.f32.mrf.mxu3 }
 0x56b   : > { %3654 = vst [vmem:[%s6032_s12 + $0x1d8] sm:$0xff] %v3590_v15  ;;  %v3079_v2 = vadd.f32 %v3078_v37, %v6373_v46 }
 0x56c   : > { %v3205_v30 = vmax.f32 %v2990_v34, 0.0 }
 0x56d   : > { %v3206_v0 = vmax.f32 %v3079_v2, 0.0 }
 0x56e   : > { %v3525_v49 = vadd.f32 %v3397_v4, %v3205_v30 }
 0x56f   : > { %v3526_v40 = vadd.f32 %v3398_v12, %v3206_v0 }
 0x571   : > { %v3592_v35 = vpack.c.bf16 %v3526_v40, %v3525_v49  ;;  %v2991_v11 = vpop.f32.mrf.mxu2 }
 0x572   : > { %v2992_v48 = vadd.f32 %v2991_v11, %v6383_v36  ;;  %v3080_v18 = vpop.f32.mrf.mxu3 }
 0x573   : > { %3656 = vst [vmem:[%s6032_s12 + $0x1e8] sm:$0xff] %v3592_v35  ;;  %v3081_v46 = vadd.f32 %v3080_v18, %v6383_v36 }
 0x574   : > { %v3209_v47 = vmax.f32 %v2992_v48, 0.0 }
 0x575   : > { %v3210_v22 = vmax.f32 %v3081_v46, 0.0 }
 0x576   : > { %v3529_v33 = vadd.f32 %v3401_v45, %v3209_v47 }
 0x577   : > { %v3530_v51 = vadd.f32 %v3402_v24, %v3210_v22 }
 0x579   : > { %v3594_v26 = vpack.c.bf16 %v3530_v51, %v3529_v33 }
 0x57b   : > { %3658 = vst [vmem:[%s6032_s12 + $0x1f8] sm:$0xff] %v3594_v26 }
 0x57c   : > { %4361 = shalt.err (!%p4358_p0)
}
 0x57d   : > { %s4426_s3 = smov 256   ;;  %s4427_s12 = smov 16  }
 0x57e   : > { %4169 = dma.vmem_to_hbm [thread:$0]  (%p4568_p9), %s3675_s24, 8192, %s3677_s30, %s3660_s21, %s4426_s3, %s4426_s3, %s4427_s12  }
 0x57f PF: > { %s6680_s8 = sld [smem:[#allocation12_spill]]  ;;  %p4182_p1 = pnand %p3870_p12, %p4575_p11 }
 0x580   : > { %s6682_s23 = sld [smem:[#allocation14_spill]] }
 0x581   : > { %p4183_p2 = pneg %p4182_p1 }
 0x585   : > { %s3691_s0 = sand.u32 1, %s6680_s8  }
 0x586   : > { %s3692_s28 = scalar_lea.sflag [#allocation4], %s3691_s0 }
 0x587   : > { %4395 = dma.done.wait (%p4183_p2), %s3692_s28, 8192  }
 0x588   : > { %4397 = vsyncadd (%p4183_p2), %s3692_s28, 4294959104  ;;  %s35_s26 = sadd.s32 1, %s6682_s23   ;;  %s6683_s15 = sld [smem:[#allocation13_spill]] }
 0x589   : > { %p32_p3 = scmp.ge.s32.totalorder %s35_s26, 4   ;;  %s6684_s23 = sld [smem:[#allocation17_spill]] }
 0x58a   : > { %s6685_s30 = sld [smem:[#allocation15_spill]]  ;;  %s6686_s21 = smov %s4404_s22 }
 0x58b   : > { %s6688_s24 = smov %s4416_s25 }
 0x58c   :  { %34 = sbr.rel (!%p32_p3) target bundleno = 23 (0x17), region = 162 }
 0x58e   : > { %s6687_s22 = smov %s6683_s15 }
 0x590   : > { %s6689_s25 = smov %s6685_s30 }
 0x591   :  { %3698 = vsyncpa [#allocation3], 1 }
 0x592   :  { %3700 = vsyncpa [#allocation3 + $0x1], 1 }
 0x593   :  { %3701 = vsyncpa [#allocation6], 1 }
 0x594   :  { %3703 = vsyncpa [#allocation6 + $0x1], 1 }
 0x595   :  { %3704 = vsyncpa [#allocation4], 1 }
 0x596   :  { %3706 = vsyncpa [#allocation4 + $0x1], 1 }

</bundles_post_ra>
